<compile_context>
chip_gen: v7x
topology: tpu7x:2x2x1
jax: 0.10.0
libtpu: 0.0.40
codegen_flags: <defaults>
</compile_context>

<pallas_src>
import jax
import jax.numpy as jnp
from jax import lax
from jax.experimental import pallas as pl
from jax.experimental.pallas import tpu as pltpu

EMB = 512                      # per-backbone, per-task embedding width
NUM_TASKS = 6                  # spectacles, facial_hair, pose, emotion, gender, id
FUSED_EMB = NUM_TASKS * EMB    # 3072
SMALL_COLS = 16                # packed small-head output: 10 logits + norm + pad
MAG_LA = 10.0                  # MagFace feature-norm clamp (lower)
MAG_UA = 110.0                 # MagFace feature-norm clamp (upper)
ID_TILE_N = 2048               # class-dim tile for the id matmul (bf16 weights)
VMEM_LIMIT = 32 * 1024 * 1024  # explicit scoped-VMEM budget (portable on all gens)


# ----------------------------------------------------------------------------
# Kernel A: fused backbone stand-in + small heads + MagFace norm + normalized id
# ----------------------------------------------------------------------------
def _fused_kernel(x_ref, w1_ref, b1_ref, w2_ref, b2_ref,
                  wbd1_ref, wbd2_ref, bsm_ref,
                  packed_ref, idn_ref):
    # x_ref:   [B, 2, C, H*W]            w{1,2}_ref: [C, 3072]
    # b{1,2}:  [1, 3072]                 wbd{1,2}:   [3072, 16] (block-diag)
    # bsm_ref: [1, 16]
    # packed_ref: [B, 16] f32 (10 logits, col 10 = clamped ||id||)
    # idn_ref:    [B, 1024] bf16 (pre-normalized concatenated id embedding)
    x = x_ref[...]                                       # [B, 2, C, HW]
    inv_hw = 1.0 / float(x.shape[-1])
    pooled = jnp.sum(x, axis=-1) * inv_hw                # [B, 2, C]
    p1 = pooled[:, 0, :]                                 # [B, C]
    p2 = pooled[:, 1, :]

    e1 = jnp.dot(p1, w1_ref[...], preferred_element_type=jnp.float32) + b1_ref[...]
    e2 = jnp.dot(p2, w2_ref[...], preferred_element_type=jnp.float32) + b2_ref[...]

    # Five Linear(1024, 2) heads fused into one matmul per stream
    logits = (jnp.dot(e1, wbd1_ref[...], preferred_element_type=jnp.float32)
              + jnp.dot(e2, wbd2_ref[...], preferred_element_type=jnp.float32)
              + bsm_ref[...])                            # [B, 16]

    # MagFace feature norm of the id embedding (task index 5); no concat needed
    id1 = e1[:, 5 * EMB:]                                # [B, 512]
    id2 = e2[:, 5 * EMB:]
    ss = (jnp.sum(id1 * id1, axis=1, keepdims=True)
          + jnp.sum(id2 * id2, axis=1, keepdims=True))   # [B, 1]
    norm_c = jnp.clip(jnp.sqrt(ss), MAG_LA, MAG_UA)
    inv_norm = lax.rsqrt(jnp.maximum(ss, 1e-24))         # EUP rsqrt, hoisted here

    col = lax.broadcasted_iota(jnp.int32, (1, SMALL_COLS), 1)
    packed_ref[...] = jnp.where(col == 10, norm_c, logits)  # single lane-dense store

    # Pre-normalized, concatenated id embedding (bf16: native MXU path downstream)
    idn_ref[:, :EMB] = (id1 * inv_norm).astype(idn_ref.dtype)
    idn_ref[:, EMB:] = (id2 * inv_norm).astype(idn_ref.dtype)


def fused_backbone_heads(x4, w1f, b1f, w2f, b2f, w1_bd, w2_bd, b_small):
    B, _, C, HW = x4.shape
    return pl.pallas_call(
        _fused_kernel,
        out_shape=(jax.ShapeDtypeStruct((B, SMALL_COLS), jnp.float32),
                   jax.ShapeDtypeStruct((B, 2 * EMB), jnp.bfloat16)),
        grid=(1,),
        in_specs=[
            pl.BlockSpec((B, 2, C, HW), lambda i: (0, 0, 0, 0)),
            pl.BlockSpec((C, FUSED_EMB), lambda i: (0, 0)),
            pl.BlockSpec((1, FUSED_EMB), lambda i: (0, 0)),
            pl.BlockSpec((C, FUSED_EMB), lambda i: (0, 0)),
            pl.BlockSpec((1, FUSED_EMB), lambda i: (0, 0)),
            pl.BlockSpec((FUSED_EMB, SMALL_COLS), lambda i: (0, 0)),
            pl.BlockSpec((FUSED_EMB, SMALL_COLS), lambda i: (0, 0)),
            pl.BlockSpec((1, SMALL_COLS), lambda i: (0, 0)),
        ],
        out_specs=(pl.BlockSpec((B, SMALL_COLS), lambda i: (0, 0)),
                   pl.BlockSpec((B, 2 * EMB), lambda i: (0, 0))),
        compiler_params=pltpu.CompilerParams(vmem_limit_bytes=VMEM_LIMIT),
    )(x4, w1f, b1f, w2f, b2f, w1_bd, w2_bd, b_small)


# ----------------------------------------------------------------------------
# Kernel B: MagLinear id head, tiled over num_classes ("parallel" grid axis)
#   logits = (x_normalized_bf16 @ W_bf16) * inv_colnorm     (f32 accumulation)
# ----------------------------------------------------------------------------
def _id_head_kernel(xn_ref, w_ref, invc_ref, out_ref):
    # xn_ref: [B, 1024] bf16   w_ref: [1024, TN] bf16
    # invc_ref: [1, TN] f32    out_ref: [B, TN] f32
    raw = jnp.dot(xn_ref[...], w_ref[...], preferred_element_type=jnp.float32)
    out_ref[...] = raw * invc_ref[...]                   # lane-dense store


def id_head(xn, wid_pad, invc_pad, tile_n):
    B = xn.shape[0]
    k, nc_pad = wid_pad.shape
    grid_n = nc_pad // tile_n
    return pl.pallas_call(
        _id_head_kernel,
        out_shape=jax.ShapeDtypeStruct((B, nc_pad), jnp.float32),
        grid=(grid_n,),
        in_specs=[
            pl.BlockSpec((B, k), lambda j: (0, 0)),
            pl.BlockSpec((k, tile_n), lambda j: (0, j)),
            pl.BlockSpec((1, tile_n), lambda j: (0, j)),
        ],
        out_specs=pl.BlockSpec((B, tile_n), lambda j: (0, j)),
        compiler_params=pltpu.CompilerParams(
            dimension_semantics=("parallel",),
            vmem_limit_bytes=VMEM_LIMIT),
    )(xn, wid_pad, invc_pad)


# ----------------------------------------------------------------------------
# Full forward (mirrors ConcatMTLFaceRecognitionV2.forward)
# ----------------------------------------------------------------------------
def _round_up(n, m):
    return pl.cdiv(n, m) * m


def _pick_class_tile(nc_pad128, max_tile):
    # largest multiple of 128 that divides nc_pad128 and is <= max_tile
    m = nc_pad128 // 128
    best = 1
    for d in range(1, m + 1):
        if m % d == 0 and 128 * d <= max_tile:
            best = d
    return 128 * best


def _block_diag_small(w_part):
    # w_part: [5, EMB, 2] -> [3072, 16] block-diagonal (cols 10..15 zero)
    eye5 = jnp.eye(5, dtype=w_part.dtype)
    bd = jnp.einsum("teo,ts->teso", w_part, eye5).reshape(5 * EMB, 10)
    out = jnp.zeros((FUSED_EMB, SMALL_COLS), w_part.dtype)
    return out.at[:5 * EMB, :10].set(bd)


@jax.jit
def concat_mtl_forward(x, bb1_w, bb1_b, bb2_w, bb2_b, w5, b5, wid):
    B, _, C, H, W = x.shape
    num_classes = wid.shape[1]

    # ---- layout plumbing (wrapper-side, parameter-only except a free reshape) --
    x4 = x.reshape(B, 2, C, H * W)                   # contiguous reshape, no copy

    def pack_bb(w, b):  # (6, C, EMB) -> (C, 3072) ; (6, EMB) -> (1, 3072)
        return (jnp.transpose(w, (1, 0, 2)).reshape(C, FUSED_EMB),
                b.reshape(1, FUSED_EMB))

    w1f, b1f = pack_bb(bb1_w, bb1_b)
    w2f, b2f = pack_bb(bb2_w, bb2_b)

    w1_bd = _block_diag_small(w5[:, :EMB, :])        # stream-1 half of the 5 heads
    w2_bd = _block_diag_small(w5[:, EMB:, :])        # stream-2 half
    b_small = jnp.zeros((1, SMALL_COLS), w5.dtype).at[0, :10].set(b5.reshape(10))

    # MagLinear: fold weight column norms outside the kernel; stream weight as bf16
    inv_colnorm = lax.rsqrt(jnp.maximum(jnp.sum(wid * wid, axis=0), 1e-24))
    nc_pad = _round_up(num_classes, 128)
    tile_n = _pick_class_tile(nc_pad, ID_TILE_N)
    wid_pad = (jnp.zeros((2 * EMB, nc_pad), jnp.bfloat16)
               .at[:, :num_classes].set(wid.astype(jnp.bfloat16)))
    invc_pad = (jnp.ones((1, nc_pad), jnp.float32)
                .at[0, :num_classes].set(inv_colnorm.astype(jnp.float32)))

    # ---- kernels ---------------------------------------------------------------
    packed, id_norm_emb = fused_backbone_heads(
        x4, w1f, b1f, w2f, b2f, w1_bd, w2_bd, b_small)     # [B,16], [B,1024] bf16

    id_logits_pad = id_head(id_norm_emb, wid_pad, invc_pad, tile_n)  # [B, nc_pad]
    id_logits = (id_logits_pad if nc_pad == num_classes
                 else id_logits_pad[:, :num_classes])      # <=127 pad cols removed

    # ---- unpack ----------------------------------------------------------------
    x_spectacles = packed[:, 0:2]
    x_facial_hair = packed[:, 2:4]
    x_pose = packed[:, 4:6]
    x_emotion = packed[:, 6:8]
    x_gender = packed[:, 8:10]
    x_id_norm = packed[:, 10:11]
    return (x_spectacles, x_facial_hair, x_pose, x_emotion, x_gender,
            id_logits, x_id_norm)


# ----------------------------------------------------------------------------
# pure-JAX reference for a sanity check
# ----------------------------------------------------------------------------
def ref_forward(x, bb1_w, bb1_b, bb2_w, bb2_b, w5, b5, wid):
    def bb(xb, w, b):
        pooled = xb.mean(axis=(2, 3))                               # [B, C]
        return jnp.einsum("bc,tce->bte", pooled, w) + b[None]       # [B, 6, 512]

    e1 = bb(x[:, 0], bb1_w, bb1_b)
    e2 = bb(x[:, 1], bb2_w, bb2_b)
    small = []
    for t in range(5):
        cat = jnp.concatenate([e1[:, t, :], e2[:, t, :]], axis=1)
        small.append(cat @ w5[t] + b5[t])
    id_cat = jnp.concatenate([e1[:, 5, :], e2[:, 5, :]], axis=1)
    x_norm = jnp.linalg.norm(id_cat, axis=1, keepdims=True)
    id_logits = (id_cat / x_norm) @ (wid / jnp.linalg.norm(wid, axis=0, keepdims=True))
    return (*small, id_logits, jnp.clip(x_norm, MAG_LA, MAG_UA))


if __name__ == "__main__":
    B, C, H, W = 2, 4, 16, 16
    NUM_CLASSES = 16

    key = jax.random.PRNGKey(0)
    ks = jax.random.split(key, 8)

    # input: [B, 2 streams, C, H, W]
    x = jax.random.normal(ks[0], (B, 2, C, H, W), jnp.float32)

    # stand-in backbone parameters (two independent backbones)
    bb1_w = 0.05 * jax.random.normal(ks[1], (NUM_TASKS, C, EMB), jnp.float32)
    bb1_b = 0.01 * jax.random.normal(ks[2], (NUM_TASKS, EMB), jnp.float32)
    bb2_w = 0.05 * jax.random.normal(ks[3], (NUM_TASKS, C, EMB), jnp.float32)
    bb2_b = 0.01 * jax.random.normal(ks[4], (NUM_TASKS, EMB), jnp.float32)

    # head parameters, stored as (in_features, out_features)
    w5 = 0.02 * jax.random.normal(ks[5], (5, 2 * EMB, 2), jnp.float32)
    b5 = 0.01 * jax.random.normal(ks[6], (5, 2), jnp.float32)
    wid = 0.02 * jax.random.normal(ks[7], (2 * EMB, NUM_CLASSES), jnp.float32)

    outs = concat_mtl_forward(x, bb1_w, bb1_b, bb2_w, bb2_b, w5, b5, wid)
    outs = jax.block_until_ready(outs)

    refs = ref_forward(x, bb1_w, bb1_b, bb2_w, bb2_b, w5, b5, wid)
    # id logits (index 5) use bf16 weight streaming -> relaxed tolerance there.
    tols = [(1e-4, 1e-4)] * 5 + [(2e-2, 2e-2), (1e-4, 1e-4)]
    for (o, r), (atol, rtol) in zip(zip(outs, refs), tols):
        assert o.shape == r.shape, (o.shape, r.shape)
        assert jnp.allclose(o, r, atol=atol, rtol=rtol), float(jnp.max(jnp.abs(o - r)))

    print("KERNEL_OK")
</pallas_src>

<mosaic_0001>
module attributes {stable_mosaic.version = 11 : i64} {
  func.func @_fused_kernel(%arg0: i32, %arg1: memref<2x2x4x256xf32, #tpu.memory_space<vmem>>, %arg2: memref<4x3072xf32, #tpu.memory_space<vmem>>, %arg3: memref<1x3072xf32, #tpu.memory_space<vmem>>, %arg4: memref<4x3072xf32, #tpu.memory_space<vmem>>, %arg5: memref<1x3072xf32, #tpu.memory_space<vmem>>, %arg6: memref<3072x16xf32, #tpu.memory_space<vmem>>, %arg7: memref<3072x16xf32, #tpu.memory_space<vmem>>, %arg8: memref<1x16xf32, #tpu.memory_space<vmem>>, %arg9: memref<2x16xf32, #tpu.memory_space<vmem>>, %arg10: memref<2x1024xbf16, #tpu.memory_space<vmem>>) attributes {dimension_semantics = [#tpu.dimension_semantics<arbitrary>], iteration_bounds = array<i64: 1>, scalar_prefetch = 0 : i64, scratch_operands = 0 : i64, tpu.core_type = #tpu.core_type<tc>, window_params = [{pipeline_mode = #tpu.pipeline_mode<synchronous>, transform_indices = @transform_0, window_bounds = array<i64: 2, 2, 4, 256>}, {pipeline_mode = #tpu.pipeline_mode<synchronous>, transform_indices = @transform_1, window_bounds = array<i64: 4, 3072>}, {pipeline_mode = #tpu.pipeline_mode<synchronous>, transform_indices = @transform_2, window_bounds = array<i64: 1, 3072>}, {pipeline_mode = #tpu.pipeline_mode<synchronous>, transform_indices = @transform_3, window_bounds = array<i64: 4, 3072>}, {pipeline_mode = #tpu.pipeline_mode<synchronous>, transform_indices = @transform_4, window_bounds = array<i64: 1, 3072>}, {pipeline_mode = #tpu.pipeline_mode<synchronous>, transform_indices = @transform_5, window_bounds = array<i64: 3072, 16>}, {pipeline_mode = #tpu.pipeline_mode<synchronous>, transform_indices = @transform_6, window_bounds = array<i64: 3072, 16>}, {pipeline_mode = #tpu.pipeline_mode<synchronous>, transform_indices = @transform_7, window_bounds = array<i64: 1, 16>}, {pipeline_mode = #tpu.pipeline_mode<synchronous>, transform_indices = @transform_8, window_bounds = array<i64: 2, 16>}, {pipeline_mode = #tpu.pipeline_mode<synchronous>, transform_indices = @transform_9, window_bounds = array<i64: 2, 1024>}]} {
    %c0 = arith.constant 0 : index
    %c0_0 = arith.constant 0 : index
    %c0_1 = arith.constant 0 : index
    %c0_2 = arith.constant 0 : index
    %0 = vector.load %arg1[%c0, %c0_0, %c0_1, %c0_2] : memref<2x2x4x256xf32, #tpu.memory_space<vmem>>, vector<2x2x4x256xf32>
    %cst = arith.constant dense<0.000000e+00> : vector<2x2x4xf32>
    %1 = vector.multi_reduction <add>, %0, %cst [3] : vector<2x2x4x256xf32> to vector<2x2x4xf32>
    %cst_3 = arith.constant 3.906250e-03 : f32
    %2 = vector.broadcast %cst_3 : f32 to vector<2x2x4xf32>
    %3 = arith.mulf %1, %2 : vector<2x2x4xf32>
    %4 = vector.extract_strided_slice %3 {offsets = [0, 0, 0], sizes = [2, 1, 4], strides = [1, 1, 1]} : vector<2x2x4xf32> to vector<2x1x4xf32>
    %5 = vector.shape_cast %4 : vector<2x1x4xf32> to vector<2x4xf32>
    %6 = vector.extract_strided_slice %3 {offsets = [0, 1, 0], sizes = [2, 1, 4], strides = [1, 1, 1]} : vector<2x2x4xf32> to vector<2x1x4xf32>
    %7 = vector.shape_cast %6 : vector<2x1x4xf32> to vector<2x4xf32>
    %c0_4 = arith.constant 0 : index
    %c0_5 = arith.constant 0 : index
    %8 = vector.load %arg2[%c0_4, %c0_5] : memref<4x3072xf32, #tpu.memory_space<vmem>>, vector<4x3072xf32>
    %cst_6 = arith.constant dense<0.000000e+00> : vector<2x3072xf32>
    %9 = tpu.matmul %5, %8, %cst_6 {dimension_numbers = #tpu.dot_dimension_numbers<[1], [0], [0], [1], [0, 0, 1, 1], [], []>} : vector<2x4xf32>, vector<4x3072xf32>, vector<2x3072xf32> -> vector<2x3072xf32>
    %c0_7 = arith.constant 0 : index
    %c0_8 = arith.constant 0 : index
    %10 = vector.load %arg3[%c0_7, %c0_8] : memref<1x3072xf32, #tpu.memory_space<vmem>>, vector<1x3072xf32>
    %11 = vector.broadcast %10 : vector<1x3072xf32> to vector<2x3072xf32>
    %12 = arith.addf %9, %11 : vector<2x3072xf32>
    %c0_9 = arith.constant 0 : index
    %c0_10 = arith.constant 0 : index
    %13 = vector.load %arg4[%c0_9, %c0_10] : memref<4x3072xf32, #tpu.memory_space<vmem>>, vector<4x3072xf32>
    %cst_11 = arith.constant dense<0.000000e+00> : vector<2x3072xf32>
    %14 = tpu.matmul %7, %13, %cst_11 {dimension_numbers = #tpu.dot_dimension_numbers<[1], [0], [0], [1], [0, 0, 1, 1], [], []>} : vector<2x4xf32>, vector<4x3072xf32>, vector<2x3072xf32> -> vector<2x3072xf32>
    %c0_12 = arith.constant 0 : index
    %c0_13 = arith.constant 0 : index
    %15 = vector.load %arg5[%c0_12, %c0_13] : memref<1x3072xf32, #tpu.memory_space<vmem>>, vector<1x3072xf32>
    %16 = vector.broadcast %15 : vector<1x3072xf32> to vector<2x3072xf32>
    %17 = arith.addf %14, %16 : vector<2x3072xf32>
    %c0_14 = arith.constant 0 : index
    %c0_15 = arith.constant 0 : index
    %18 = vector.load %arg6[%c0_14, %c0_15] : memref<3072x16xf32, #tpu.memory_space<vmem>>, vector<3072x16xf32>
    %cst_16 = arith.constant dense<0.000000e+00> : vector<2x16xf32>
    %19 = tpu.matmul %12, %18, %cst_16 {dimension_numbers = #tpu.dot_dimension_numbers<[1], [0], [0], [1], [0, 0, 1, 1], [], []>} : vector<2x3072xf32>, vector<3072x16xf32>, vector<2x16xf32> -> vector<2x16xf32>
    %c0_17 = arith.constant 0 : index
    %c0_18 = arith.constant 0 : index
    %20 = vector.load %arg7[%c0_17, %c0_18] : memref<3072x16xf32, #tpu.memory_space<vmem>>, vector<3072x16xf32>
    %cst_19 = arith.constant dense<0.000000e+00> : vector<2x16xf32>
    %21 = tpu.matmul %17, %20, %cst_19 {dimension_numbers = #tpu.dot_dimension_numbers<[1], [0], [0], [1], [0, 0, 1, 1], [], []>} : vector<2x3072xf32>, vector<3072x16xf32>, vector<2x16xf32> -> vector<2x16xf32>
    %22 = arith.addf %19, %21 : vector<2x16xf32>
    %c0_20 = arith.constant 0 : index
    %c0_21 = arith.constant 0 : index
    %23 = vector.load %arg8[%c0_20, %c0_21] : memref<1x16xf32, #tpu.memory_space<vmem>>, vector<1x16xf32>
    %24 = vector.broadcast %23 : vector<1x16xf32> to vector<2x16xf32>
    %25 = arith.addf %22, %24 : vector<2x16xf32>
    %26 = vector.extract_strided_slice %12 {offsets = [0, 2560], sizes = [2, 512], strides = [1, 1]} : vector<2x3072xf32> to vector<2x512xf32>
    %27 = vector.extract_strided_slice %17 {offsets = [0, 2560], sizes = [2, 512], strides = [1, 1]} : vector<2x3072xf32> to vector<2x512xf32>
    %28 = arith.mulf %26, %26 : vector<2x512xf32>
    %cst_22 = arith.constant dense<0.000000e+00> : vector<2xf32>
    %29 = vector.multi_reduction <add>, %28, %cst_22 [1] : vector<2x512xf32> to vector<2xf32>
    %30 = vector.shape_cast %29 : vector<2xf32> to vector<2x1xf32>
    %31 = arith.mulf %27, %27 : vector<2x512xf32>
    %cst_23 = arith.constant dense<0.000000e+00> : vector<2xf32>
    %32 = vector.multi_reduction <add>, %31, %cst_23 [1] : vector<2x512xf32> to vector<2xf32>
    %33 = vector.shape_cast %32 : vector<2xf32> to vector<2x1xf32>
    %34 = arith.addf %30, %33 : vector<2x1xf32>
    %35 = math.sqrt %34 : vector<2x1xf32>
    %cst_24 = arith.constant 1.000000e+01 : f32
    %cst_25 = arith.constant 1.100000e+02 : f32
    %36 = vector.broadcast %cst_24 : f32 to vector<2x1xf32>
    %37 = arith.maximumf %36, %35 : vector<2x1xf32>
    %38 = vector.broadcast %cst_25 : f32 to vector<2x1xf32>
    %39 = arith.minimumf %38, %37 : vector<2x1xf32>
    %cst_26 = arith.constant 1.000000e-24 : f32
    %40 = vector.broadcast %cst_26 : f32 to vector<2x1xf32>
    %41 = arith.maximumf %34, %40 : vector<2x1xf32>
    %42 = math.rsqrt %41 : vector<2x1xf32>
    %43 = tpu.iota {dimensions = array<i32: 1>} : vector<1x16xi32>
    %c10_i32 = arith.constant 10 : i32
    %44 = vector.broadcast %c10_i32 : i32 to vector<1x16xi32>
    %45 = arith.cmpi eq, %43, %44 : vector<1x16xi32>
    %46 = vector.shape_cast %45 : vector<1x16xi1> to vector<1x16xi1>
    %47 = vector.broadcast %46 : vector<1x16xi1> to vector<2x16xi1>
    %48 = vector.shape_cast %39 : vector<2x1xf32> to vector<2x1xf32>
    %49 = vector.broadcast %48 : vector<2x1xf32> to vector<2x16xf32>
    %50 = arith.select %47, %49, %25 : vector<2x16xi1>, vector<2x16xf32>
    %c0_27 = arith.constant 0 : index
    %c0_28 = arith.constant 0 : index
    %51 = vector.load %arg9[%c0_27, %c0_28] : memref<2x16xf32, #tpu.memory_space<vmem>>, vector<2x16xf32>
    tpu.vector_store %arg9[%c0_27, %c0_28], %50 {strides = array<i32>} : memref<2x16xf32, #tpu.memory_space<vmem>>, vector<2x16xf32>,
    %52 = vector.broadcast %42 : vector<2x1xf32> to vector<2x512xf32>
    %53 = arith.mulf %26, %52 : vector<2x512xf32>
    %54 = arith.truncf %53 : vector<2x512xf32> to vector<2x512xbf16>
    %c0_29 = arith.constant 0 : index
    %c0_30 = arith.constant 0 : index
    %55 = vector.load %arg10[%c0_29, %c0_30] : memref<2x1024xbf16, #tpu.memory_space<vmem>>, vector<2x512xbf16>
    tpu.vector_store %arg10[%c0_29, %c0_30], %54 {strides = array<i32>} : memref<2x1024xbf16, #tpu.memory_space<vmem>>, vector<2x512xbf16>,
    %56 = vector.broadcast %42 : vector<2x1xf32> to vector<2x512xf32>
    %57 = arith.mulf %27, %56 : vector<2x512xf32>
    %58 = arith.truncf %57 : vector<2x512xf32> to vector<2x512xbf16>
    %c0_31 = arith.constant 0 : index
    %c512 = arith.constant 512 : index
    %59 = vector.load %arg10[%c0_31, %c512] : memref<2x1024xbf16, #tpu.memory_space<vmem>>, vector<2x512xbf16>
    tpu.vector_store %arg10[%c0_31, %c512], %58 {strides = array<i32>} : memref<2x1024xbf16, #tpu.memory_space<vmem>>, vector<2x512xbf16>,
    return
  }
  func.func @transform_0(%arg0: i32) -> (i32, i32, i32, i32) {
    %c0_i32 = arith.constant 0 : i32
    %c0_i32_0 = arith.constant 0 : i32
    %c0_i32_1 = arith.constant 0 : i32
    %c0_i32_2 = arith.constant 0 : i32
    %c0_i32_3 = arith.constant 0 : i32
    return %c0_i32, %c0_i32_0, %c0_i32_1, %c0_i32_2 : i32, i32, i32, i32
  }
  func.func @transform_1(%arg0: i32) -> (i32, i32) {
    %c0_i32 = arith.constant 0 : i32
    %c0_i32_0 = arith.constant 0 : i32
    %c0_i32_1 = arith.constant 0 : i32
    return %c0_i32, %c0_i32_0 : i32, i32
  }
  func.func @transform_2(%arg0: i32) -> (i32, i32) {
    %c0_i32 = arith.constant 0 : i32
    %c0_i32_0 = arith.constant 0 : i32
    %c0_i32_1 = arith.constant 0 : i32
    return %c0_i32, %c0_i32_0 : i32, i32
  }
  func.func @transform_3(%arg0: i32) -> (i32, i32) {
    %c0_i32 = arith.constant 0 : i32
    %c0_i32_0 = arith.constant 0 : i32
    %c0_i32_1 = arith.constant 0 : i32
    return %c0_i32, %c0_i32_0 : i32, i32
  }
  func.func @transform_4(%arg0: i32) -> (i32, i32) {
    %c0_i32 = arith.constant 0 : i32
    %c0_i32_0 = arith.constant 0 : i32
    %c0_i32_1 = arith.constant 0 : i32
    return %c0_i32, %c0_i32_0 : i32, i32
  }
  func.func @transform_5(%arg0: i32) -> (i32, i32) {
    %c0_i32 = arith.constant 0 : i32
    %c0_i32_0 = arith.constant 0 : i32
    %c0_i32_1 = arith.constant 0 : i32
    return %c0_i32, %c0_i32_0 : i32, i32
  }
  func.func @transform_6(%arg0: i32) -> (i32, i32) {
    %c0_i32 = arith.constant 0 : i32
    %c0_i32_0 = arith.constant 0 : i32
    %c0_i32_1 = arith.constant 0 : i32
    return %c0_i32, %c0_i32_0 : i32, i32
  }
  func.func @transform_7(%arg0: i32) -> (i32, i32) {
    %c0_i32 = arith.constant 0 : i32
    %c0_i32_0 = arith.constant 0 : i32
    %c0_i32_1 = arith.constant 0 : i32
    return %c0_i32, %c0_i32_0 : i32, i32
  }
  func.func @transform_8(%arg0: i32) -> (i32, i32) {
    %c0_i32 = arith.constant 0 : i32
    %c0_i32_0 = arith.constant 0 : i32
    %c0_i32_1 = arith.constant 0 : i32
    return %c0_i32, %c0_i32_0 : i32, i32
  }
  func.func @transform_9(%arg0: i32) -> (i32, i32) {
    %c0_i32 = arith.constant 0 : i32
    %c0_i32_0 = arith.constant 0 : i32
    %c0_i32_1 = arith.constant 0 : i32
    return %c0_i32, %c0_i32_0 : i32, i32
  }
}

module attributes {stable_mosaic.version = 11 : i64} {
  func.func @_id_head_kernel(%arg0: i32, %arg1: memref<2x1024xbf16, #tpu.memory_space<vmem>>, %arg2: memref<1024x128xbf16, #tpu.memory_space<vmem>>, %arg3: memref<1x128xf32, #tpu.memory_space<vmem>>, %arg4: memref<2x128xf32, #tpu.memory_space<vmem>>) attributes {dimension_semantics = [#tpu.dimension_semantics<parallel>], iteration_bounds = array<i64: 1>, scalar_prefetch = 0 : i64, scratch_operands = 0 : i64, tpu.core_type = #tpu.core_type<tc>, window_params = [{pipeline_mode = #tpu.pipeline_mode<synchronous>, transform_indices = @transform_0, window_bounds = array<i64: 2, 1024>}, {transform_indices = @transform_1, window_bounds = array<i64: 1024, 128>}, {transform_indices = @transform_2, window_bounds = array<i64: 1, 128>}, {transform_indices = @transform_3, window_bounds = array<i64: 2, 128>}]} {
    %c0 = arith.constant 0 : index
    %c0_0 = arith.constant 0 : index
    %0 = vector.load %arg1[%c0, %c0_0] : memref<2x1024xbf16, #tpu.memory_space<vmem>>, vector<2x1024xbf16>
    %c0_1 = arith.constant 0 : index
    %c0_2 = arith.constant 0 : index
    %1 = vector.load %arg2[%c0_1, %c0_2] : memref<1024x128xbf16, #tpu.memory_space<vmem>>, vector<1024x128xbf16>
    %cst = arith.constant dense<0.000000e+00> : vector<2x128xf32>
    %2 = tpu.matmul %0, %1, %cst {dimension_numbers = #tpu.dot_dimension_numbers<[1], [0], [0], [1], [0, 0, 1, 1], [], []>} : vector<2x1024xbf16>, vector<1024x128xbf16>, vector<2x128xf32> -> vector<2x128xf32>
    %c0_3 = arith.constant 0 : index
    %c0_4 = arith.constant 0 : index
    %3 = vector.load %arg3[%c0_3, %c0_4] : memref<1x128xf32, #tpu.memory_space<vmem>>, vector<1x128xf32>
    %4 = vector.broadcast %3 : vector<1x128xf32> to vector<2x128xf32>
    %5 = arith.mulf %2, %4 : vector<2x128xf32>
    %c0_5 = arith.constant 0 : index
    %c0_6 = arith.constant 0 : index
    %6 = vector.load %arg4[%c0_5, %c0_6] : memref<2x128xf32, #tpu.memory_space<vmem>>, vector<2x128xf32>
    tpu.vector_store %arg4[%c0_5, %c0_6], %5 {strides = array<i32>} : memref<2x128xf32, #tpu.memory_space<vmem>>, vector<2x128xf32>,
    return
  }
  func.func @transform_0(%arg0: i32) -> (i32, i32) {
    %c0_i32 = arith.constant 0 : i32
    %c0_i32_0 = arith.constant 0 : i32
    %c0_i32_1 = arith.constant 0 : i32
    return %c0_i32, %c0_i32_0 : i32, i32
  }
  func.func @transform_1(%arg0: i32) -> (i32, i32) {
    %c0_i32 = arith.constant 0 : i32
    %c0_i32_0 = arith.constant 0 : i32
    return %c0_i32, %arg0 : i32, i32
  }
  func.func @transform_2(%arg0: i32) -> (i32, i32) {
    %c0_i32 = arith.constant 0 : i32
    %c0_i32_0 = arith.constant 0 : i32
    return %c0_i32, %arg0 : i32, i32
  }
  func.func @transform_3(%arg0: i32) -> (i32, i32) {
    %c0_i32 = arith.constant 0 : i32
    %c0_i32_0 = arith.constant 0 : i32
    return %c0_i32, %arg0 : i32, i32
  }
}

</mosaic_0001>

<bundles_post_ra>
// kernel: concat_mtl_forward.3
= control target key start
LH: loop header
LB: loop body
LE: loop exit
PB: predicated region body
PF: predicated region fallthrough
CT: control target
= control target key end

     0   :  { %v150_v28 = vlaneseq  ;;  %v1014_v36 = vmov 1966171168   ;;  %s1259_s0 = inlined_call_operand.vmem [shape: bf16[2,1024], index: 0, kind: input, shape index: {}]   ;;  %s1260_s1 = inlined_call_operand.vmem [shape: bf16[1024,128], index: 1, kind: input, shape index: {}]   ;;  %s1261_s2 = inlined_call_operand.vmem [shape: f32[1,128], index: 2, kind: input, shape index: {}]   ;;  %s1262_s3 = inlined_call_operand.hbm [shape: f32[2,128], index: 3, kind: output, shape index: {}]  }
   0x1   :  { %v925_v0 = vld [vmem:[%s1260_s1 + $0x40] sm:$0xff]   ;;  %v929_v4 = vld [vmem:[%s1260_s1 + $0x48] sm:$0xff]   ;;  %v933_v8 = vld [vmem:[%s1260_s1 + $0x50] sm:$0xff]   ;;  %v148_v37 = vunpack.c.l.s4 %v1014_v36 }
   0x2   :  { %v926_v1 = vld [vmem:[%s1260_s1 + $0xc0] sm:$0xff]   ;;  %835 = vmatprep.subr.bf16.mxu0 %v925_v0  ;;  %v930_v5 = vld [vmem:[%s1260_s1 + $0xc8] sm:$0xff]   ;;  %v934_v9 = vld [vmem:[%s1260_s1 + $0xd0] sm:$0xff]   ;;  %v151_v33 = vshrl.u32 %v150_v28, 7 }
   0x3   :  { %v927_v2 = vld [vmem:[%s1260_s1] sm:$0xff]   ;;  %857 = vmatprep.subr.bf16.mxu1 %v926_v1  ;;  %v931_v6 = vld [vmem:[%s1260_s1 + $0x8] sm:$0xff]   ;;  %v935_v10 = vld [vmem:[%s1260_s1 + $0x10] sm:$0xff]   ;;  %v149_v40 = vunpack.c.0.s8 %v148_v37 }
   0x4   :  { %v928_v3 = vld [vmem:[%s1260_s1 + $0x80] sm:$0xff]   ;;  %836 = vmatpush3.bf16.msra.mxu0 %v927_v2  ;;  %v932_v7 = vld [vmem:[%s1260_s1 + $0x88] sm:$0xff]   ;;  %v936_v11 = vld [vmem:[%s1260_s1 + $0x90] sm:$0xff]  }
   0x5   :  { %858 = vmatpush3.bf16.msra.mxu1 %v928_v3  ;;  %837 = vmatprep.subr.bf16.mxu0 %v929_v4  ;;  %v937_v12 = vld [vmem:[%s1260_s1 + $0x58] sm:$0xff]   ;;  %v941_v16 = vld [vmem:[%s1260_s1 + $0x60] sm:$0xff]   ;;  %v945_v20 = vld [vmem:[%s1260_s1 + $0x68] sm:$0xff]   ;;  %v1141_v41 = vsub.s32 %v149_v40, %v151_v33 }
   0x6   :  { %859 = vmatprep.subr.bf16.mxu1 %v930_v5  ;;  %v938_v13 = vld [vmem:[%s1260_s1 + $0xd8] sm:$0xff]   ;;  %v942_v17 = vld [vmem:[%s1260_s1 + $0xe0] sm:$0xff]   ;;  %v946_v21 = vld [vmem:[%s1260_s1 + $0xe8] sm:$0xff]  }
   0x7   :  { %v939_v14 = vld [vmem:[%s1260_s1 + $0x18] sm:$0xff]   ;;  %v943_v18 = vld [vmem:[%s1260_s1 + $0x20] sm:$0xff]   ;;  %v947_v22 = vld [vmem:[%s1260_s1 + $0x28] sm:$0xff]  }
   0x8   :  { %838 = vmatpush3.bf16.msra.mxu0 %v931_v6  ;;  %v940_v15 = vld [vmem:[%s1260_s1 + $0x98] sm:$0xff]   ;;  %v944_v19 = vld [vmem:[%s1260_s1 + $0xa0] sm:$0xff]   ;;  %v948_v23 = vld [vmem:[%s1260_s1 + $0xa8] sm:$0xff]  }
   0x9   :  { %860 = vmatpush3.bf16.msra.mxu1 %v932_v7  ;;  %839 = vmatprep.subr.bf16.mxu0 %v933_v8  ;;  %v949_v24 = vld [vmem:[%s1260_s1 + $0x70] sm:$0xff]   ;;  %v953_v29 = vld [vmem:[%s1260_s1 + $0x78] sm:$0xff]   ;;  %v16_v34 = vld [vmem:[%s1259_s0] sm:$0xff] }
   0xa   :  { %861 = vmatprep.subr.bf16.mxu1 %v934_v9  ;;  %v950_v25 = vld [vmem:[%s1260_s1 + $0xf0] sm:$0xff]   ;;  %v954_v30 = vld [vmem:[%s1260_s1 + $0xf8] sm:$0xff]   ;;  %v958_v35 = vld [vmem:[%s1260_s1 + $0x140] sm:$0xff]   ;;  %v146_v39 = vcombine.high %v16_v34, %v16_v34  ;;  %v153_v42 = vrot.slane %v16_v34, %v1141_v41 }
   0xb   :  { %v951_v26 = vld [vmem:[%s1260_s1 + $0x30] sm:$0xff]   ;;  %v955_v31 = vld [vmem:[%s1260_s1 + $0x38] sm:$0xff]   ;;  %v959_v38 = vld [vmem:[%s1260_s1 + $0x1c0] sm:$0xff]  }
   0xc   :  { %840 = vmatpush3.bf16.msra.mxu0 %v935_v10  ;;  %v952_v27 = vld [vmem:[%s1260_s1 + $0xb0] sm:$0xff]   ;;  %v956_v32 = vld [vmem:[%s1260_s1 + $0xb8] sm:$0xff]   ;;  %v1145_v43 = vrot.slane %v146_v39, %v1141_v41  ;;  %v161_v44 = vcombine.high %v153_v42, %v153_v42  ;;  %v169_v45 = vrot.slane %v153_v42, %v1141_v41  ;;  %v960_v48 = vld [vmem:[%s1260_s1 + $0x100] sm:$0xff]  }
   0xd   :  { %862 = vmatpush3.bf16.msra.mxu1 %v936_v11  ;;  %841 = vmatprep.subr.bf16.mxu0 %v937_v12  ;;  %v962_v51 = vld [vmem:[%s1260_s1 + $0x148] sm:$0xff]   ;;  %v961_v53 = vld [vmem:[%s1260_s1 + $0x180] sm:$0xff]   ;;  %v966_v57 = vld [vmem:[%s1260_s1 + $0x150] sm:$0xff]  }
   0xe   :  { %863 = vmatprep.subr.bf16.mxu1 %v938_v13  ;;  %v162_v46 = vcombine.high %v1145_v43, %v1145_v43  ;;  %v183_v47 = vrot.slane %v161_v44, %v1141_v41  ;;  %v191_v50 = vcombine.high %v169_v45, %v169_v45  ;;  %v963_v54 = vld [vmem:[%s1260_s1 + $0x1c8] sm:$0xff]   ;;  %v967_v59 = vld [vmem:[%s1260_s1 + $0x1d0] sm:$0xff]   ;;  %v970_v61 = vld [vmem:[%s1260_s1 + $0x158] sm:$0xff]  }
   0xf   :  { %v964_v56 = vld [vmem:[%s1260_s1 + $0x108] sm:$0xff]   ;;  %v968_v60 = vld [vmem:[%s1260_s1 + $0x110] sm:$0xff]   ;;  %v971_v63 = vld [vmem:[%s1260_s1 + $0x1d8] sm:$0xff]  }
  0x10   :  { %842 = vmatpush3.bf16.msra.mxu0 %v939_v14  ;;  %v190_v49 = vrot.slane %v162_v46, %v1141_v41  ;;  %619 = vmatprep.mubr.bf16.mxu0 %v183_v47  ;;  %v193_v52 = vcombine.high %v183_v47, %v183_v47  ;;  %v965_v58 = vld [vmem:[%s1260_s1 + $0x188] sm:$0xff]   ;;  %v969_v62 = vld [vmem:[%s1260_s1 + $0x190] sm:$0xff]   ;;  %v972_v0 = vld [vmem:[%s1260_s1 + $0x118] sm:$0xff]  }
  0x11   :  { %864 = vmatpush3.bf16.msra.mxu1 %v940_v15  ;;  %843 = vmatprep.subr.bf16.mxu0 %v941_v16  ;;  %v974_v1 = vld [vmem:[%s1260_s1 + $0x160] sm:$0xff]   ;;  %v973_v2 = vld [vmem:[%s1260_s1 + $0x198] sm:$0xff]   ;;  %v978_v5 = vld [vmem:[%s1260_s1 + $0x168] sm:$0xff]  }
  0x12   :  { %865 = vmatprep.subr.bf16.mxu1 %v942_v17  ;;  %v194_v55 = vcombine.high %v190_v49, %v190_v49  ;;  %659 = vmatprep.mubr.bf16.mxu1 %v193_v52  ;;  %v975_v3 = vld [vmem:[%s1260_s1 + $0x1e0] sm:$0xff]   ;;  %v979_v7 = vld [vmem:[%s1260_s1 + $0x1e8] sm:$0xff]   ;;  %v982_v9 = vld [vmem:[%s1260_s1 + $0x170] sm:$0xff]  }
  0x13   :  { %v976_v4 = vld [vmem:[%s1260_s1 + $0x120] sm:$0xff]   ;;  %v980_v8 = vld [vmem:[%s1260_s1 + $0x128] sm:$0xff]  }
  0x14   :  { %844 = vmatpush3.bf16.msra.mxu0 %v943_v18  ;;  %v977_v6 = vld [vmem:[%s1260_s1 + $0x1a0] sm:$0xff]  }
  0x15   :  { %866 = vmatpush3.bf16.msra.mxu1 %v944_v19  ;;  %845 = vmatprep.subr.bf16.mxu0 %v945_v20 }
  0x16   :  { %867 = vmatprep.subr.bf16.mxu1 %v946_v21 }
  0x18   :  { %846 = vmatpush3.bf16.msra.mxu0 %v947_v22 }
  0x19   :  { %868 = vmatpush3.bf16.msra.mxu1 %v948_v23  ;;  %847 = vmatprep.subr.bf16.mxu0 %v949_v24 }
  0x1a   :  { %869 = vmatprep.subr.bf16.mxu1 %v950_v25 }
  0x1c   :  { %848 = vmatpush3.bf16.msra.mxu0 %v951_v26 }
  0x1d   :  { %870 = vmatpush3.bf16.msra.mxu1 %v952_v27  ;;  %849 = vmatprep.subr.bf16.mxu0 %v953_v29 }
  0x1e   :  { %871 = vmatprep.subr.bf16.mxu1 %v954_v30 }
  0x20   :  { %850 = vmatpush3.bf16.msra.mxu0 %v955_v31 }
  0x21   :  { %872 = vmatpush3.bf16.msra.mxu1 %v956_v32  ;;  %879 = vmatprep.subr.bf16.mxu0 %v958_v35 }
  0x22   :  { %901 = vmatprep.subr.bf16.mxu1 %v959_v38 }
  0x23   :  { %620 = vmatmul.mubr.bf16.vlgmr.msra.gmra.mrb[0].mxu0 %v169_v45 }
  0x24   :  { %880 = vmatpush3.bf16.msra.mxu0 %v960_v48  ;;  %660 = vmatmul.mubr.bf16.vlgmr.msra.gmra.mrb[0].mxu1 %v191_v50 }
  0x25   :  { %881 = vmatprep.subr.bf16.mxu0 %v962_v51  ;;  %902 = vmatpush3.bf16.msra.mxu1 %v961_v53 }
  0x26   :  { %699 = vmatprep.mubr.bf16.mxu0 %v190_v49  ;;  %903 = vmatprep.subr.bf16.mxu1 %v963_v54 }
  0x27   :  { %739 = vmatprep.mubr.bf16.mxu1 %v194_v55 }
  0x28   :  { %882 = vmatpush3.bf16.msra.mxu0 %v964_v56 }
  0x29   :  { %883 = vmatprep.subr.bf16.mxu0 %v966_v57  ;;  %904 = vmatpush3.bf16.msra.mxu1 %v965_v58 }
  0x2a   :  { %905 = vmatprep.subr.bf16.mxu1 %v967_v59 }
  0x2c   :  { %884 = vmatpush3.bf16.msra.mxu0 %v968_v60 }
  0x2d   :  { %885 = vmatprep.subr.bf16.mxu0 %v970_v61  ;;  %906 = vmatpush3.bf16.msra.mxu1 %v969_v62 }
  0x2e   :  { %907 = vmatprep.subr.bf16.mxu1 %v971_v63 }
  0x30   :  { %886 = vmatpush3.bf16.msra.mxu0 %v972_v0 }
  0x31   :  { %887 = vmatprep.subr.bf16.mxu0 %v974_v1  ;;  %908 = vmatpush3.bf16.msra.mxu1 %v973_v2 }
  0x32   :  { %909 = vmatprep.subr.bf16.mxu1 %v975_v3 }
  0x34   :  { %888 = vmatpush3.bf16.msra.mxu0 %v976_v4 }
  0x35   :  { %889 = vmatprep.subr.bf16.mxu0 %v978_v5 }
  0x36   :  { %8 = vsyncpa [#allocation3], 0  ;;  %910 = vmatpush3.bf16.msra.mxu1 %v977_v6  ;;  %v981_v10 = vld [vmem:[%s1260_s1 + $0x1a8] sm:$0xff]   ;;  %v983_v11 = vld [vmem:[%s1260_s1 + $0x1f0] sm:$0xff]   ;;  %v176_v17 = vrot.slane %v1145_v43, %v1141_v41  ;;  %s1015_s5 = smov [#allocation2]  }
  0x37   :  { %911 = vmatprep.subr.bf16.mxu1 %v979_v7  ;;  %v984_v12 = vld [vmem:[%s1260_s1 + $0x130] sm:$0xff]   ;;  %v986_v13 = vld [vmem:[%s1260_s1 + $0x178] sm:$0xff]   ;;  %v834_v42 = vld [vmem:[%s1261_s2] ss:$0 sm:$0xff]  ;;  %s762_s6 = sshll.u32 %s1015_s5, 4  ;;  %s763_s6 = int_to_ptr.vmem [resolvable:$true] %s762_s6 }
  0x38   :  { %890 = vmatpush3.bf16.msra.mxu0 %v980_v8  ;;  %v985_v14 = vld [vmem:[%s1260_s1 + $0x1b0] sm:$0xff]   ;;  %v987_v15 = vld [vmem:[%s1260_s1 + $0x1f8] sm:$0xff]   ;;  %v192_v19 = vcombine.high %v176_v17, %v176_v17  ;;  %s990_s7 = scalar_lea.vmem %s763_s6, 32  ;;  %p995_p1 = scmp.lt.s32.totalorder %s763_s6, %s763_s6 }
  0x39   :  { %891 = vmatprep.subr.bf16.mxu0 %v982_v9  ;;  %v988_v16 = vld [vmem:[%s1260_s1 + $0x138] sm:$0xff]   ;;  %p991_p0 = scmp.ne.s32.totalorder %s763_s6, %s990_s7  ;;  %p996_p2 = scmp.lt.s32.totalorder %s990_s7, %s990_s7 }
  0x3a   :  { %912 = vmatpush3.bf16.msra.mxu1 %v981_v10  ;;  %v989_v18 = vld [vmem:[%s1260_s1 + $0x1b8] sm:$0xff]  }
  0x3b   :  { %913 = vmatprep.subr.bf16.mxu1 %v983_v11  ;;  %p997_p3 = por %p996_p2, %p995_p1 }
  0x3c   :  { %892 = vmatpush3.bf16.msra.mxu0 %v984_v12 }
  0x3d   :  { %893 = vmatprep.subr.bf16.mxu0 %v986_v13  ;;  %p998_p4 = pnand %p997_p3, %p991_p0 }
  0x3e   :  { %914 = vmatpush3.bf16.msra.mxu1 %v985_v14 }
  0x3f   :  { %915 = vmatprep.subr.bf16.mxu1 %v987_v15 }
  0x40   :  { %894 = vmatpush3.bf16.msra.mxu0 %v988_v16 }
  0x42   :  { %916 = vmatpush3.bf16.msra.mxu1 %v989_v18 }
  0x43   :  { %700 = vmatmul.mubr.bf16.vlgmr.msra.gmra.mrb[4].mxu0 %v176_v17 }
  0x45   :  { %740 = vmatmul.mubr.bf16.vlgmr.msra.gmra.mrb[4].mxu1 %v192_v19 }
  0xf6   :  { %v851_v20 = vpop.f32.mrb[0].mxu0 }
  0xf7   :  { %v852_v21 = vpop.f32.mrb[1].mxu0  ;;  %v873_v22 = vpop.f32.mrb[0].mxu1 }
  0xf8   :  { %v853_v23 = vadd.f32 %v852_v21, %v851_v20  ;;  %v854_v24 = vpop.f32.mrb[2].mxu0  ;;  %v874_v25 = vpop.f32.mrb[1].mxu1 }
  0xf9   :  { %v855_v26 = vpop.f32.mrb[3].mxu0  ;;  %v875_v27 = vadd.f32 %v874_v25, %v873_v22  ;;  %v876_v28 = vpop.f32.mrb[2].mxu1 }
  0xfa   :  { %v877_v29 = vpop.f32.mrb[3].mxu1 }
  0xfb   :  { %v662_v30 = vadd.f32 %v875_v27, %v853_v23 }
 0x116   :  { %v895_v31 = vpop.f32.mrb[4].mxu0 }
 0x117   :  { %v896_v32 = vpop.f32.mrb[5].mxu0 }
 0x118   :  { %v917_v33 = vpop.f32.mrb[4].mxu1  ;;  %v897_v34 = vadd.f32 %v896_v32, %v895_v31  ;;  %v898_v35 = vpop.f32.mrb[6].mxu0 }
 0x119   :  { %v918_v36 = vpop.f32.mrb[5].mxu1  ;;  %v899_v37 = vpop.f32.mrb[7].mxu0 }
 0x11a   :  { %v702_v38 = vadd.f32 %v897_v34, %v662_v30  ;;  %v919_v39 = vadd.f32 %v918_v36, %v917_v33  ;;  %v920_v40 = vpop.f32.mrb[6].mxu1 }
 0x11b   :  { %v921_v41 = vpop.f32.mrb[7].mxu1 }
 0x11c   :  { %v742_v43 = vadd.f32 %v919_v39, %v702_v38 }
 0x11e   :  { %v754_v44 = vmul.f32 %v834_v42, %v742_v43 }
 0x120   :  { %755 = vst [vmem:[#allocation2] sm:$0x3] %v754_v44 }
 0x121   :  { %1001 = shalt.err (!%p998_p4)
}
 0x122   :  { %s1002_s10 = scalar_lea.hbm %s1262_s3, 32 }
 0x123   :  { %p1003_p5 = scmp.ne.s32.totalorder %s1262_s3, %s1002_s10  ;;  %p1006_p6 = scmp.lt.u32.totalorder %s1002_s10, %s1262_s3 }
 0x125   :  { %p1008_p7 = pnand %p1006_p6, %p1003_p5 }
 0x127   :  { %1011 = shalt.err (!%p1008_p7)
}
 0x128   :  { %765 = dma.vmem_to_hbm [thread:$0]  %s763_s6, 32, %s1262_s3, [#allocation3]  }
 0x129   :  { %1012 = dma.done.wait [#allocation3], 32  }
 0x12a   :  { %1013 = vsyncadd [#allocation3], 4294967264 }
 0x12b   :  { %769 = vsyncpa [#allocation3], 1 }

// kernel: concat_mtl_forward.2
= control target key start
LH: loop header
LB: loop body
LE: loop exit
PB: predicated region body
PF: predicated region fallthrough
CT: control target
= control target key end

     0   :  { %vm47_vm0 = vcmask 1043456   ;;  %v6534_v24 = vmov 0.0   ;;  %v90_v29 = vlaneseq  ;;  %vm222_vm1 = vcmask 1041409   ;;  %s9470_s0 = inlined_call_operand.vmem [shape: f32[2,2,4,256], index: 0, kind: input, shape index: {}]   ;;  %s9471_s1 = inlined_call_operand.vmem [shape: f32[4,3072], index: 1, kind: input, shape index: {}]   ;;  %s9472_s3 = inlined_call_operand.vmem [shape: f32[4,3072], index: 3, kind: input, shape index: {}]   ;;  %s9473_s6 = inlined_call_operand.vmem [shape: f32[3072,16], index: 6, kind: input, shape index: {}]   ;;  %s9474_s2 = inlined_call_operand.vmem [shape: f32[1,3072], index: 2, kind: input, shape index: {}]   ;;  %s9475_s4 = inlined_call_operand.vmem [shape: f32[1,3072], index: 4, kind: input, shape index: {}]   ;;  %s9476_s5 = inlined_call_operand.vmem [shape: f32[3072,16], index: 5, kind: input, shape index: {}]   ;;  %s9477_s9 = inlined_call_operand.vmem [shape: bf16[2,1024], index: 9, kind: output, shape index: {1}]   ;;  %s9478_s7 = inlined_call_operand.vmem [shape: f32[1,16], index: 7, kind: input, shape index: {}]   ;;  %s9479_s8 = inlined_call_operand.vmem [shape: f32[2,16], index: 8, kind: output, shape index: {0}]  }
   0x1   :  { %v31_v0 = vld [vmem:[%s9470_s0] sm:$0xff]  ;;  %v33_v1 = vld [vmem:[%s9470_s0 + $0x10] sm:$0xff]  ;;  %v32_v2 = vld [vmem:[%s9470_s0 + $0x8] sm:$0xff]  ;;  %363 = vmatprep.mubr.f32.mxu0 %v6534_v24  ;;  %434 = vmatprep.mubr.f32.mxu1 %v6534_v24  ;;  %vm248_vm2 = vcmask 31744   ;;  %vm4686_vm3 = vcmask 1041408   ;;  %vm4725_vm7 = vcmask 123904  }
   0x2   :  { %v39_v3 = vcombine.high %v31_v0, %v31_v0  ;;  %v48_v4 = vsel %vm47_vm0, %v31_v0, 0.0  ;;  %v41_v5 = vcombine.high %v33_v1, %v33_v1  ;;  %v34_v6 = vld [vmem:[%s9470_s0 + $0x18] sm:$0xff]  ;;  %v40_v7 = vcombine.high %v32_v2, %v32_v2  ;;  %v72_v20 = vld [vmem:[%s9471_s1] sm:$0xff]  ;;  %v73_v21 = vld [vmem:[%s9471_s1 + $0x8] sm:$0xff] }
   0x3   :  { %v53_v8 = vsel %vm47_vm0, %v32_v2, 0.0  ;;  %v42_v9 = vcombine.high %v34_v6, %v34_v6  ;;  %v58_v11 = vsel %vm47_vm0, %v33_v1, 0.0  ;;  %v63_v15 = vsel %vm47_vm0, %v34_v6, 0.0  ;;  %v74_v25 = vld [vmem:[%s9471_s1 + $0x10] sm:$0xff]  ;;  %v75_v26 = vld [vmem:[%s9471_s1 + $0x18] sm:$0xff]  ;;  %v76_v37 = vld [vmem:[%s9471_s1 + $0x20] sm:$0xff] }
   0x4   :  { %v49_v10 = vsel %vm47_vm0, %v39_v3, 0.0  ;;  %v59_v12 = vsel %vm47_vm0, %v41_v5, 0.0  ;;  %v54_v14 = vsel %vm47_vm0, %v40_v7, 0.0  ;;  %v236_v22 = vcombine.high %v72_v20, %v72_v20  ;;  %v77_v38 = vld [vmem:[%s9471_s1 + $0x28] sm:$0xff]  ;;  %v78_v44 = vld [vmem:[%s9471_s1 + $0x30] sm:$0xff]  ;;  %v79_v45 = vld [vmem:[%s9471_s1 + $0x38] sm:$0xff] }
   0x5   :  { %v50_v13 = vadd.f32 %v49_v10, %v48_v4  ;;  %v64_v16 = vsel %vm47_vm0, %v42_v9, 0.0  ;;  %v55_v17 = vadd.f32 %v54_v14, %v53_v8  ;;  %v60_v18 = vadd.f32 %v59_v12, %v58_v11  ;;  %v80_v48 = vld [vmem:[%s9471_s1 + $0x40] sm:$0xff]  ;;  %v81_v49 = vld [vmem:[%s9471_s1 + $0x48] sm:$0xff]  ;;  %v82_v53 = vld [vmem:[%s9471_s1 + $0x50] sm:$0xff] }
   0x6   :  { %v65_v19 = vadd.f32 %v64_v16, %v63_v15  ;;  %v237_v23 = vcombine.high %v73_v21, %v73_v21  ;;  %4811 = vmatprep.subr.msk.mxu0 %vm47_vm0, %v236_v22  ;;  %v238_v27 = vcombine.high %v74_v25, %v74_v25  ;;  %v239_v28 = vcombine.high %v75_v26, %v75_v26  ;;  %v83_v54 = vld [vmem:[%s9471_s1 + $0x58] sm:$0xff]  ;;  %v1151_v58 = vld [vmem:[%s9472_s3] sm:$0xff]  ;;  %v1152_v59 = vld [vmem:[%s9472_s3 + $0x8] sm:$0xff] }
   0x7   :  { %51 = vadd.xlane.f32.xlu0 %v50_v13  ;;  %56 = vadd.xlane.f32.xlu1 %v55_v17  ;;  %v6626_v30 = vshrl.u32 %v90_v29, 7  ;;  %v6628_v31 = vand.u32 127, %v90_v29  ;;  %v240_v42 = vcombine.high %v76_v37, %v76_v37  ;;  %v241_v43 = vcombine.high %v77_v38, %v77_v38  ;;  %v1153_v0 = vld [vmem:[%s9472_s3 + $0x10] sm:$0xff]  ;;  %v1154_v1 = vld [vmem:[%s9472_s3 + $0x18] sm:$0xff]  ;;  %v1155_v6 = vld [vmem:[%s9472_s3 + $0x20] sm:$0xff] }
   0x8   :  { %4814 = vmatprep.subr.msk.mxu1 %vm47_vm0, %v237_v23  ;;  %4812 = vmatpush1.msk.msra.mxu0 %vm47_vm0, %v72_v20  ;;  %v242_v46 = vcombine.high %v78_v44, %v78_v44  ;;  %v243_v47 = vcombine.high %v79_v45, %v79_v45  ;;  %v244_v51 = vcombine.high %v80_v48, %v80_v48  ;;  %v1156_v7 = vld [vmem:[%s9472_s3 + $0x28] sm:$0xff]  ;;  %v1157_v11 = vld [vmem:[%s9472_s3 + $0x30] sm:$0xff]  ;;  %v1158_v12 = vld [vmem:[%s9472_s3 + $0x38] sm:$0xff] }
   0x9   :  { %4815 = vmatpush1.msk.msra.mxu1 %vm47_vm0, %v73_v21  ;;  %4817 = vmatprep.subr.msk.mxu0 %vm47_vm0, %v238_v27  ;;  %9481 = vst [vmem:[#allocation2_spill] sm:$0xff] %v6628_v31  ;;  %v6632_v33 = vsub.s32 %v6628_v31, %v6626_v30  ;;  %v245_v52 = vcombine.high %v81_v49, %v81_v49  ;;  %v1159_v15 = vld [vmem:[%s9472_s3 + $0x40] sm:$0xff]  ;;  %v1160_v16 = vld [vmem:[%s9472_s3 + $0x48] sm:$0xff]  ;;  %v1162_v20 = vld [vmem:[%s9472_s3 + $0x58] sm:$0xff] }
   0xa   :  { %4820 = vmatprep.subr.msk.mxu1 %vm47_vm0, %v239_v28  ;;  %v246_v55 = vcombine.high %v82_v53, %v82_v53  ;;  %v247_v56 = vcombine.high %v83_v54, %v83_v54  ;;  %v1312_v62 = vcombine.high %v1151_v58, %v1151_v58  ;;  %v1313_v63 = vcombine.high %v1152_v59, %v1152_v59  ;;  %v2626_v23 = vld [vmem:[%s9473_s6 + $0x80] sm:$0xff]  ;;  %v2659_v27 = vld [vmem:[%s9473_s6 + $0x188] sm:$0xff] }
   0xb   :  { %61 = vadd.xlane.f32.xlu0 %v60_v18  ;;  %66 = vadd.xlane.f32.xlu1 %v65_v19  ;;  %v1314_v2 = vcombine.high %v1153_v0, %v1153_v0  ;;  %v1315_v5 = vcombine.high %v1154_v1, %v1154_v1  ;;  %v1316_v9 = vcombine.high %v1155_v6, %v1155_v6  ;;  %v1161_v19 = vld [vmem:[%s9472_s3 + $0x50] sm:$0xff]  ;;  %v2610_v28 = vld [vmem:[%s9473_s6] sm:$0xff]  ;;  %v2611_v29 = vld [vmem:[%s9473_s6 + $0x8] sm:$0xff] }
   0xc   :  { %v1317_v10 = vcombine.high %v1156_v7, %v1156_v7  ;;  %v1318_v13 = vcombine.high %v1157_v11, %v1157_v11  ;;  %v1319_v14 = vcombine.high %v1158_v12, %v1158_v12  ;;  %v1320_v17 = vcombine.high %v1159_v15, %v1159_v15 }
   0xd   :  { %v1321_v18 = vcombine.high %v1160_v16, %v1160_v16  ;;  %v1322_v21 = vcombine.high %v1161_v19, %v1161_v19  ;;  %v1323_v22 = vcombine.high %v1162_v20, %v1162_v20 }
  0x94   :  { %v52_v32 = vpop.xlane.xlu0 %51  ;;  %v57_v50 = vpop.xlane.xlu1 %56 }
  0x95   :  { %v68_v34 = vmul.f32 0.00390625, %v52_v32  ;;  %v69_v60 = vmul.f32 0.00390625, %v57_v50  ;;  %v2642_v32 = vld [vmem:[%s9473_s6 + $0x100] sm:$0xff]  ;;  %v2631_v50 = vld [vmem:[%s9473_s6 + $0xa8] sm:$0xff] }
  0x97   :  { %v217_v39 = vrot.slane %v68_v34, %v6632_v33  ;;  %v1294_v3 = vrot.slane %v69_v60, %v6632_v33 }
  0x98   :  { %v62_v35 = vpop.xlane.xlu0 %61  ;;  %v67_v57 = vpop.xlane.xlu1 %66 }
  0x99   :  { %v70_v36 = vmul.f32 0.00390625, %v62_v35  ;;  %v71_v61 = vmul.f32 0.00390625, %v67_v57 }
  0x9b   :  { %v221_v40 = vrot.slane %v70_v36, %v6632_v33  ;;  %v1298_v4 = vrot.slane %v71_v61, %v6632_v33  ;;  %v2643_v33 = vld [vmem:[%s9473_s6 + $0x108] sm:$0xff]  ;;  %v5732_v36 = vpack.c.bf16 %v2611_v29, %v2610_v28  ;;  %v2632_v61 = vld [vmem:[%s9473_s6 + $0xb0] sm:$0xff] }
  0x9c   :  { %v6957_v28 = vld [vmem:[%s9474_s2 + $0x10] sm:$0xff] }
  0x9d   :  { %v6643_v41 = vsel %vm222_vm1, %v221_v40, %v217_v39  ;;  %v6742_v8 = vsel %vm222_vm1, %v1298_v4, %v1294_v3  ;;  %v2629_v39 = vld [vmem:[%s9473_s6 + $0x98] sm:$0xff] }
  0x9e   :  { %4813 = vmatmul.mubr.msk.f32.vlgmr.msra.gmra.mrb[0].mxu0 %vm248_vm2, %v6643_v41  ;;  %4816 = vmatmul.mubr.msk.f32.vlgmr.msra.gmra.mrb[0].mxu1 %vm248_vm2, %v6643_v41  ;;  %v2617_v4 = vld [vmem:[%s9473_s6 + $0x38] sm:$0xff] }
  0x9f   :  { %4818 = vmatpush1.msk.msra.mxu0 %vm47_vm0, %v74_v25  ;;  %4821 = vmatpush1.msk.msra.mxu1 %vm47_vm0, %v75_v26  ;;  %v2627_v25 = vld [vmem:[%s9473_s6 + $0x88] sm:$0xff]  ;;  %v2658_v26 = vld [vmem:[%s9473_s6 + $0x180] sm:$0xff] }
  0xa0   :  { %505 = vmatprep.mubr.f32.mxu0 %v6534_v24  ;;  %576 = vmatprep.mubr.f32.mxu1 %v6534_v24  ;;  %v5730_v34 = vpack.c.bf16 %v2627_v25, %v2626_v23  ;;  %v5762_v35 = vpack.c.bf16 %v2659_v27, %v2658_v26  ;;  %v2637_v23 = vld [vmem:[%s9473_s6 + $0xd8] sm:$0xff]  ;;  %v2668_v25 = vld [vmem:[%s9473_s6 + $0x1d0] sm:$0xff]  ;;  %v6949_v26 = vsub.s32 1, %v6626_v30  ;;  %v6952_v27 = vsub.s32 3, %v6626_v30 }
  0xa1   :  { %4823 = vmatprep.subr.msk.mxu0 %vm47_vm0, %v240_v42  ;;  %4826 = vmatprep.subr.msk.mxu1 %vm47_vm0, %v241_v43  ;;  %v2612_v42 = vld [vmem:[%s9473_s6 + $0x10] sm:$0xff]  ;;  %v2613_v43 = vld [vmem:[%s9473_s6 + $0x18] sm:$0xff] }
  0xa2   :  { %4819 = vmatmul.mubr.msk.f32.vlgmr.msra.gmra.mrb[2].mxu0 %vm248_vm2, %v6643_v41  ;;  %4822 = vmatmul.mubr.msk.f32.vlgmr.msra.gmra.mrb[2].mxu1 %vm248_vm2, %v6643_v41 }
  0xa3   :  { %4824 = vmatpush1.msk.msra.mxu0 %vm47_vm0, %v76_v37  ;;  %4827 = vmatpush1.msk.msra.mxu1 %vm47_vm0, %v77_v38  ;;  %v5764_v37 = vpack.c.bf16 %v2643_v33, %v2642_v32  ;;  %v2628_v38 = vld [vmem:[%s9473_s6 + $0x90] sm:$0xff]  ;;  %v2669_v32 = vld [vmem:[%s9473_s6 + $0x1d8] sm:$0xff] }
  0xa4   :  { %647 = vmatprep.mubr.f32.mxu0 %v6534_v24  ;;  %718 = vmatprep.mubr.f32.mxu1 %v6534_v24  ;;  %v5734_v40 = vpack.c.bf16 %v2629_v39, %v2628_v38  ;;  %v2620_v33 = vld [vmem:[%s9473_s6 + $0x50] sm:$0xff]  ;;  %v2653_v38 = vld [vmem:[%s9473_s6 + $0x158] sm:$0xff]  ;;  %v161_v39 = vrot.slane %v6957_v28, %v6949_v26 }
  0xa5   :  { %4829 = vmatprep.subr.msk.mxu0 %vm47_vm0, %v242_v46  ;;  %4832 = vmatprep.subr.msk.mxu1 %vm47_vm0, %v243_v47  ;;  %v2644_v46 = vld [vmem:[%s9473_s6 + $0x110] sm:$0xff]  ;;  %v2645_v47 = vld [vmem:[%s9473_s6 + $0x118] sm:$0xff] }
  0xa6   :  { %4825 = vmatmul.mubr.msk.f32.vlgmr.msra.gmra.mrb[4].mxu0 %vm248_vm2, %v6643_v41  ;;  %4828 = vmatmul.mubr.msk.f32.vlgmr.msra.gmra.mrb[4].mxu1 %vm248_vm2, %v6643_v41 }
  0xa7   :  { %4830 = vmatpush1.msk.msra.mxu0 %vm47_vm0, %v78_v44  ;;  %4833 = vmatpush1.msk.msra.mxu1 %vm47_vm0, %v79_v45  ;;  %v5736_v45 = vpack.c.bf16 %v2613_v43, %v2612_v42  ;;  %v2638_v42 = vld [vmem:[%s9473_s6 + $0xe0] sm:$0xff]  ;;  %v2639_v43 = vld [vmem:[%s9473_s6 + $0xe8] sm:$0xff] }
  0xa8   :  { %789 = vmatprep.mubr.f32.mxu0 %v6534_v24  ;;  %860 = vmatprep.mubr.f32.mxu1 %v6534_v24 }
  0xa9   :  { %4835 = vmatprep.subr.msk.mxu0 %vm47_vm0, %v244_v51  ;;  %4838 = vmatprep.subr.msk.mxu1 %vm47_vm0, %v245_v52  ;;  %v2662_v51 = vld [vmem:[%s9473_s6 + $0x1a0] sm:$0xff] }
  0xaa   :  { %4831 = vmatmul.mubr.msk.f32.vlgmr.msra.gmra.mrb[6].mxu0 %vm248_vm2, %v6643_v41  ;;  %4834 = vmatmul.mubr.msk.f32.vlgmr.msra.gmra.mrb[6].mxu1 %vm248_vm2, %v6643_v41 }
  0xab   :  { %4836 = vmatpush1.msk.msra.mxu0 %vm47_vm0, %v80_v48  ;;  %4839 = vmatpush1.msk.msra.mxu1 %vm47_vm0, %v81_v49  ;;  %v5768_v48 = vpack.c.bf16 %v2645_v47, %v2644_v46  ;;  %v2630_v49 = vld [vmem:[%s9473_s6 + $0xa0] sm:$0xff]  ;;  %v2671_v46 = vld [vmem:[%s9473_s6 + $0x1e8] sm:$0xff] }
  0xac   :  { %931 = vmatprep.mubr.f32.mxu0 %v6534_v24  ;;  %1002 = vmatprep.mubr.f32.mxu1 %v6534_v24  ;;  %v5738_v52 = vpack.c.bf16 %v2631_v50, %v2630_v49  ;;  %v2622_v47 = vld [vmem:[%s9473_s6 + $0x60] sm:$0xff] }
  0xad   :  { %4841 = vmatprep.subr.msk.mxu0 %vm47_vm0, %v246_v55  ;;  %4844 = vmatprep.subr.msk.mxu1 %vm47_vm0, %v247_v56  ;;  %v2615_v55 = vld [vmem:[%s9473_s6 + $0x28] sm:$0xff] }
  0xae   :  { %4837 = vmatmul.mubr.msk.f32.vlgmr.msra.gmra.mrb[8].mxu0 %vm248_vm2, %v6643_v41  ;;  %4840 = vmatmul.mubr.msk.f32.vlgmr.msra.gmra.mrb[8].mxu1 %vm248_vm2, %v6643_v41 }
  0xaf   :  { %4842 = vmatpush1.msk.msra.mxu0 %vm47_vm0, %v82_v53  ;;  %4845 = vmatpush1.msk.msra.mxu1 %vm47_vm0, %v83_v54  ;;  %v2663_v53 = vld [vmem:[%s9473_s6 + $0x1a8] sm:$0xff]  ;;  %v2614_v54 = vld [vmem:[%s9473_s6 + $0x20] sm:$0xff] }
  0xb0   :  { %1073 = vmatprep.mubr.f32.mxu0 %v6534_v24  ;;  %1144 = vmatprep.mubr.f32.mxu1 %v6534_v24  ;;  %v5770_v56 = vpack.c.bf16 %v2663_v53, %v2662_v51  ;;  %v5740_v57 = vpack.c.bf16 %v2615_v55, %v2614_v54  ;;  %v2654_v51 = vld [vmem:[%s9473_s6 + $0x160] sm:$0xff]  ;;  %v2640_v54 = vld [vmem:[%s9473_s6 + $0xf0] sm:$0xff]  ;;  %v2641_v55 = vld [vmem:[%s9473_s6 + $0xf8] sm:$0xff] }
  0xb1   :  { %4847 = vmatprep.subr.msk.mxu0 %vm47_vm0, %v1312_v62  ;;  %4850 = vmatprep.subr.msk.mxu1 %vm47_vm0, %v1313_v63  ;;  %v2633_v62 = vld [vmem:[%s9473_s6 + $0xb8] sm:$0xff]  ;;  %v2664_v63 = vld [vmem:[%s9473_s6 + $0x1b0] sm:$0xff] }
  0xb2   :  { %4843 = vmatmul.mubr.msk.f32.vlgmr.msra.gmra.mrb[10].mxu0 %vm248_vm2, %v6643_v41  ;;  %4846 = vmatmul.mubr.msk.f32.vlgmr.msra.gmra.mrb[10].mxu1 %vm248_vm2, %v6643_v41  ;;  %v2661_v41 = vld [vmem:[%s9473_s6 + $0x198] sm:$0xff] }
  0xb3   :  { %4848 = vmatpush1.msk.msra.mxu0 %vm47_vm0, %v1151_v58  ;;  %4851 = vmatpush1.msk.msra.mxu1 %vm47_vm0, %v1152_v59  ;;  %v2646_v58 = vld [vmem:[%s9473_s6 + $0x120] sm:$0xff]  ;;  %v2647_v59 = vld [vmem:[%s9473_s6 + $0x128] sm:$0xff] }
  0xb4   :  { %1438 = vmatprep.mubr.f32.mxu0 %v6534_v24  ;;  %1509 = vmatprep.mubr.f32.mxu1 %v6534_v24  ;;  %v5772_v60 = vpack.c.bf16 %v2647_v59, %v2646_v58  ;;  %v2673_v58 = vld [vmem:[%s9473_s6 + $0x1f8] sm:$0xff]  ;;  %v2624_v59 = vld [vmem:[%s9473_s6 + $0x70] sm:$0xff] }
  0xb5   :  { %4853 = vmatprep.subr.msk.mxu0 %vm47_vm0, %v1314_v2  ;;  %4856 = vmatprep.subr.msk.mxu1 %vm47_vm0, %v1315_v5  ;;  %v2616_v2 = vld [vmem:[%s9473_s6 + $0x30] sm:$0xff] }
  0xb6   :  { %4849 = vmatmul.mubr.msk.f32.vlgmr.msra.gmra.mrb[12].mxu0 %vm248_vm2, %v6742_v8  ;;  %4852 = vmatmul.mubr.msk.f32.vlgmr.msra.gmra.mrb[12].mxu1 %vm248_vm2, %v6742_v8  ;;  %v2648_v5 = vld [vmem:[%s9473_s6 + $0x130] sm:$0xff] }
  0xb7   :  { %4854 = vmatpush1.msk.msra.mxu0 %vm47_vm0, %v1153_v0  ;;  %1580 = vmatprep.mubr.f32.mxu0 %v6534_v24  ;;  %v5742_v0 = vpack.c.bf16 %v2633_v62, %v2632_v61  ;;  %v2625_v61 = vld [vmem:[%s9473_s6 + $0x78] sm:$0xff]  ;;  %v2656_v62 = vld [vmem:[%s9473_s6 + $0x170] sm:$0xff] }
  0xb8   :  { %4857 = vmatpush1.msk.msra.mxu1 %vm47_vm0, %v1154_v1  ;;  %1651 = vmatprep.mubr.f32.mxu1 %v6534_v24  ;;  %v2665_v1 = vld [vmem:[%s9473_s6 + $0x1b8] sm:$0xff] }
  0xb9   :  { %4859 = vmatprep.subr.msk.mxu0 %vm47_vm0, %v1316_v9  ;;  %4862 = vmatprep.subr.msk.mxu1 %vm47_vm0, %v1317_v10  ;;  %v5774_v3 = vpack.c.bf16 %v2665_v1, %v2664_v63  ;;  %v2634_v9 = vld [vmem:[%s9473_s6 + $0xc0] sm:$0xff]  ;;  %v2635_v10 = vld [vmem:[%s9473_s6 + $0xc8] sm:$0xff]  ;;  %v2657_v63 = vld [vmem:[%s9473_s6 + $0x178] sm:$0xff] }
  0xba   :  { %4855 = vmatmul.mubr.msk.f32.vlgmr.msra.gmra.mrb[14].mxu0 %vm248_vm2, %v6742_v8  ;;  %4858 = vmatmul.mubr.msk.f32.vlgmr.msra.gmra.mrb[14].mxu1 %vm248_vm2, %v6742_v8  ;;  %v5792_v1 = vpack.c.bf16 %v2657_v63, %v2656_v62 }
  0xbb   :  { %4860 = vmatpush1.msk.msra.mxu0 %vm47_vm0, %v1155_v6  ;;  %1722 = vmatprep.mubr.f32.mxu0 %v6534_v24  ;;  %v2649_v6 = vld [vmem:[%s9473_s6 + $0x138] sm:$0xff] }
  0xbc   :  { %4863 = vmatpush1.msk.msra.mxu1 %vm47_vm0, %v1156_v7  ;;  %1793 = vmatprep.mubr.f32.mxu1 %v6534_v24  ;;  %v5744_v7 = vpack.c.bf16 %v2617_v4, %v2616_v2  ;;  %v2690_v2 = vld [vmem:[%s9473_s6 + $0x280] sm:$0xff] }
  0xbd   :  { %4865 = vmatprep.subr.msk.mxu0 %vm47_vm0, %v1318_v13  ;;  %4868 = vmatprep.subr.msk.mxu1 %vm47_vm0, %v1319_v14  ;;  %v2667_v13 = vld [vmem:[%s9473_s6 + $0x1c8] sm:$0xff]  ;;  %v2618_v14 = vld [vmem:[%s9473_s6 + $0x40] sm:$0xff] }
  0xbe   :  { %4861 = vmatmul.mubr.msk.f32.vlgmr.msra.gmra.mrb[16].mxu0 %vm248_vm2, %v6742_v8  ;;  %4864 = vmatmul.mubr.msk.f32.vlgmr.msra.gmra.mrb[16].mxu1 %vm248_vm2, %v6742_v8  ;;  %v2722_v4 = vld [vmem:[%s9473_s6 + $0x380] sm:$0xff] }
  0xbf   :  { %4866 = vmatpush1.msk.msra.mxu0 %vm47_vm0, %v1157_v11  ;;  %1864 = vmatprep.mubr.f32.mxu0 %v6534_v24  ;;  %v2666_v11 = vld [vmem:[%s9473_s6 + $0x1c0] sm:$0xff] }
  0xc0   :  { %4869 = vmatpush1.msk.msra.mxu1 %vm47_vm0, %v1158_v12  ;;  %1935 = vmatprep.mubr.f32.mxu1 %v6534_v24  ;;  %v5746_v12 = vpack.c.bf16 %v2635_v10, %v2634_v9  ;;  %v7046_v9 = vld [vmem:[%s9475_s4 + $0x8] sm:$0xff] }
  0xc1   :  { %4871 = vmatprep.subr.msk.mxu0 %vm47_vm0, %v1320_v17  ;;  %4874 = vmatprep.subr.msk.mxu1 %vm47_vm0, %v1321_v18  ;;  %v2650_v18 = vld [vmem:[%s9473_s6 + $0x140] sm:$0xff] }
  0xc2   :  { %4867 = vmatmul.mubr.msk.f32.vlgmr.msra.gmra.mrb[18].mxu0 %vm248_vm2, %v6742_v8  ;;  %4870 = vmatmul.mubr.msk.f32.vlgmr.msra.gmra.mrb[18].mxu1 %vm248_vm2, %v6742_v8 }
  0xc3   :  { %4872 = vmatpush1.msk.msra.mxu0 %vm47_vm0, %v1159_v15  ;;  %2006 = vmatprep.mubr.f32.mxu0 %v6534_v24  ;;  %v2619_v15 = vld [vmem:[%s9473_s6 + $0x48] sm:$0xff] }
  0xc4   :  { %4875 = vmatpush1.msk.msra.mxu1 %vm47_vm0, %v1160_v16  ;;  %2077 = vmatprep.mubr.f32.mxu1 %v6534_v24  ;;  %v5778_v16 = vpack.c.bf16 %v2667_v13, %v2666_v11  ;;  %v5748_v17 = vpack.c.bf16 %v2619_v15, %v2618_v14  ;;  %v7053_v11 = vld [vmem:[%s9475_s4 + $0x10] sm:$0xff]  ;;  %v84_v15 = vld [vmem:[%s9474_s2] sm:$0xff] }
  0xc5   :  { %4877 = vmatprep.subr.msk.mxu0 %vm47_vm0, %v1322_v21  ;;  %4880 = vmatprep.subr.msk.mxu1 %vm47_vm0, %v1323_v22  ;;  %v6937_v21 = vsub.s32 2, %v6626_v30  ;;  %v2636_v22 = vld [vmem:[%s9473_s6 + $0xd0] sm:$0xff] }
  0xc6   :  { %4873 = vmatmul.mubr.msk.f32.vlgmr.msra.gmra.mrb[20].mxu0 %vm248_vm2, %v6742_v8  ;;  %4876 = vmatmul.mubr.msk.f32.vlgmr.msra.gmra.mrb[20].mxu1 %vm248_vm2, %v6742_v8  ;;  %v5750_v29 = vpack.c.bf16 %v2637_v23, %v2636_v22  ;;  %v7074_v22 = vsub.s32 7, %v6626_v30 }
  0xc7   :  { %4878 = vmatpush1.msk.msra.mxu0 %vm47_vm0, %v1161_v19  ;;  %2148 = vmatprep.mubr.f32.mxu0 %v6534_v24  ;;  %v2651_v19 = vld [vmem:[%s9473_s6 + $0x148] sm:$0xff] }
  0xc8   :  { %4881 = vmatpush1.msk.msra.mxu1 %vm47_vm0, %v1162_v20  ;;  %2219 = vmatprep.mubr.f32.mxu1 %v6534_v24  ;;  %v2660_v24 = vld [vmem:[%s9473_s6 + $0x190] sm:$0xff]  ;;  %v5780_v20 = vpack.c.bf16 %v2651_v19, %v2650_v18  ;;  %v97_v18 = vrot.slane %v84_v15, %v6949_v26  ;;  %v105_v19 = vrot.slane %v84_v15, %v6952_v27 }
  0xc9   :  { %5731 = vmatprep.subr.bf16.mxu0 %v5730_v34  ;;  %5763 = vmatprep.subr.bf16.mxu1 %v5762_v35  ;;  %v5766_v44 = vpack.c.bf16 %v2661_v41, %v2660_v24  ;;  %v165_v34 = vrot.slane %v6957_v28, %v6937_v21  ;;  %v5782_v35 = vpack.c.bf16 %v2669_v32, %v2668_v25 }
  0xca   :  { %4879 = vmatmul.mubr.msk.f32.vlgmr.msra.gmra.mrb[22].mxu0 %vm248_vm2, %v6742_v8  ;;  %4882 = vmatmul.mubr.msk.f32.vlgmr.msra.gmra.mrb[22].mxu1 %vm248_vm2, %v6742_v8  ;;  %v5776_v8 = vpack.c.bf16 %v2649_v6, %v2648_v5  ;;  %v169_v24 = vrot.slane %v6957_v28, %v6952_v27  ;;  %v2723_v6 = vld [vmem:[%s9473_s6 + $0x388] sm:$0xff] }
  0xcb   :  { %5733 = vmatpush3.bf16.msra.mxu0 %v5732_v36  ;;  %5765 = vmatpush3.bf16.msra.mxu1 %v5764_v37  ;;  %v2621_v36 = vld [vmem:[%s9473_s6 + $0x58] sm:$0xff]  ;;  %v2652_v37 = vld [vmem:[%s9473_s6 + $0x150] sm:$0xff] }
  0xcc   :  { %5735 = vmatprep.subr.bf16.mxu0 %v5734_v40  ;;  %5767 = vmatprep.subr.bf16.mxu1 %v5766_v44  ;;  %v5752_v40 = vpack.c.bf16 %v2621_v36, %v2620_v33  ;;  %v5784_v41 = vpack.c.bf16 %v2653_v38, %v2652_v37  ;;  %v2670_v44 = vld [vmem:[%s9473_s6 + $0x1e0] sm:$0xff] }
  0xcd   :  { %v5786_v49 = vpack.c.bf16 %v2671_v46, %v2670_v44 }
  0xcf   :  { %5737 = vmatpush3.bf16.msra.mxu0 %v5736_v45  ;;  %5769 = vmatpush3.bf16.msra.mxu1 %v5768_v48  ;;  %v5754_v45 = vpack.c.bf16 %v2639_v43, %v2638_v42  ;;  %v2623_v48 = vld [vmem:[%s9473_s6 + $0x68] sm:$0xff] }
  0xd0   :  { %5739 = vmatprep.subr.bf16.mxu0 %v5738_v52  ;;  %5771 = vmatprep.subr.bf16.mxu1 %v5770_v56  ;;  %v5756_v50 = vpack.c.bf16 %v2623_v48, %v2622_v47  ;;  %v2655_v52 = vld [vmem:[%s9473_s6 + $0x168] sm:$0xff]  ;;  %v2672_v56 = vld [vmem:[%s9473_s6 + $0x1f0] sm:$0xff] }
  0xd1   :  { %v5788_v53 = vpack.c.bf16 %v2655_v52, %v2654_v51  ;;  %v85_v42 = vld [vmem:[%s9474_s2 + $0x8] sm:$0xff] }
  0xd2   :  { %v129_v52 = vrot.slane %v85_v42, %v6949_v26 }
  0xd3   :  { %5741 = vmatpush3.bf16.msra.mxu0 %v5740_v57  ;;  %5773 = vmatpush3.bf16.msra.mxu1 %v5772_v60  ;;  %v5758_v57 = vpack.c.bf16 %v2641_v55, %v2640_v54  ;;  %v5790_v60 = vpack.c.bf16 %v2673_v58, %v2672_v56 }
  0xd4   :  { %5743 = vmatprep.subr.bf16.mxu0 %v5742_v0  ;;  %5775 = vmatprep.subr.bf16.mxu1 %v5774_v3  ;;  %v5760_v0 = vpack.c.bf16 %v2625_v61, %v2624_v59  ;;  %v2691_v3 = vld [vmem:[%s9473_s6 + $0x288] sm:$0xff] }
  0xd5   :  { %v5794_v5 = vpack.c.bf16 %v2691_v3, %v2690_v2 }
  0xd7   :  { %5745 = vmatpush3.bf16.msra.mxu0 %v5744_v7  ;;  %5777 = vmatpush3.bf16.msra.mxu1 %v5776_v8  ;;  %v5826_v7 = vpack.c.bf16 %v2723_v6, %v2722_v4  ;;  %v7041_v8 = vsub.s32 6, %v6626_v30 }
  0xd8   :  { %5747 = vmatprep.subr.bf16.mxu0 %v5746_v12  ;;  %5779 = vmatprep.subr.bf16.mxu1 %v5778_v16  ;;  %v101_v16 = vrot.slane %v84_v15, %v6937_v21 }
  0xd9   :  { %v117_v36 = vrot.slane %v84_v15, %v7041_v8 }
  0xdb   :  { %5749 = vmatpush3.bf16.msra.mxu0 %v5748_v17  ;;  %5781 = vmatpush3.bf16.msra.mxu1 %v5780_v20  ;;  %v7066_v17 = vsub.s32 4, %v6626_v30  ;;  %v7071_v20 = vsub.s32 5, %v6626_v30 }
  0xdc   :  { %5751 = vmatprep.subr.bf16.mxu0 %v5750_v29  ;;  %5783 = vmatprep.subr.bf16.mxu1 %v5782_v35 }
  0xdd   :  { %v109_v35 = vrot.slane %v84_v15, %v7066_v17  ;;  %v141_v59 = vrot.slane %v85_v42, %v7066_v17  ;;  %v145_v63 = vrot.slane %v85_v42, %v7071_v20 }
  0xdf   :  { %5753 = vmatpush3.bf16.msra.mxu0 %v5752_v40  ;;  %5785 = vmatpush3.bf16.msra.mxu1 %v5784_v41  ;;  %v113_v40 = vrot.slane %v84_v15, %v7071_v20  ;;  %v121_v41 = vrot.slane %v84_v15, %v7074_v22 }
  0xe0   :  { %5755 = vmatprep.subr.bf16.mxu0 %v5754_v45  ;;  %5787 = vmatprep.subr.bf16.mxu1 %v5786_v49  ;;  %v133_v49 = vrot.slane %v85_v42, %v6937_v21 }
  0xe3   :  { %5757 = vmatpush3.bf16.msra.mxu0 %v5756_v50  ;;  %5789 = vmatpush3.bf16.msra.mxu1 %v5788_v53  ;;  %v137_v53 = vrot.slane %v85_v42, %v6952_v27 }
  0xe4   :  { %5759 = vmatprep.subr.bf16.mxu0 %v5758_v57  ;;  %5791 = vmatprep.subr.bf16.mxu1 %v5790_v60  ;;  %v149_v60 = vrot.slane %v85_v42, %v7041_v8 }
  0xe7   :  { %5761 = vmatpush3.bf16.msra.mxu0 %v5760_v0  ;;  %5793 = vmatpush3.bf16.msra.mxu1 %v5792_v1  ;;  %v153_v0 = vrot.slane %v85_v42, %v7074_v22  ;;  %v7115_v1 = vsub.s32 0, %v6626_v30 }
  0xe8   :  { %5795 = vmatprep.subr.bf16.mxu0 %v5794_v5  ;;  %5827 = vmatprep.subr.bf16.mxu1 %v5826_v7 }
  0xe9   :  { %v157_v15 = vrot.slane %v6957_v28, %v7115_v1 }
 0x171   :  { %v7076_v23 = vpop.f32.mrb[0].mxu0  ;;  %v436_v25 = vpop.f32.mrb[0].mxu1 }
 0x172   :  { %v7078_v29 = vadd.f32 %v436_v25, %v101_v16  ;;  %v367_v32 = vpop.f32.mrb[1].mxu0  ;;  %v438_v33 = vpop.f32.mrb[1].mxu1 }
 0x173   :  { %v7082_v37 = vadd.f32 %v367_v32, %v97_v18  ;;  %v7084_v38 = vadd.f32 %v438_v33, %v105_v19 }
 0x175   :  { %v507_v43 = vpop.f32.mrb[2].mxu0  ;;  %v578_v44 = vpop.f32.mrb[2].mxu1 }
 0x176   :  { %v7091_v45 = vadd.f32 %v507_v43, %v109_v35  ;;  %v7093_v46 = vadd.f32 %v578_v44, %v117_v36  ;;  %v509_v47 = vpop.f32.mrb[3].mxu0  ;;  %v580_v48 = vpop.f32.mrb[3].mxu1  ;;  %v185_v44 = vrot.slane %v6957_v28, %v7074_v22 }
 0x177   :  { %v7096_v50 = vadd.f32 %v509_v47, %v113_v40  ;;  %v7098_v51 = vadd.f32 %v580_v48, %v121_v41  ;;  %v173_v40 = vrot.slane %v6957_v28, %v7066_v17  ;;  %v181_v41 = vrot.slane %v6957_v28, %v7041_v8  ;;  %v7155_v47 = vld [vmem:[%s9475_s4] sm:$0xff] }
 0x179   :  { %v7102_v54 = vpop.f32.mrb[4].mxu0  ;;  %v720_v55 = vpop.f32.mrb[4].mxu1 }
 0x17a   :  { %9482 = vst [vmem:[#allocation3_spill] sm:$0xff] %v7102_v54  ;;  %v7104_v56 = vadd.f32 %v720_v55, %v133_v49  ;;  %v651_v57 = vpop.f32.mrb[5].mxu0  ;;  %v722_v58 = vpop.f32.mrb[5].mxu1  ;;  %v1176_v55 = vrot.slane %v7155_v47, %v6949_v26 }
 0x17b   :  { %v7108_v61 = vadd.f32 %v651_v57, %v129_v52  ;;  %v7110_v62 = vadd.f32 %v722_v58, %v137_v53  ;;  %v2675_v57 = vld [vmem:[%s9473_s6 + $0x208] sm:$0xff]  ;;  %v2706_v58 = vld [vmem:[%s9473_s6 + $0x300] sm:$0xff] }
 0x17c   :  { %9483 = vst [vmem:[#allocation4_spill] sm:$0xff] %v7104_v56  ;;  %v2686_v56 = vld [vmem:[%s9473_s6 + $0x260] sm:$0xff] }
 0x17d   :  { %9484 = vst [vmem:[#allocation5_spill] sm:$0xff] %v7110_v62  ;;  %v791_v2 = vpop.f32.mrb[6].mxu0  ;;  %v862_v3 = vpop.f32.mrb[6].mxu1  ;;  %v2738_v62 = vld [vmem:[%s9473_s6 + $0x400] sm:$0xff] }
 0x17e   :  { %v7117_v4 = vadd.f32 %v791_v2, %v141_v59  ;;  %v7119_v5 = vadd.f32 %v862_v3, %v149_v60  ;;  %v793_v6 = vpop.f32.mrb[7].mxu0  ;;  %v864_v7 = vpop.f32.mrb[7].mxu1  ;;  %v2692_v2 = vld [vmem:[%s9473_s6 + $0x290] sm:$0xff]  ;;  %v2693_v3 = vld [vmem:[%s9473_s6 + $0x298] sm:$0xff] }
 0x17f   :  { %v7123_v16 = vadd.f32 %v793_v6, %v145_v63  ;;  %v7125_v18 = vadd.f32 %v864_v7, %v153_v0  ;;  %v1184_v63 = vrot.slane %v7155_v47, %v6952_v27  ;;  %v2707_v0 = vld [vmem:[%s9473_s6 + $0x308] sm:$0xff]  ;;  %v1172_v7 = vrot.slane %v7155_v47, %v7115_v1 }
 0x180   :  { %9485 = vst [vmem:[#allocation6_spill] sm:$0xff] %v7117_v4  ;;  %9486 = vst [vmem:[#allocation7_spill] sm:$0xff] %v7119_v5  ;;  %v5798_v14 = vpack.c.bf16 %v2693_v3, %v2692_v2  ;;  %v2694_v3 = vld [vmem:[%s9473_s6 + $0x2a0] sm:$0xff]  ;;  %v9495_v4 = vrot.slane %v7053_v11, %v6949_v26 }
 0x181   :  { %9487 = vst [vmem:[#allocation8_spill] sm:$0xff] %v7123_v16  ;;  %9488 = vst [vmem:[#allocation9_spill] sm:$0xff] %v7125_v18  ;;  %v933_v19 = vpop.f32.mrb[8].mxu0  ;;  %v1004_v25 = vpop.f32.mrb[8].mxu1 }
 0x182   :  { %v7127_v32 = vadd.f32 %v933_v19, %v157_v15  ;;  %v7132_v33 = vadd.f32 %v1004_v25, %v165_v34  ;;  %v935_v35 = vpop.f32.mrb[9].mxu0  ;;  %v1006_v36 = vpop.f32.mrb[9].mxu1  ;;  %v177_v34 = vrot.slane %v6957_v28, %v7071_v20  ;;  %v2674_v28 = vld [vmem:[%s9473_s6 + $0x200] sm:$0xff]  ;;  %v1180_v15 = vrot.slane %v7155_v47, %v6937_v21 }
 0x183   :  { %v7141_v42 = vadd.f32 %v935_v35, %v161_v39  ;;  %v7146_v43 = vadd.f32 %v1006_v36, %v169_v24 }
 0x184   :  { %9489 = vst [vmem:[#allocation10_spill] sm:$0xff] %v7127_v32  ;;  %9490 = vst [vmem:[#allocation11_spill] sm:$0xff] %v7132_v33 }
 0x185   :  { %9491 = vst [vmem:[#allocation12_spill] sm:$0xff] %v7141_v42  ;;  %9492 = vst [vmem:[#allocation13_spill] sm:$0xff] %v7146_v43  ;;  %v1075_v48 = vpop.f32.mrb[10].mxu0  ;;  %v1146_v49 = vpop.f32.mrb[10].mxu1  ;;  %v2678_v43 = vld [vmem:[%s9473_s6 + $0x220] sm:$0xff] }
 0x186   :  { %v7157_v39 = vadd.f32 %v1075_v48, %v173_v40  ;;  %v7159_v52 = vadd.f32 %v1146_v49, %v181_v41  ;;  %v1077_v53 = vpop.f32.mrb[11].mxu0  ;;  %v1148_v24 = vpop.f32.mrb[11].mxu1  ;;  %v1192_v40 = vrot.slane %v7155_v47, %v7071_v20  ;;  %v5796_v41 = vpack.c.bf16 %v2675_v57, %v2674_v28  ;;  %v2676_v28 = vld [vmem:[%s9473_s6 + $0x210] sm:$0xff]  ;;  %v2677_v57 = vld [vmem:[%s9473_s6 + $0x218] sm:$0xff] }
 0x187   :  { %v7172_v59 = vadd.f32 %v1077_v53, %v177_v34  ;;  %v7174_v60 = vadd.f32 %v1148_v24, %v185_v44  ;;  %v2724_v34 = vld [vmem:[%s9473_s6 + $0x390] sm:$0xff]  ;;  %v2725_v44 = vld [vmem:[%s9473_s6 + $0x398] sm:$0xff]  ;;  %v1200_v53 = vrot.slane %v7155_v47, %v7074_v22  ;;  %v5828_v24 = vpack.c.bf16 %v2707_v0, %v2706_v58 }
 0x188   :  { %v4682_v6 = vmul.f32 %v7157_v39, %v7157_v39  ;;  %v4684_v19 = vmul.f32 %v7159_v52, %v7159_v52  ;;  %v5830_v0 = vpack.c.bf16 %v2725_v44, %v2724_v34 }
 0x189   :  { %v4683_v25 = vmul.f32 %v7172_v59, %v7172_v59  ;;  %v1440_v35 = vpop.f32.mrb[12].mxu0  ;;  %v1511_v36 = vpop.f32.mrb[12].mxu1  ;;  %v4685_v31 = vmul.f32 %v7174_v60, %v7174_v60 }
 0x18a   :  { %v1442_v48 = vpop.f32.mrb[13].mxu0  ;;  %v1513_v49 = vpop.f32.mrb[13].mxu1  ;;  %v4687_v13 = vsel %vm4686_vm3, %v4682_v6, 0.0  ;;  %v1441_v32 = vadd.f32 %v1440_v35, %v1172_v7  ;;  %v1512_v58 = vadd.f32 %v1511_v36, %v1180_v15  ;;  %v4690_v7 = vsel %vm4686_vm3, %v4684_v19, 0.0  ;;  %v2695_v15 = vld [vmem:[%s9473_s6 + $0x2a8] sm:$0xff] }
 0x18b   :  { %v1443_v12 = vadd.f32 %v1442_v48, %v1176_v55  ;;  %v1514_v10 = vadd.f32 %v1513_v49, %v1184_v63  ;;  %v4688_v33 = vsel %vm4686_vm3, %v4683_v25, 0.0  ;;  %v2708_v55 = vld [vmem:[%s9473_s6 + $0x310] sm:$0xff]  ;;  %v2709_v63 = vld [vmem:[%s9473_s6 + $0x318] sm:$0xff]  ;;  %v4692_v49 = vsel %vm4686_vm3, %v4685_v31, 0.0  ;;  %v2711_v31 = vld [vmem:[%s9473_s6 + $0x328] sm:$0xff] }
 0x18c   :  { %v4689_v2 = vadd.f32 %v4688_v33, %v4687_v13  ;;  %v2726_v13 = vld [vmem:[%s9473_s6 + $0x3a0] sm:$0xff]  ;;  %v2727_v33 = vld [vmem:[%s9473_s6 + $0x3a8] sm:$0xff]  ;;  %v5832_v44 = vpack.c.bf16 %v2709_v63, %v2708_v55  ;;  %v2729_v55 = vld [vmem:[%s9473_s6 + $0x3b8] sm:$0xff] }
 0x18d   :  { %v7226_v6 = vpop.f32.mrb[14].mxu0  ;;  %v7228_v48 = vpop.f32.mrb[14].mxu1  ;;  %3058 = vmatprep.mubr.f32.mxu0 %v1443_v12  ;;  %3128 = vmatprep.mubr.f32.mxu1 %v1514_v10  ;;  %v1212_v10 = vrot.slane %v7046_v9, %v6937_v21  ;;  %v5800_v12 = vpack.c.bf16 %v2677_v57, %v2676_v28  ;;  %v5802_v28 = vpack.c.bf16 %v2695_v15, %v2694_v3 }
 0x18e   :  { %v1584_v25 = vpop.f32.mrb[15].mxu0  ;;  %v1655_v35 = vpop.f32.mrb[15].mxu1  ;;  %3059 = vmatmul.mubr.f32.vlgmr.msra.gmra.mrb[24].mxu0 %v1441_v32  ;;  %3129 = vmatmul.mubr.f32.vlgmr.msra.gmra.mrb[24].mxu1 %v1512_v58  ;;  %v4691_v19 = vadd.f32 %v4690_v7, %v4689_v2  ;;  %v2679_v32 = vld [vmem:[%s9473_s6 + $0x228] sm:$0xff]  ;;  %v5834_v57 = vpack.c.bf16 %v2727_v33, %v2726_v13  ;;  %v1220_v7 = vrot.slane %v7046_v9, %v7066_v17 }
 0x18f   :  { %v1585_v36 = vadd.f32 %v1584_v25, %v1192_v40  ;;  %v1656_v34 = vadd.f32 %v1655_v35, %v1200_v53  ;;  %5797 = vmatpush3.bf16.msra.mxu0 %v5796_v41  ;;  %5829 = vmatpush3.bf16.msra.mxu1 %v5828_v24  ;;  %v2710_v40 = vld [vmem:[%s9473_s6 + $0x320] sm:$0xff]  ;;  %v2696_v41 = vld [vmem:[%s9473_s6 + $0x2b0] sm:$0xff]  ;;  %v5804_v15 = vpack.c.bf16 %v2679_v32, %v2678_v43  ;;  %v2699_v32 = vld [vmem:[%s9473_s6 + $0x2c8] sm:$0xff] }
 0x190   :  { %5799 = vmatprep.subr.bf16.mxu0 %v5798_v14  ;;  %5831 = vmatprep.subr.bf16.mxu1 %v5830_v0  ;;  %v4693_v58 = vadd.f32 %v4692_v49, %v4691_v19  ;;  %v2697_v14 = vld [vmem:[%s9473_s6 + $0x2b8] sm:$0xff]  ;;  %v2728_v0 = vld [vmem:[%s9473_s6 + $0x3b0] sm:$0xff]  ;;  %v1224_v13 = vrot.slane %v7046_v9, %v7071_v20  ;;  %v1232_v33 = vrot.slane %v7046_v9, %v7074_v22 }
 0x191   :  { %v7258_v53 = vpop.f32.mrb[16].mxu0  ;;  %v1795_v24 = vpop.f32.mrb[16].mxu1  ;;  %3198 = vmatprep.mubr.f32.mxu0 %v1585_v36  ;;  %3268 = vmatprep.mubr.f32.mxu1 %v1656_v34  ;;  %v5836_v25 = vpack.c.bf16 %v2711_v31, %v2710_v40  ;;  %v2680_v35 = vld [vmem:[%s9473_s6 + $0x230] sm:$0xff]  ;;  %v5806_v43 = vpack.c.bf16 %v2697_v14, %v2696_v41  ;;  %v2713_v36 = vld [vmem:[%s9473_s6 + $0x338] sm:$0xff]  ;;  %v2698_v34 = vld [vmem:[%s9473_s6 + $0x2c0] sm:$0xff]  ;;  %v9493_v40 = vrot.slane %v7046_v9, %v7041_v8 }
 0x192   :  { %v7269_v63 = vadd.f32 %v1795_v24, %v1212_v10  ;;  %v7271_v2 = vpop.f32.mrb[17].mxu0  ;;  %v7273_v3 = vpop.f32.mrb[17].mxu1  ;;  %4694 = vadd.xlane.f32.xlu0 %v4693_v58  ;;  %v2681_v10 = vld [vmem:[%s9473_s6 + $0x238] sm:$0xff]  ;;  %v2712_v19 = vld [vmem:[%s9473_s6 + $0x330] sm:$0xff]  ;;  %v2730_v58 = vld [vmem:[%s9473_s6 + $0x3c0] sm:$0xff]  ;;  %v1236_v14 = vrot.slane %v7053_v11, %v7115_v1 }
 0x193   :  { %5801 = vmatpush3.bf16.msra.mxu0 %v5800_v12  ;;  %5833 = vmatpush3.bf16.msra.mxu1 %v5832_v44  ;;  %v5838_v12 = vpack.c.bf16 %v2729_v55, %v2728_v0  ;;  %v5808_v0 = vpack.c.bf16 %v2681_v10, %v2680_v35  ;;  %v2682_v55 = vld [vmem:[%s9473_s6 + $0x240] sm:$0xff]  ;;  %v2715_v10 = vld [vmem:[%s9473_s6 + $0x348] sm:$0xff] }
 0x194   :  { %5803 = vmatprep.subr.bf16.mxu0 %v5802_v28  ;;  %5835 = vmatprep.subr.bf16.mxu1 %v5834_v57  ;;  %v2731_v28 = vld [vmem:[%s9473_s6 + $0x3c8] sm:$0xff]  ;;  %v2714_v35 = vld [vmem:[%s9473_s6 + $0x340] sm:$0xff] }
 0x195   :  { %v1866_v44 = vpop.f32.mrb[18].mxu0  ;;  %v1937_v49 = vpop.f32.mrb[18].mxu1  ;;  %v5842_v5 = vpack.c.bf16 %v2731_v28, %v2730_v58  ;;  %v9494_v58 = vrot.slane %v7053_v11, %v6937_v21  ;;  %v5844_v21 = vpack.c.bf16 %v2715_v10, %v2714_v35 }
 0x196   :  { %v7305_v57 = vadd.f32 %v1866_v44, %v1220_v7  ;;  %v7310_v31 = vadd.f32 %v1937_v49, %v9493_v40  ;;  %v1868_v41 = vpop.f32.mrb[19].mxu0  ;;  %v1939_v24 = vpop.f32.mrb[19].mxu1  ;;  %v2683_v7 = vld [vmem:[%s9473_s6 + $0x248] sm:$0xff]  ;;  %v5840_v49 = vpack.c.bf16 %v2713_v36, %v2712_v19  ;;  %v5810_v40 = vpack.c.bf16 %v2699_v32, %v2698_v34  ;;  %v2701_v19 = vld [vmem:[%s9473_s6 + $0x2d8] sm:$0xff]  ;;  %v2732_v36 = vld [vmem:[%s9473_s6 + $0x3d0] sm:$0xff] }
 0x197   :  { %v7320_v44 = vadd.f32 %v1868_v41, %v1224_v13  ;;  %v7322_v42 = vadd.f32 %v1939_v24, %v1232_v33  ;;  %5805 = vmatpush3.bf16.msra.mxu0 %v5804_v15  ;;  %5837 = vmatpush3.bf16.msra.mxu1 %v5836_v25  ;;  %v2700_v13 = vld [vmem:[%s9473_s6 + $0x2d0] sm:$0xff]  ;;  %v1252_v25 = vrot.slane %v7053_v11, %v7066_v17  ;;  %v2733_v34 = vld [vmem:[%s9473_s6 + $0x3d8] sm:$0xff] }
 0x198   :  { %5807 = vmatprep.subr.bf16.mxu0 %v5806_v43  ;;  %5839 = vmatprep.subr.bf16.mxu1 %v5838_v12  ;;  %v1260_v43 = vrot.slane %v7053_v11, %v7041_v8  ;;  %v5812_v12 = vpack.c.bf16 %v2683_v7, %v2682_v55  ;;  %v1256_v55 = vrot.slane %v7053_v11, %v7071_v20  ;;  %v2684_v20 = vld [vmem:[%s9473_s6 + $0x250] sm:$0xff] }
 0x199   :  { %v2008_v33 = vpop.f32.mrb[20].mxu0  ;;  %v2079_v15 = vpop.f32.mrb[20].mxu1  ;;  %v1264_v7 = vrot.slane %v7053_v11, %v7074_v22  ;;  %v2685_v22 = vld [vmem:[%s9473_s6 + $0x258] sm:$0xff] }
 0x19a   :  { %v7346_v32 = vadd.f32 %v2008_v33, %v1236_v14  ;;  %v7351_v28 = vadd.f32 %v2079_v15, %v9494_v58  ;;  %v2010_v41 = vpop.f32.mrb[21].mxu0  ;;  %v2081_v24 = vpop.f32.mrb[21].mxu1  ;;  %v9496_v14 = vrot.slane %v7053_v11, %v6952_v27  ;;  %v5846_v15 = vpack.c.bf16 %v2733_v34, %v2732_v36  ;;  %v2716_v11 = vld [vmem:[%s9473_s6 + $0x350] sm:$0xff] }
 0x19b   :  { %v7360_v18 = vadd.f32 %v2010_v41, %v9495_v4  ;;  %5809 = vmatpush3.bf16.msra.mxu0 %v5808_v0  ;;  %5841 = vmatpush3.bf16.msra.mxu1 %v5840_v49  ;;  %v5814_v4 = vpack.c.bf16 %v2701_v19, %v2700_v13  ;;  %v2717_v0 = vld [vmem:[%s9473_s6 + $0x358] sm:$0xff]  ;;  %v2702_v49 = vld [vmem:[%s9473_s6 + $0x2e0] sm:$0xff]  ;;  %v2735_v13 = vld [vmem:[%s9473_s6 + $0x3e8] sm:$0xff]  ;;  %v5816_v41 = vpack.c.bf16 %v2685_v22, %v2684_v20 }
 0x19c   :  { %v7365_v33 = vadd.f32 %v2081_v24, %v9496_v14  ;;  %5811 = vmatprep.subr.bf16.mxu0 %v5810_v40  ;;  %5843 = vmatprep.subr.bf16.mxu1 %v5842_v5  ;;  %v2703_v5 = vld [vmem:[%s9473_s6 + $0x2e8] sm:$0xff]  ;;  %v2734_v40 = vld [vmem:[%s9473_s6 + $0x3e0] sm:$0xff]  ;;  %v5848_v16 = vpack.c.bf16 %v2717_v0, %v2716_v11  ;;  %v2736_v11 = vld [vmem:[%s9473_s6 + $0x3f0] sm:$0xff] }
 0x19d   :  { %v2150_v35 = vpop.f32.mrb[22].mxu0  ;;  %v2221_v10 = vpop.f32.mrb[22].mxu1  ;;  %v5850_v20 = vpack.c.bf16 %v2735_v13, %v2734_v40  ;;  %v2737_v0 = vld [vmem:[%s9473_s6 + $0x3f8] sm:$0xff] }
 0x19e   :  { %v7391_v19 = vadd.f32 %v2150_v35, %v1252_v25  ;;  %v7393_v36 = vadd.f32 %v2221_v10, %v1260_v43  ;;  %v2152_v34 = vpop.f32.mrb[23].mxu0  ;;  %v2223_v58 = vpop.f32.mrb[23].mxu1  ;;  %v2687_v25 = vld [vmem:[%s9473_s6 + $0x268] sm:$0xff]  ;;  %v2721_v40 = vld [vmem:[%s9473_s6 + $0x378] sm:$0xff] }
 0x19f   :  { %v7395_v24 = vadd.f32 %v2152_v34, %v1256_v55  ;;  %v7397_v14 = vadd.f32 %v2223_v58, %v1264_v7  ;;  %5813 = vmatpush3.bf16.msra.mxu0 %v5812_v12  ;;  %5845 = vmatpush3.bf16.msra.mxu1 %v5844_v21  ;;  %v5818_v55 = vpack.c.bf16 %v2703_v5, %v2702_v49  ;;  %v2718_v12 = vld [vmem:[%s9473_s6 + $0x360] sm:$0xff]  ;;  %v2719_v7 = vld [vmem:[%s9473_s6 + $0x368] sm:$0xff]  ;;  %v2704_v21 = vld [vmem:[%s9473_s6 + $0x2f0] sm:$0xff] }
 0x1a0   :  { %v4696_v43 = vmul.f32 %v7391_v19, %v7391_v19  ;;  %5815 = vmatprep.subr.bf16.mxu0 %v5814_v4  ;;  %5847 = vmatprep.subr.bf16.mxu1 %v5846_v15  ;;  %v4698_v22 = vmul.f32 %v7393_v36, %v7393_v36  ;;  %v2705_v15 = vld [vmem:[%s9473_s6 + $0x2f8] sm:$0xff]  ;;  %v5820_v35 = vpack.c.bf16 %v2687_v25, %v2686_v56  ;;  %v2720_v5 = vld [vmem:[%s9473_s6 + $0x370] sm:$0xff] }
 0x1a1   :  { %v4697_v4 = vmul.f32 %v7395_v24, %v7395_v24  ;;  %v5852_v10 = vpack.c.bf16 %v2719_v7, %v2718_v12  ;;  %v4699_v13 = vmul.f32 %v7397_v14, %v7397_v14  ;;  %v5822_v58 = vpack.c.bf16 %v2705_v15, %v2704_v21  ;;  %v2688_v56 = vld [vmem:[%s9473_s6 + $0x270] sm:$0xff]  ;;  %v2689_v25 = vld [vmem:[%s9473_s6 + $0x278] sm:$0xff]  ;;  %v2787_v7 = vld [vmem:[%s9473_s6 + $0x588] sm:$0xff] }
 0x1a2   :  { %v4700_v49 = vsel %vm4686_vm3, %v4696_v43, 0.0  ;;  %v2754_v43 = vld [vmem:[%s9473_s6 + $0x480] sm:$0xff]  ;;  %v4703_v12 = vsel %vm4686_vm3, %v4698_v22, 0.0  ;;  %v1188_v21 = vrot.slane %v7155_v47, %v7066_v17  ;;  %v1196_v15 = vrot.slane %v7155_v47, %v7041_v8  ;;  %v2739_v17 = vld [vmem:[%s9473_s6 + $0x408] sm:$0xff] }
 0x1a3   :  { %5817 = vmatpush3.bf16.msra.mxu0 %v5816_v41  ;;  %5849 = vmatpush3.bf16.msra.mxu1 %v5848_v16  ;;  %v4701_v34 = vsel %vm4686_vm3, %v4697_v4, 0.0  ;;  %v5854_v41 = vpack.c.bf16 %v2737_v0, %v2736_v11  ;;  %v5856_v22 = vpack.c.bf16 %v2721_v40, %v2720_v5  ;;  %v4705_v11 = vsel %vm4686_vm3, %v4699_v13, 0.0  ;;  %v2770_v47 = vld [vmem:[%s9473_s6 + $0x500] sm:$0xff]  ;;  %v2788_v40 = vld [vmem:[%s9473_s6 + $0x590] sm:$0xff]  ;;  %v2789_v13 = vld [vmem:[%s9473_s6 + $0x598] sm:$0xff] }
 0x1a4   :  { %5819 = vmatprep.subr.bf16.mxu0 %v5818_v55  ;;  %5851 = vmatprep.subr.bf16.mxu1 %v5850_v20  ;;  %v4702_v16 = vadd.f32 %v4701_v34, %v4700_v49  ;;  %v2755_v55 = vld [vmem:[%s9473_s6 + $0x488] sm:$0xff]  ;;  %v2786_v20 = vld [vmem:[%s9473_s6 + $0x580] sm:$0xff]  ;;  %v5824_v0 = vpack.c.bf16 %v2689_v25, %v2688_v56  ;;  %v1208_v8 = vrot.slane %v7046_v9, %v6949_v26  ;;  %v2757_v26 = vld [vmem:[%s9473_s6 + $0x498] sm:$0xff] }
 0x1a5   :  { %v5858_v34 = vpack.c.bf16 %v2755_v55, %v2754_v43  ;;  %v5890_v54 = vpack.c.bf16 %v2787_v7, %v2786_v20  ;;  %v1216_v5 = vrot.slane %v7046_v9, %v6952_v27  ;;  %v1654_v27 = vadd.f32 %v7228_v48, %v1196_v15  ;;  %v2740_v56 = vld [vmem:[%s9473_s6 + $0x410] sm:$0xff]  ;;  %v2741_v25 = vld [vmem:[%s9473_s6 + $0x418] sm:$0xff]  ;;  %v2758_v48 = vld [vmem:[%s9473_s6 + $0x4a0] sm:$0xff] }
 0x1a6   :  { %v4704_v4 = vadd.f32 %v4703_v12, %v4702_v16  ;;  %v2772_v43 = vld [vmem:[%s9473_s6 + $0x510] sm:$0xff]  ;;  %v5894_v12 = vpack.c.bf16 %v2789_v13, %v2788_v40  ;;  %v2759_v55 = vld [vmem:[%s9473_s6 + $0x4a8] sm:$0xff]  ;;  %v2745_v40 = vld [vmem:[%s9473_s6 + $0x438] sm:$0xff] }
 0x1a7   :  { %5821 = vmatpush3.bf16.msra.mxu0 %v5820_v35  ;;  %5853 = vmatpush3.bf16.msra.mxu1 %v5852_v10  ;;  %v2771_v35 = vld [vmem:[%s9473_s6 + $0x508] sm:$0xff]  ;;  %v2756_v10 = vld [vmem:[%s9473_s6 + $0x490] sm:$0xff]  ;;  %v1798_v20 = vadd.f32 %v7273_v3, %v1216_v5  ;;  %v5866_v15 = vpack.c.bf16 %v2759_v55, %v2758_v48  ;;  %v2742_v3 = vld [vmem:[%s9473_s6 + $0x420] sm:$0xff] }
 0x1a8   :  { %5823 = vmatprep.subr.bf16.mxu0 %v5822_v58  ;;  %5855 = vmatprep.subr.bf16.mxu1 %v5854_v41  ;;  %v4706_v49 = vadd.f32 %v4705_v11, %v4704_v4  ;;  %v5860_v58 = vpack.c.bf16 %v2739_v17, %v2738_v62  ;;  %v1583_v41 = vadd.f32 %v7226_v6, %v1188_v21  ;;  %v2791_v7 = vld [vmem:[%s9473_s6 + $0x5a8] sm:$0xff]  ;;  %v2774_v11 = vld [vmem:[%s9473_s6 + $0x520] sm:$0xff]  ;;  %v2761_v17 = vld [vmem:[%s9473_s6 + $0x4b8] sm:$0xff] }
 0x1a9   :  { %v5892_v16 = vpack.c.bf16 %v2771_v35, %v2770_v47  ;;  %v1727_v62 = vadd.f32 %v7271_v2, %v1208_v8  ;;  %v5862_v6 = vpack.c.bf16 %v2757_v26, %v2756_v10  ;;  %v2790_v2 = vld [vmem:[%s9473_s6 + $0x5a0] sm:$0xff]  ;;  %v5864_v21 = vpack.c.bf16 %v2741_v25, %v2740_v56  ;;  %v2792_v8 = vld [vmem:[%s9473_s6 + $0x5b0] sm:$0xff]  ;;  %v2793_v47 = vld [vmem:[%s9473_s6 + $0x5b8] sm:$0xff] }
 0x1aa   :  { %4707 = vadd.xlane.f32.xlu1 %v4706_v49  ;;  %v2775_v49 = vld [vmem:[%s9473_s6 + $0x528] sm:$0xff]  ;;  %v2744_v26 = vld [vmem:[%s9473_s6 + $0x430] sm:$0xff]  ;;  %v2794_v56 = vld [vmem:[%s9473_s6 + $0x5c0] sm:$0xff] }
 0x1ab   :  { %5857 = vmatpush3.bf16.msra.mxu1 %v5856_v22  ;;  %5825 = vmatpush3.bf16.msra.mxu0 %v5824_v0  ;;  %v2743_v22 = vld [vmem:[%s9473_s6 + $0x428] sm:$0xff]  ;;  %v5898_v0 = vpack.c.bf16 %v2791_v7, %v2790_v2  ;;  %v5900_v10 = vpack.c.bf16 %v2775_v49, %v2774_v11  ;;  %v2776_v13 = vld [vmem:[%s9473_s6 + $0x530] sm:$0xff]  ;;  %v2778_v48 = vld [vmem:[%s9473_s6 + $0x540] sm:$0xff] }
 0x1ac   :  { %5859 = vmatprep.subr.bf16.mxu0 %v5858_v34  ;;  %5891 = vmatprep.subr.bf16.mxu1 %v5890_v54  ;;  %v2773_v54 = vld [vmem:[%s9473_s6 + $0x518] sm:$0xff]  ;;  %v2760_v34 = vld [vmem:[%s9473_s6 + $0x4b0] sm:$0xff]  ;;  %v5868_v35 = vpack.c.bf16 %v2743_v22, %v2742_v3  ;;  %v2795_v25 = vld [vmem:[%s9473_s6 + $0x5c8] sm:$0xff] }
 0x1ad   :  { %v5896_v4 = vpack.c.bf16 %v2773_v54, %v2772_v43  ;;  %v5870_v5 = vpack.c.bf16 %v2761_v17, %v2760_v34  ;;  %v5872_v43 = vpack.c.bf16 %v2745_v40, %v2744_v26  ;;  %v2747_v54 = vld [vmem:[%s9473_s6 + $0x448] sm:$0xff]  ;;  %v5906_v55 = vpack.c.bf16 %v2795_v25, %v2794_v56  ;;  %v2764_v2 = vld [vmem:[%s9473_s6 + $0x4d0] sm:$0xff]  ;;  %v2765_v7 = vld [vmem:[%s9473_s6 + $0x4d8] sm:$0xff] }
 0x1ae   :  { %3199 = vmatmul.mubr.f32.vlgmr.msra.gmra.mrb[26].mxu0 %v1583_v41  ;;  %3269 = vmatmul.mubr.f32.vlgmr.msra.gmra.mrb[26].mxu1 %v1654_v27  ;;  %v2777_v41 = vld [vmem:[%s9473_s6 + $0x538] sm:$0xff]  ;;  %v2762_v27 = vld [vmem:[%s9473_s6 + $0x4c0] sm:$0xff]  ;;  %v5878_v22 = vpack.c.bf16 %v2765_v7, %v2764_v2  ;;  %v2748_v11 = vld [vmem:[%s9473_s6 + $0x450] sm:$0xff] }
 0x1af   :  { %5861 = vmatpush3.bf16.msra.mxu0 %v5860_v58  ;;  %3338 = vmatprep.mubr.f32.mxu0 %v1727_v62  ;;  %v5902_v58 = vpack.c.bf16 %v2793_v47, %v2792_v8  ;;  %v5904_v62 = vpack.c.bf16 %v2777_v41, %v2776_v13  ;;  %v2780_v49 = vld [vmem:[%s9473_s6 + $0x550] sm:$0xff]  ;;  %v2781_v17 = vld [vmem:[%s9473_s6 + $0x558] sm:$0xff]  ;;  %v2766_v8 = vld [vmem:[%s9473_s6 + $0x4e0] sm:$0xff] }
 0x1b0   :  { %5893 = vmatpush3.bf16.msra.mxu1 %v5892_v16  ;;  %3408 = vmatprep.mubr.f32.mxu1 %v1798_v20  ;;  %v2763_v16 = vld [vmem:[%s9473_s6 + $0x4c8] sm:$0xff]  ;;  %v5912_v26 = vpack.c.bf16 %v2781_v17, %v2780_v49  ;;  %v2750_v13 = vld [vmem:[%s9473_s6 + $0x460] sm:$0xff]  ;;  %v2768_v56 = vld [vmem:[%s9473_s6 + $0x4f0] sm:$0xff] }
 0x1b1   :  { %5863 = vmatprep.subr.bf16.mxu0 %v5862_v6  ;;  %5895 = vmatprep.subr.bf16.mxu1 %v5894_v12  ;;  %v5874_v6 = vpack.c.bf16 %v2763_v16, %v2762_v27  ;;  %v2746_v12 = vld [vmem:[%s9473_s6 + $0x440] sm:$0xff]  ;;  %v2779_v20 = vld [vmem:[%s9473_s6 + $0x548] sm:$0xff]  ;;  %v2769_v25 = vld [vmem:[%s9473_s6 + $0x4f8] sm:$0xff] }
 0x1b2   :  { %v5908_v3 = vpack.c.bf16 %v2779_v20, %v2778_v48  ;;  %v2767_v47 = vld [vmem:[%s9473_s6 + $0x4e8] sm:$0xff]  ;;  %v2782_v41 = vld [vmem:[%s9473_s6 + $0x560] sm:$0xff]  ;;  %v2752_v48 = vld [vmem:[%s9473_s6 + $0x470] sm:$0xff] }
 0x1b3   :  { %5865 = vmatpush3.bf16.msra.mxu0 %v5864_v21  ;;  %v2796_v21 = vld [vmem:[%s9473_s6 + $0x5d0] sm:$0xff]  ;;  %v5882_v40 = vpack.c.bf16 %v2767_v47, %v2766_v8  ;;  %v2783_v16 = vld [vmem:[%s9473_s6 + $0x568] sm:$0xff]  ;;  %v2785_v7 = vld [vmem:[%s9473_s6 + $0x578] sm:$0xff] }
 0x1b4   :  { %5897 = vmatpush3.bf16.msra.mxu1 %v5896_v4  ;;  %5867 = vmatprep.subr.bf16.mxu0 %v5866_v15  ;;  %v2797_v4 = vld [vmem:[%s9473_s6 + $0x5d8] sm:$0xff]  ;;  %v5876_v15 = vpack.c.bf16 %v2747_v54, %v2746_v12  ;;  %v5916_v12 = vpack.c.bf16 %v2783_v16, %v2782_v41  ;;  %v5886_v54 = vpack.c.bf16 %v2769_v25, %v2768_v56  ;;  %v2784_v20 = vld [vmem:[%s9473_s6 + $0x570] sm:$0xff]  ;;  %v2803_v17 = vld [vmem:[%s9473_s6 + $0x608] sm:$0xff] }
 0x1b5   :  { %5899 = vmatprep.subr.bf16.mxu1 %v5898_v0  ;;  %v2749_v0 = vld [vmem:[%s9473_s6 + $0x458] sm:$0xff]  ;;  %v5910_v34 = vpack.c.bf16 %v2797_v4, %v2796_v21  ;;  %v2818_v21 = vld [vmem:[%s9473_s6 + $0x680] sm:$0xff]  ;;  %v2819_v4 = vld [vmem:[%s9473_s6 + $0x688] sm:$0xff] }
 0x1b6   :  { %v5922_v49 = vpack.c.bf16 %v2819_v4, %v2818_v21  ;;  %v2834_v47 = vld [vmem:[%s9473_s6 + $0x700] sm:$0xff]  ;;  %v2804_v41 = vld [vmem:[%s9473_s6 + $0x610] sm:$0xff]  ;;  %v2825_v4 = vld [vmem:[%s9473_s6 + $0x6b8] sm:$0xff] }
 0x1b7   :  { %5869 = vmatpush3.bf16.msra.mxu0 %v5868_v35  ;;  %v2798_v35 = vld [vmem:[%s9473_s6 + $0x5e0] sm:$0xff]  ;;  %v2836_v16 = vld [vmem:[%s9473_s6 + $0x710] sm:$0xff] }
 0x1b8   :  { %5901 = vmatpush3.bf16.msra.mxu1 %v5900_v10  ;;  %5871 = vmatprep.subr.bf16.mxu0 %v5870_v5  ;;  %v2799_v10 = vld [vmem:[%s9473_s6 + $0x5e8] sm:$0xff]  ;;  %v5880_v5 = vpack.c.bf16 %v2749_v0, %v2748_v11  ;;  %v1204_v11 = vrot.slane %v7046_v9, %v7115_v1  ;;  %v5920_v0 = vpack.c.bf16 %v2785_v7, %v2784_v20  ;;  %v2822_v25 = vld [vmem:[%s9473_s6 + $0x6a0] sm:$0xff]  ;;  %v2824_v21 = vld [vmem:[%s9473_s6 + $0x6b0] sm:$0xff] }
 0x1b9   :  { %5903 = vmatprep.subr.bf16.mxu1 %v5902_v58  ;;  %v2751_v58 = vld [vmem:[%s9473_s6 + $0x468] sm:$0xff]  ;;  %v5914_v27 = vpack.c.bf16 %v2799_v10, %v2798_v35  ;;  %v2820_v35 = vld [vmem:[%s9473_s6 + $0x690] sm:$0xff]  ;;  %v2821_v10 = vld [vmem:[%s9473_s6 + $0x698] sm:$0xff] }
 0x1ba   :  { %v2835_v9 = vld [vmem:[%s9473_s6 + $0x708] sm:$0xff]  ;;  %v5926_v56 = vpack.c.bf16 %v2821_v10, %v2820_v35  ;;  %v2806_v20 = vld [vmem:[%s9473_s6 + $0x620] sm:$0xff] }
 0x1bb   :  { %5873 = vmatpush3.bf16.msra.mxu0 %v5872_v43  ;;  %v2800_v43 = vld [vmem:[%s9473_s6 + $0x5f0] sm:$0xff]  ;;  %v2838_v7 = vld [vmem:[%s9473_s6 + $0x720] sm:$0xff]  ;;  %v2859_v10 = vld [vmem:[%s9473_s6 + $0x7c8] sm:$0xff] }
 0x1bc   :  { %5905 = vmatpush3.bf16.msra.mxu1 %v5904_v62  ;;  %5875 = vmatprep.subr.bf16.mxu0 %v5874_v6  ;;  %v2801_v62 = vld [vmem:[%s9473_s6 + $0x5f8] sm:$0xff]  ;;  %v5884_v6 = vpack.c.bf16 %v2751_v58, %v2750_v13  ;;  %v1725_v13 = vadd.f32 %v7258_v53, %v1204_v11  ;;  %v5956_v58 = vpack.c.bf16 %v2835_v9, %v2834_v47  ;;  %v2826_v47 = vld [vmem:[%s9473_s6 + $0x6c0] sm:$0xff]  ;;  %v2827_v9 = vld [vmem:[%s9473_s6 + $0x6c8] sm:$0xff] }
 0x1bd   :  { %5907 = vmatprep.subr.bf16.mxu1 %v5906_v55  ;;  %v2753_v55 = vld [vmem:[%s9473_s6 + $0x478] sm:$0xff]  ;;  %v5918_v2 = vpack.c.bf16 %v2801_v62, %v2800_v43  ;;  %v2823_v43 = vld [vmem:[%s9473_s6 + $0x6a8] sm:$0xff]  ;;  %v5934_v11 = vpack.c.bf16 %v2825_v4, %v2824_v21  ;;  %v2858_v35 = vld [vmem:[%s9473_s6 + $0x7c0] sm:$0xff] }
 0x1be   :  { %v2837_v53 = vld [vmem:[%s9473_s6 + $0x718] sm:$0xff]  ;;  %v2863_v21 = vld [vmem:[%s9473_s6 + $0x7e8] sm:$0xff] }
 0x1bf   :  { %5877 = vmatpush3.bf16.msra.mxu0 %v5876_v15  ;;  %v2850_v15 = vld [vmem:[%s9473_s6 + $0x780] sm:$0xff] }
 0x1c0   :  { %5909 = vmatpush3.bf16.msra.mxu1 %v5908_v3  ;;  %5879 = vmatprep.subr.bf16.mxu0 %v5878_v22  ;;  %v2851_v3 = vld [vmem:[%s9473_s6 + $0x788] sm:$0xff]  ;;  %v5888_v22 = vpack.c.bf16 %v2753_v55, %v2752_v48  ;;  %v5960_v48 = vpack.c.bf16 %v2837_v53, %v2836_v16  ;;  %v5930_v55 = vpack.c.bf16 %v2823_v43, %v2822_v25  ;;  %v2829_v53 = vld [vmem:[%s9473_s6 + $0x6d8] sm:$0xff]  ;;  %v2860_v25 = vld [vmem:[%s9473_s6 + $0x7d0] sm:$0xff] }
 0x1c1   :  { %5911 = vmatprep.subr.bf16.mxu1 %v5910_v34  ;;  %v2802_v34 = vld [vmem:[%s9473_s6 + $0x600] sm:$0xff]  ;;  %v5954_v8 = vpack.c.bf16 %v2851_v3, %v2850_v15  ;;  %v2856_v15 = vld [vmem:[%s9473_s6 + $0x7b0] sm:$0xff]  ;;  %v2843_v16 = vld [vmem:[%s9473_s6 + $0x748] sm:$0xff] }
 0x1c2   :  { %v2861_v43 = vld [vmem:[%s9473_s6 + $0x7d8] sm:$0xff] }
 0x1c3   :  { %5881 = vmatpush3.bf16.msra.mxu0 %v5880_v5  ;;  %v5924_v5 = vpack.c.bf16 %v2803_v17, %v2802_v34  ;;  %v2840_v34 = vld [vmem:[%s9473_s6 + $0x730] sm:$0xff] }
 0x1c4   :  { %5913 = vmatpush3.bf16.msra.mxu1 %v5912_v26  ;;  %5883 = vmatprep.subr.bf16.mxu0 %v5882_v40  ;;  %v2852_v26 = vld [vmem:[%s9473_s6 + $0x790] sm:$0xff]  ;;  %v2853_v40 = vld [vmem:[%s9473_s6 + $0x798] sm:$0xff] }
 0x1c5   :  { %5915 = vmatprep.subr.bf16.mxu1 %v5914_v27  ;;  %v2805_v27 = vld [vmem:[%s9473_s6 + $0x618] sm:$0xff]  ;;  %v5958_v62 = vpack.c.bf16 %v2853_v40, %v2852_v26  ;;  %v5938_v40 = vpack.c.bf16 %v2827_v9, %v2826_v47 }
 0x1c6   :  { %v2865_v47 = vld [vmem:[%s9473_s6 + $0x7f8] sm:$0xff] }
 0x1c7   :  { %5885 = vmatpush3.bf16.msra.mxu0 %v5884_v6  ;;  %v2854_v6 = vld [vmem:[%s9473_s6 + $0x7a0] sm:$0xff] }
 0x1c8   :  { %5917 = vmatpush3.bf16.msra.mxu1 %v5916_v12  ;;  %5887 = vmatprep.subr.bf16.mxu0 %v5886_v54  ;;  %v2855_v12 = vld [vmem:[%s9473_s6 + $0x7a8] sm:$0xff]  ;;  %v5928_v54 = vpack.c.bf16 %v2805_v27, %v2804_v41  ;;  %v2842_v41 = vld [vmem:[%s9473_s6 + $0x740] sm:$0xff]  ;;  %v5970_v27 = vpack.c.bf16 %v2859_v10, %v2858_v35 }
 0x1c9   :  { %5919 = vmatprep.subr.bf16.mxu1 %v5918_v2  ;;  %v2807_v2 = vld [vmem:[%s9473_s6 + $0x628] sm:$0xff] }
 0x1ca   :  { %v5932_v3 = vpack.c.bf16 %v2807_v2, %v2806_v20  ;;  %v5974_v20 = vpack.c.bf16 %v2861_v43, %v2860_v25  ;;  %v2845_v2 = vld [vmem:[%s9473_s6 + $0x758] sm:$0xff] }
 0x1cb   :  { %5889 = vmatpush3.bf16.msra.mxu0 %v5888_v22 }
 0x1cc   :  { %5921 = vmatpush3.bf16.msra.mxu1 %v5920_v0  ;;  %5923 = vmatprep.subr.bf16.mxu0 %v5922_v49  ;;  %v2808_v0 = vld [vmem:[%s9473_s6 + $0x630] sm:$0xff]  ;;  %v2809_v49 = vld [vmem:[%s9473_s6 + $0x638] sm:$0xff] }
 0x1cd   :  { %5955 = vmatprep.subr.bf16.mxu1 %v5954_v8  ;;  %v2841_v8 = vld [vmem:[%s9473_s6 + $0x738] sm:$0xff] }
 0x1ce   :  { %3339 = vmatmul.mubr.f32.vlgmr.msra.gmra.mrb[28].mxu0 %v1725_v13  ;;  %v5968_v26 = vpack.c.bf16 %v2841_v8, %v2840_v34  ;;  %v2810_v13 = vld [vmem:[%s9473_s6 + $0x640] sm:$0xff]  ;;  %v2832_v34 = vld [vmem:[%s9473_s6 + $0x6f0] sm:$0xff] }
 0x1cf   :  { %3409 = vmatmul.mubr.f32.vlgmr.msra.gmra.mrb[28].mxu1 %v7269_v63  ;;  %5925 = vmatpush3.bf16.msra.mxu0 %v5924_v5  ;;  %v5962_v63 = vpack.c.bf16 %v2855_v12, %v2854_v6  ;;  %v5936_v5 = vpack.c.bf16 %v2809_v49, %v2808_v0  ;;  %v5972_v6 = vpack.c.bf16 %v2843_v16, %v2842_v41  ;;  %v2847_v49 = vld [vmem:[%s9473_s6 + $0x768] sm:$0xff]  ;;  %v2864_v8 = vld [vmem:[%s9473_s6 + $0x7f0] sm:$0xff]  ;;  %v2882_v41 = vld [vmem:[%s9473_s6 + $0x880] sm:$0xff] }
 0x1d0   :  { %3478 = vmatprep.mubr.f32.mxu0 %v7320_v44  ;;  %5957 = vmatpush3.bf16.msra.mxu1 %v5956_v58  ;;  %v2839_v44 = vld [vmem:[%s9473_s6 + $0x728] sm:$0xff]  ;;  %v2914_v16 = vld [vmem:[%s9473_s6 + $0x980] sm:$0xff] }
 0x1d1   :  { %3548 = vmatprep.mubr.f32.mxu1 %v7322_v42  ;;  %5927 = vmatprep.subr.bf16.mxu0 %v5926_v56  ;;  %v2857_v42 = vld [vmem:[%s9473_s6 + $0x7b8] sm:$0xff]  ;;  %v5964_v22 = vpack.c.bf16 %v2839_v44, %v2838_v7  ;;  %v2811_v58 = vld [vmem:[%s9473_s6 + $0x648] sm:$0xff]  ;;  %v2828_v56 = vld [vmem:[%s9473_s6 + $0x6d0] sm:$0xff] }
 0x1d2   :  { %5959 = vmatprep.subr.bf16.mxu1 %v5958_v62  ;;  %v5966_v17 = vpack.c.bf16 %v2857_v42, %v2856_v15  ;;  %v5940_v62 = vpack.c.bf16 %v2811_v58, %v2810_v13  ;;  %v5942_v12 = vpack.c.bf16 %v2829_v53, %v2828_v56  ;;  %v2830_v7 = vld [vmem:[%s9473_s6 + $0x6e0] sm:$0xff]  ;;  %v5982_v13 = vpack.c.bf16 %v2865_v47, %v2864_v8  ;;  %v2849_v58 = vld [vmem:[%s9473_s6 + $0x778] sm:$0xff]  ;;  %v2915_v56 = vld [vmem:[%s9473_s6 + $0x988] sm:$0xff] }
 0x1d3   :  { %5929 = vmatpush3.bf16.msra.mxu0 %v5928_v54  ;;  %v2812_v54 = vld [vmem:[%s9473_s6 + $0x650] sm:$0xff]  ;;  %v2862_v44 = vld [vmem:[%s9473_s6 + $0x7e0] sm:$0xff] }
 0x1d4   :  { %5961 = vmatpush3.bf16.msra.mxu1 %v5960_v48  ;;  %5931 = vmatprep.subr.bf16.mxu0 %v5930_v55  ;;  %v2813_v48 = vld [vmem:[%s9473_s6 + $0x658] sm:$0xff]  ;;  %v2844_v55 = vld [vmem:[%s9473_s6 + $0x750] sm:$0xff]  ;;  %v5978_v0 = vpack.c.bf16 %v2863_v21, %v2862_v44 }
 0x1d5   :  { %5963 = vmatprep.subr.bf16.mxu1 %v5962_v63  ;;  %v2831_v63 = vld [vmem:[%s9473_s6 + $0x6e8] sm:$0xff]  ;;  %v5944_v4 = vpack.c.bf16 %v2813_v48, %v2812_v54  ;;  %v5976_v15 = vpack.c.bf16 %v2845_v2, %v2844_v55  ;;  %v2898_v54 = vld [vmem:[%s9473_s6 + $0x900] sm:$0xff]  ;;  %v2884_v55 = vld [vmem:[%s9473_s6 + $0x890] sm:$0xff] }
 0x1d6   :  { %v5946_v42 = vpack.c.bf16 %v2831_v63, %v2830_v7  ;;  %v2899_v48 = vld [vmem:[%s9473_s6 + $0x908] sm:$0xff]  ;;  %v2916_v7 = vld [vmem:[%s9473_s6 + $0x990] sm:$0xff]  ;;  %v2917_v63 = vld [vmem:[%s9473_s6 + $0x998] sm:$0xff] }
 0x1d7   :  { %5933 = vmatpush3.bf16.msra.mxu0 %v5932_v3  ;;  %v2814_v3 = vld [vmem:[%s9473_s6 + $0x660] sm:$0xff]  ;;  %v6020_v44 = vpack.c.bf16 %v2899_v48, %v2898_v54  ;;  %v2868_v21 = vld [vmem:[%s9473_s6 + $0x810] sm:$0xff] }
 0x1d8   :  { %5965 = vmatpush3.bf16.msra.mxu1 %v5964_v22  ;;  %5935 = vmatprep.subr.bf16.mxu0 %v5934_v11  ;;  %v2815_v22 = vld [vmem:[%s9473_s6 + $0x668] sm:$0xff]  ;;  %v2846_v11 = vld [vmem:[%s9473_s6 + $0x760] sm:$0xff] }
 0x1d9   :  { %5967 = vmatprep.subr.bf16.mxu1 %v5966_v17  ;;  %v2833_v17 = vld [vmem:[%s9473_s6 + $0x6f8] sm:$0xff]  ;;  %v5948_v9 = vpack.c.bf16 %v2815_v22, %v2814_v3  ;;  %v5980_v35 = vpack.c.bf16 %v2847_v49, %v2846_v11  ;;  %v2886_v22 = vld [vmem:[%s9473_s6 + $0x8a0] sm:$0xff]  ;;  %v2887_v11 = vld [vmem:[%s9473_s6 + $0x8a8] sm:$0xff] }
 0x1da   :  { %v5950_v10 = vpack.c.bf16 %v2833_v17, %v2832_v34  ;;  %v2901_v3 = vld [vmem:[%s9473_s6 + $0x918] sm:$0xff]  ;;  %v2918_v49 = vld [vmem:[%s9473_s6 + $0x9a0] sm:$0xff]  ;;  %v2919_v34 = vld [vmem:[%s9473_s6 + $0x9a8] sm:$0xff]  ;;  %v5994_v47 = vpack.c.bf16 %v2887_v11, %v2886_v22 }
 0x1db   :  { %5937 = vmatpush3.bf16.msra.mxu0 %v5936_v5  ;;  %v2816_v5 = vld [vmem:[%s9473_s6 + $0x670] sm:$0xff] }
 0x1dc   :  { %5969 = vmatpush3.bf16.msra.mxu1 %v5968_v26  ;;  %5939 = vmatprep.subr.bf16.mxu0 %v5938_v40  ;;  %v2817_v26 = vld [vmem:[%s9473_s6 + $0x678] sm:$0xff]  ;;  %v2848_v40 = vld [vmem:[%s9473_s6 + $0x770] sm:$0xff] }
 0x1dd   :  { %5971 = vmatprep.subr.bf16.mxu1 %v5970_v27  ;;  %v2883_v27 = vld [vmem:[%s9473_s6 + $0x888] sm:$0xff]  ;;  %v5952_v53 = vpack.c.bf16 %v2817_v26, %v2816_v5  ;;  %v5984_v25 = vpack.c.bf16 %v2849_v58, %v2848_v40  ;;  %v2889_v5 = vld [vmem:[%s9473_s6 + $0x8b8] sm:$0xff]  ;;  %v2920_v26 = vld [vmem:[%s9473_s6 + $0x9b0] sm:$0xff] }
 0x1de   :  { %v5986_v43 = vpack.c.bf16 %v2883_v27, %v2882_v41  ;;  %v2872_v41 = vld [vmem:[%s9473_s6 + $0x830] sm:$0xff]  ;;  %v2873_v27 = vld [vmem:[%s9473_s6 + $0x838] sm:$0xff] }
 0x1df   :  { %5941 = vmatpush3.bf16.msra.mxu0 %v5940_v62  ;;  %v2866_v62 = vld [vmem:[%s9473_s6 + $0x800] sm:$0xff]  ;;  %v2876_v11 = vld [vmem:[%s9473_s6 + $0x850] sm:$0xff] }
 0x1e0   :  { %5973 = vmatpush3.bf16.msra.mxu1 %v5972_v6  ;;  %5943 = vmatprep.subr.bf16.mxu0 %v5942_v12  ;;  %v2867_v6 = vld [vmem:[%s9473_s6 + $0x808] sm:$0xff]  ;;  %v6018_v12 = vpack.c.bf16 %v2915_v56, %v2914_v16  ;;  %v2904_v16 = vld [vmem:[%s9473_s6 + $0x930] sm:$0xff] }
 0x1e1   :  { %5975 = vmatprep.subr.bf16.mxu1 %v5974_v20  ;;  %v2885_v20 = vld [vmem:[%s9473_s6 + $0x898] sm:$0xff]  ;;  %v5988_v2 = vpack.c.bf16 %v2867_v6, %v2866_v62  ;;  %v2922_v62 = vld [vmem:[%s9473_s6 + $0x9c0] sm:$0xff]  ;;  %v2923_v6 = vld [vmem:[%s9473_s6 + $0x9c8] sm:$0xff] }
 0x1e3   :  { %5945 = vmatpush3.bf16.msra.mxu0 %v5944_v4  ;;  %v2869_v4 = vld [vmem:[%s9473_s6 + $0x818] sm:$0xff] }
 0x1e4   :  { %5977 = vmatpush3.bf16.msra.mxu1 %v5976_v15  ;;  %5947 = vmatprep.subr.bf16.mxu0 %v5946_v42  ;;  %v2900_v15 = vld [vmem:[%s9473_s6 + $0x910] sm:$0xff]  ;;  %v5990_v42 = vpack.c.bf16 %v2885_v20, %v2884_v55  ;;  %v5992_v17 = vpack.c.bf16 %v2869_v4, %v2868_v21  ;;  %v2874_v55 = vld [vmem:[%s9473_s6 + $0x840] sm:$0xff]  ;;  %v2875_v20 = vld [vmem:[%s9473_s6 + $0x848] sm:$0xff] }
 0x1e5   :  { %5979 = vmatprep.subr.bf16.mxu1 %v5978_v0  ;;  %v6022_v0 = vpack.c.bf16 %v2917_v63, %v2916_v7  ;;  %v6024_v8 = vpack.c.bf16 %v2901_v3, %v2900_v15  ;;  %v6034_v7 = vpack.c.bf16 %v2923_v6, %v2922_v62  ;;  %v2907_v63 = vld [vmem:[%s9473_s6 + $0x948] sm:$0xff]  ;;  %v2893_v21 = vld [vmem:[%s9473_s6 + $0x8d8] sm:$0xff]  ;;  %v2924_v4 = vld [vmem:[%s9473_s6 + $0x9d0] sm:$0xff] }
 0x1e6   :  { %v2925_v15 = vld [vmem:[%s9473_s6 + $0x9d8] sm:$0xff]  ;;  %v2912_v62 = vld [vmem:[%s9473_s6 + $0x970] sm:$0xff] }
 0x1e7   :  { %5949 = vmatpush3.bf16.msra.mxu0 %v5948_v9  ;;  %v2871_v9 = vld [vmem:[%s9473_s6 + $0x828] sm:$0xff] }
 0x1e8   :  { %5981 = vmatpush3.bf16.msra.mxu1 %v5980_v35  ;;  %5951 = vmatprep.subr.bf16.mxu0 %v5950_v10  ;;  %v2902_v35 = vld [vmem:[%s9473_s6 + $0x920] sm:$0xff]  ;;  %v2888_v10 = vld [vmem:[%s9473_s6 + $0x8b0] sm:$0xff] }
 0x1e9   :  { %5983 = vmatprep.subr.bf16.mxu1 %v5982_v13  ;;  %v5998_v58 = vpack.c.bf16 %v2889_v5, %v2888_v10  ;;  %v2878_v10 = vld [vmem:[%s9473_s6 + $0x860] sm:$0xff]  ;;  %v2879_v5 = vld [vmem:[%s9473_s6 + $0x868] sm:$0xff] }
 0x1eb   :  { %5953 = vmatpush3.bf16.msra.mxu0 %v5952_v53  ;;  %v2905_v53 = vld [vmem:[%s9473_s6 + $0x938] sm:$0xff] }
 0x1ec   :  { %5985 = vmatpush3.bf16.msra.mxu1 %v5984_v25  ;;  %5987 = vmatprep.subr.bf16.mxu0 %v5986_v43  ;;  %v2890_v25 = vld [vmem:[%s9473_s6 + $0x8c0] sm:$0xff]  ;;  %v2891_v43 = vld [vmem:[%s9473_s6 + $0x8c8] sm:$0xff]  ;;  %v6032_v54 = vpack.c.bf16 %v2905_v53, %v2904_v16  ;;  %v6012_v16 = vpack.c.bf16 %v2879_v5, %v2878_v10 }
 0x1ed   :  { %6019 = vmatprep.subr.bf16.mxu1 %v6018_v12  ;;  %v6000_v12 = vpack.c.bf16 %v2873_v27, %v2872_v41  ;;  %v6002_v48 = vpack.c.bf16 %v2891_v43, %v2890_v25  ;;  %v2928_v41 = vld [vmem:[%s9473_s6 + $0x9f0] sm:$0xff]  ;;  %v2929_v27 = vld [vmem:[%s9473_s6 + $0x9f8] sm:$0xff]  ;;  %v2982_v10 = vld [vmem:[%s9473_s6 + $0xba0] sm:$0xff] }
 0x1ee   :  { %3479 = vmatmul.mubr.f32.vlgmr.msra.gmra.mrb[30].mxu0 %v7305_v57  ;;  %v2870_v57 = vld [vmem:[%s9473_s6 + $0x820] sm:$0xff]  ;;  %v2880_v25 = vld [vmem:[%s9473_s6 + $0x870] sm:$0xff]  ;;  %v2881_v43 = vld [vmem:[%s9473_s6 + $0x878] sm:$0xff]  ;;  %v6046_v6 = vpack.c.bf16 %v2929_v27, %v2928_v41 }
 0x1ef   :  { %3549 = vmatmul.mubr.f32.vlgmr.msra.gmra.mrb[30].mxu1 %v7310_v31  ;;  %5989 = vmatpush3.bf16.msra.mxu0 %v5988_v2  ;;  %v6026_v31 = vpack.c.bf16 %v2919_v34, %v2918_v49  ;;  %v5996_v40 = vpack.c.bf16 %v2871_v9, %v2870_v57  ;;  %v2906_v2 = vld [vmem:[%s9473_s6 + $0x940] sm:$0xff]  ;;  %v2908_v49 = vld [vmem:[%s9473_s6 + $0x950] sm:$0xff]  ;;  %v6038_v34 = vpack.c.bf16 %v2925_v15, %v2924_v4  ;;  %v2927_v9 = vld [vmem:[%s9473_s6 + $0x9e8] sm:$0xff] }
 0x1f0   :  { %3618 = vmatprep.mubr.f32.mxu0 %v7360_v18  ;;  %6021 = vmatpush3.bf16.msra.mxu1 %v6020_v44  ;;  %v2903_v18 = vld [vmem:[%s9473_s6 + $0x928] sm:$0xff]  ;;  %v2892_v44 = vld [vmem:[%s9473_s6 + $0x8d0] sm:$0xff]  ;;  %v6036_v3 = vpack.c.bf16 %v2907_v63, %v2906_v2  ;;  %v2926_v57 = vld [vmem:[%s9473_s6 + $0x9e0] sm:$0xff]  ;;  %v6016_v2 = vpack.c.bf16 %v2881_v43, %v2880_v25 }
 0x1f1   :  { %3688 = vmatprep.mubr.f32.mxu1 %v7365_v33  ;;  %5991 = vmatprep.subr.bf16.mxu0 %v5990_v42  ;;  %v2921_v33 = vld [vmem:[%s9473_s6 + $0x9b8] sm:$0xff]  ;;  %v6028_v13 = vpack.c.bf16 %v2903_v18, %v2902_v35  ;;  %v6004_v42 = vpack.c.bf16 %v2875_v20, %v2874_v55  ;;  %v6006_v22 = vpack.c.bf16 %v2893_v21, %v2892_v44  ;;  %v2978_v55 = vld [vmem:[%s9473_s6 + $0xb80] sm:$0xff]  ;;  %v2979_v20 = vld [vmem:[%s9473_s6 + $0xb88] sm:$0xff] }
 0x1f2   :  { %6023 = vmatprep.subr.bf16.mxu1 %v6022_v0  ;;  %v6030_v56 = vpack.c.bf16 %v2921_v33, %v2920_v26  ;;  %v2877_v0 = vld [vmem:[%s9473_s6 + $0x858] sm:$0xff]  ;;  %v2910_v26 = vld [vmem:[%s9473_s6 + $0x960] sm:$0xff]  ;;  %v6042_v33 = vpack.c.bf16 %v2927_v9, %v2926_v57  ;;  %v2931_v21 = vld [vmem:[%s9473_s6 + $0xa08] sm:$0xff]  ;;  %v6082_v4 = vpack.c.bf16 %v2979_v20, %v2978_v55 }
 0x1f3   :  { %5993 = vmatpush3.bf16.msra.mxu0 %v5992_v17  ;;  %v2909_v17 = vld [vmem:[%s9473_s6 + $0x958] sm:$0xff]  ;;  %v6008_v35 = vpack.c.bf16 %v2877_v0, %v2876_v11  ;;  %v2930_v44 = vld [vmem:[%s9473_s6 + $0xa00] sm:$0xff]  ;;  %v2980_v0 = vld [vmem:[%s9473_s6 + $0xb90] sm:$0xff] }
 0x1f4   :  { %6025 = vmatpush3.bf16.msra.mxu1 %v6024_v8  ;;  %5995 = vmatprep.subr.bf16.mxu0 %v5994_v47  ;;  %v2894_v8 = vld [vmem:[%s9473_s6 + $0x8e0] sm:$0xff]  ;;  %v2895_v47 = vld [vmem:[%s9473_s6 + $0x8e8] sm:$0xff]  ;;  %v6052_v11 = vpack.c.bf16 %v2931_v21, %v2930_v44  ;;  %v2965_v9 = vld [vmem:[%s9473_s6 + $0xb18] sm:$0xff] }
 0x1f5   :  { %6027 = vmatprep.subr.bf16.mxu1 %v6026_v31  ;;  %v6040_v31 = vpack.c.bf16 %v2909_v17, %v2908_v49  ;;  %v6010_v18 = vpack.c.bf16 %v2895_v47, %v2894_v8  ;;  %v2962_v15 = vld [vmem:[%s9473_s6 + $0xb00] sm:$0xff]  ;;  %v2981_v49 = vld [vmem:[%s9473_s6 + $0xb98] sm:$0xff]  ;;  %v2932_v17 = vld [vmem:[%s9473_s6 + $0xa10] sm:$0xff] }
 0x1f6   :  { %v2933_v8 = vld [vmem:[%s9473_s6 + $0xa18] sm:$0xff]  ;;  %v2964_v47 = vld [vmem:[%s9473_s6 + $0xb10] sm:$0xff]  ;;  %v2983_v5 = vld [vmem:[%s9473_s6 + $0xba8] sm:$0xff] }
 0x1f7   :  { %5997 = vmatpush3.bf16.msra.mxu0 %v5996_v40  ;;  %v2911_v40 = vld [vmem:[%s9473_s6 + $0x968] sm:$0xff]  ;;  %v2952_v27 = vld [vmem:[%s9473_s6 + $0xab0] sm:$0xff]  ;;  %v2969_v55 = vld [vmem:[%s9473_s6 + $0xb38] sm:$0xff] }
 0x1f8   :  { %6029 = vmatpush3.bf16.msra.mxu1 %v6028_v13  ;;  %5999 = vmatprep.subr.bf16.mxu0 %v5998_v58  ;;  %v2896_v13 = vld [vmem:[%s9473_s6 + $0x8f0] sm:$0xff]  ;;  %v2897_v58 = vld [vmem:[%s9473_s6 + $0x8f8] sm:$0xff]  ;;  %v2967_v41 = vld [vmem:[%s9473_s6 + $0xb28] sm:$0xff] }
 0x1f9   :  { %6031 = vmatprep.subr.bf16.mxu1 %v6030_v56  ;;  %v6044_v56 = vpack.c.bf16 %v2911_v40, %v2910_v26  ;;  %v6014_v53 = vpack.c.bf16 %v2897_v58, %v2896_v13  ;;  %v6056_v26 = vpack.c.bf16 %v2933_v8, %v2932_v17  ;;  %v2935_v13 = vld [vmem:[%s9473_s6 + $0xa28] sm:$0xff]  ;;  %v2966_v58 = vld [vmem:[%s9473_s6 + $0xb20] sm:$0xff]  ;;  %v2989_v17 = vld [vmem:[%s9473_s6 + $0xbd8] sm:$0xff] }
 0x1fa   :  { %v6092_v43 = vpack.c.bf16 %v2967_v41, %v2966_v58  ;;  %v2954_v20 = vld [vmem:[%s9473_s6 + $0xac0] sm:$0xff]  ;;  %v2943_v41 = vld [vmem:[%s9473_s6 + $0xa68] sm:$0xff] }
 0x1fb   :  { %6001 = vmatpush3.bf16.msra.mxu0 %v6000_v12  ;;  %v2913_v12 = vld [vmem:[%s9473_s6 + $0x978] sm:$0xff] }
 0x1fc   :  { %6033 = vmatpush3.bf16.msra.mxu1 %v6032_v54  ;;  %6003 = vmatprep.subr.bf16.mxu0 %v6002_v48  ;;  %v2946_v54 = vld [vmem:[%s9473_s6 + $0xa80] sm:$0xff]  ;;  %v2947_v48 = vld [vmem:[%s9473_s6 + $0xa88] sm:$0xff] }
 0x1fd   :  { %6035 = vmatprep.subr.bf16.mxu1 %v6034_v7  ;;  %v6048_v7 = vpack.c.bf16 %v2913_v12, %v2912_v62  ;;  %v6050_v63 = vpack.c.bf16 %v2947_v48, %v2946_v54  ;;  %v2937_v12 = vld [vmem:[%s9473_s6 + $0xa38] sm:$0xff]  ;;  %v2968_v54 = vld [vmem:[%s9473_s6 + $0xb30] sm:$0xff] }
 0x1fe   :  { %v6096_v21 = vpack.c.bf16 %v2969_v55, %v2968_v54  ;;  %v2945_v55 = vld [vmem:[%s9473_s6 + $0xa78] sm:$0xff] }
 0x1ff   :  { %6005 = vmatpush3.bf16.msra.mxu0 %v6004_v42  ;;  %v2963_v42 = vld [vmem:[%s9473_s6 + $0xb08] sm:$0xff] }
 0x200   :  { %6037 = vmatpush3.bf16.msra.mxu1 %v6036_v3  ;;  %6007 = vmatprep.subr.bf16.mxu0 %v6006_v22  ;;  %v2948_v3 = vld [vmem:[%s9473_s6 + $0xa90] sm:$0xff]  ;;  %v2949_v22 = vld [vmem:[%s9473_s6 + $0xa98] sm:$0xff] }
 0x201   :  { %6039 = vmatprep.subr.bf16.mxu1 %v6038_v34  ;;  %v6084_v34 = vpack.c.bf16 %v2963_v42, %v2962_v15  ;;  %v6054_v57 = vpack.c.bf16 %v2949_v22, %v2948_v3  ;;  %v2938_v15 = vld [vmem:[%s9473_s6 + $0xa40] sm:$0xff]  ;;  %v2939_v42 = vld [vmem:[%s9473_s6 + $0xa48] sm:$0xff] }
 0x202   :  { %v2970_v3 = vld [vmem:[%s9473_s6 + $0xb40] sm:$0xff]  ;;  %v6068_v8 = vpack.c.bf16 %v2939_v42, %v2938_v15 }
 0x203   :  { %6009 = vmatpush3.bf16.msra.mxu0 %v6008_v35  ;;  %v2950_v35 = vld [vmem:[%s9473_s6 + $0xaa0] sm:$0xff] }
 0x204   :  { %6041 = vmatpush3.bf16.msra.mxu1 %v6040_v31  ;;  %6011 = vmatprep.subr.bf16.mxu0 %v6010_v18  ;;  %v2951_v31 = vld [vmem:[%s9473_s6 + $0xaa8] sm:$0xff]  ;;  %v6086_v18 = vpack.c.bf16 %v2981_v49, %v2980_v0  ;;  %v2956_v0 = vld [vmem:[%s9473_s6 + $0xad0] sm:$0xff]  ;;  %v2957_v49 = vld [vmem:[%s9473_s6 + $0xad8] sm:$0xff] }
 0x205   :  { %6043 = vmatprep.subr.bf16.mxu1 %v6042_v33  ;;  %v6088_v33 = vpack.c.bf16 %v2965_v9, %v2964_v47  ;;  %v6058_v40 = vpack.c.bf16 %v2951_v31, %v2950_v35  ;;  %v2940_v9 = vld [vmem:[%s9473_s6 + $0xa50] sm:$0xff]  ;;  %v2941_v35 = vld [vmem:[%s9473_s6 + $0xa58] sm:$0xff] }
 0x206   :  { %v2972_v31 = vld [vmem:[%s9473_s6 + $0xb50] sm:$0xff] }
 0x207   :  { %6013 = vmatpush3.bf16.msra.mxu0 %v6012_v16  ;;  %v2953_v16 = vld [vmem:[%s9473_s6 + $0xab8] sm:$0xff] }
 0x208   :  { %6045 = vmatpush3.bf16.msra.mxu1 %v6044_v56  ;;  %6015 = vmatprep.subr.bf16.mxu0 %v6014_v53  ;;  %v2984_v56 = vld [vmem:[%s9473_s6 + $0xbb0] sm:$0xff]  ;;  %v2985_v53 = vld [vmem:[%s9473_s6 + $0xbb8] sm:$0xff]  ;;  %v6062_v62 = vpack.c.bf16 %v2953_v16, %v2952_v27  ;;  %v2974_v27 = vld [vmem:[%s9473_s6 + $0xb60] sm:$0xff] }
 0x209   :  { %6047 = vmatprep.subr.bf16.mxu1 %v6046_v6  ;;  %v2936_v6 = vld [vmem:[%s9473_s6 + $0xa30] sm:$0xff]  ;;  %v6094_v48 = vpack.c.bf16 %v2985_v53, %v2984_v56  ;;  %v2975_v56 = vld [vmem:[%s9473_s6 + $0xb68] sm:$0xff] }
 0x20a   :  { %v6064_v44 = vpack.c.bf16 %v2937_v12, %v2936_v6  ;;  %v2960_v53 = vld [vmem:[%s9473_s6 + $0xaf0] sm:$0xff]  ;;  %v6108_v12 = vpack.c.bf16 %v2975_v56, %v2974_v27  ;;  %v2231_v56 = vld [vmem:[%s9476_s5 + $0x28] sm:$0xff] }
 0x20b   :  { %6017 = vmatpush3.bf16.msra.mxu0 %v6016_v2  ;;  %v2955_v2 = vld [vmem:[%s9473_s6 + $0xac8] sm:$0xff] }
 0x20c   :  { %6049 = vmatpush3.bf16.msra.mxu1 %v6048_v7  ;;  %6051 = vmatprep.subr.bf16.mxu0 %v6050_v63  ;;  %v2986_v7 = vld [vmem:[%s9473_s6 + $0xbc0] sm:$0xff]  ;;  %v2987_v63 = vld [vmem:[%s9473_s6 + $0xbc8] sm:$0xff] }
 0x20d   :  { %6083 = vmatprep.subr.bf16.mxu1 %v6082_v4  ;;  %v6066_v4 = vpack.c.bf16 %v2955_v2, %v2954_v20  ;;  %v6098_v22 = vpack.c.bf16 %v2987_v63, %v2986_v7  ;;  %v2976_v20 = vld [vmem:[%s9473_s6 + $0xb70] sm:$0xff]  ;;  %v2977_v7 = vld [vmem:[%s9473_s6 + $0xb78] sm:$0xff]  ;;  %v2242_v63 = vld [vmem:[%s9476_s5 + $0x80] sm:$0xff] }
 0x20e   :  { %3619 = vmatmul.mubr.f32.vlgmr.msra.gmra.mrb[32].mxu0 %v7346_v32  ;;  %v2934_v32 = vld [vmem:[%s9473_s6 + $0xa20] sm:$0xff]  ;;  %v6112_v42 = vpack.c.bf16 %v2977_v7, %v2976_v20  ;;  %v2233_v20 = vld [vmem:[%s9476_s5 + $0x38] sm:$0xff] }
 0x20f   :  { %3689 = vmatmul.mubr.f32.vlgmr.msra.gmra.mrb[32].mxu1 %v7351_v28  ;;  %6053 = vmatpush3.bf16.msra.mxu0 %v6052_v11  ;;  %v6090_v28 = vpack.c.bf16 %v2983_v5, %v2982_v10  ;;  %v6060_v25 = vpack.c.bf16 %v2935_v13, %v2934_v32  ;;  %v2971_v11 = vld [vmem:[%s9473_s6 + $0xb48] sm:$0xff]  ;;  %v2973_v10 = vld [vmem:[%s9473_s6 + $0xb58] sm:$0xff]  ;;  %v2958_v5 = vld [vmem:[%s9473_s6 + $0xae0] sm:$0xff]  ;;  %v6072_v32 = vpack.c.bf16 %v2941_v35, %v2940_v9 }
 0x210   :  { %3758 = vmatprep.mubr.f32.mxu0 %v7395_v24  ;;  %6085 = vmatpush3.bf16.msra.mxu1 %v6084_v34  ;;  %v2988_v34 = vld [vmem:[%s9473_s6 + $0xbd0] sm:$0xff]  ;;  %v6100_v47 = vpack.c.bf16 %v2971_v11, %v2970_v3  ;;  %v6104_v13 = vpack.c.bf16 %v2973_v10, %v2972_v31  ;;  %v2227_v11 = vld [vmem:[%s9476_s5 + $0x8] sm:$0xff]  ;;  %v2277_v9 = vld [vmem:[%s9476_s5 + $0x198] sm:$0xff] }
 0x211   :  { %3828 = vmatprep.mubr.f32.mxu1 %v7397_v14  ;;  %6055 = vmatprep.subr.bf16.mxu0 %v6054_v57  ;;  %v6070_v57 = vpack.c.bf16 %v2957_v49, %v2956_v0  ;;  %v2258_v49 = vld [vmem:[%s9476_s5 + $0x100] sm:$0xff]  ;;  %v2228_v31 = vld [vmem:[%s9476_s5 + $0x10] sm:$0xff] }
 0x212   :  { %6087 = vmatprep.subr.bf16.mxu1 %v6086_v18  ;;  %v6102_v18 = vpack.c.bf16 %v2989_v17, %v2988_v34  ;;  %v2259_v34 = vld [vmem:[%s9476_s5 + $0x108] sm:$0xff]  ;;  %v2244_v17 = vld [vmem:[%s9476_s5 + $0x90] sm:$0xff] }
 0x213   :  { %6057 = vmatpush3.bf16.msra.mxu0 %v6056_v26  ;;  %v2959_v26 = vld [vmem:[%s9473_s6 + $0xae8] sm:$0xff]  ;;  %v6148_v35 = vpack.c.bf16 %v2259_v34, %v2258_v49  ;;  %v2260_v10 = vld [vmem:[%s9476_s5 + $0x110] sm:$0xff]  ;;  %v2234_v34 = vld [vmem:[%s9476_s5 + $0x40] sm:$0xff] }
 0x214   :  { %6089 = vmatpush3.bf16.msra.mxu1 %v6088_v33  ;;  %6059 = vmatprep.subr.bf16.mxu0 %v6058_v40  ;;  %v2990_v33 = vld [vmem:[%s9473_s6 + $0xbe0] sm:$0xff]  ;;  %v2991_v40 = vld [vmem:[%s9473_s6 + $0xbe8] sm:$0xff]  ;;  %v6074_v58 = vpack.c.bf16 %v2959_v26, %v2958_v5  ;;  %v2261_v26 = vld [vmem:[%s9476_s5 + $0x118] sm:$0xff] }
 0x215   :  { %6091 = vmatprep.subr.bf16.mxu1 %v6090_v28  ;;  %v2942_v28 = vld [vmem:[%s9473_s6 + $0xa60] sm:$0xff]  ;;  %v6106_v16 = vpack.c.bf16 %v2991_v40, %v2990_v33  ;;  %v2247_v40 = vld [vmem:[%s9476_s5 + $0xa8] sm:$0xff] }
 0x216   :  { %v6076_v6 = vpack.c.bf16 %v2943_v41, %v2942_v28  ;;  %v2246_v33 = vld [vmem:[%s9476_s5 + $0xa0] sm:$0xff]  ;;  %v6152_v41 = vpack.c.bf16 %v2261_v26, %v2260_v10  ;;  %v2285_v10 = vld [vmem:[%s9476_s5 + $0x1d8] sm:$0xff] }
 0x217   :  { %6061 = vmatpush3.bf16.msra.mxu0 %v6060_v25  ;;  %v2961_v25 = vld [vmem:[%s9473_s6 + $0xaf8] sm:$0xff]  ;;  %v6122_v27 = vpack.c.bf16 %v2247_v40, %v2246_v33  ;;  %v2236_v40 = vld [vmem:[%s9476_s5 + $0x50] sm:$0xff] }
 0x218   :  { %6093 = vmatpush3.bf16.msra.mxu1 %v6092_v43  ;;  %6063 = vmatprep.subr.bf16.mxu0 %v6062_v62  ;;  %v2992_v43 = vld [vmem:[%s9473_s6 + $0xbf0] sm:$0xff]  ;;  %v2993_v62 = vld [vmem:[%s9473_s6 + $0xbf8] sm:$0xff]  ;;  %v6078_v54 = vpack.c.bf16 %v2961_v25, %v2960_v53  ;;  %v2262_v53 = vld [vmem:[%s9476_s5 + $0x120] sm:$0xff] }
 0x219   :  { %6095 = vmatprep.subr.bf16.mxu1 %v6094_v48  ;;  %v2944_v48 = vld [vmem:[%s9473_s6 + $0xa70] sm:$0xff]  ;;  %v6110_v2 = vpack.c.bf16 %v2993_v62, %v2992_v43  ;;  %v2249_v62 = vld [vmem:[%s9476_s5 + $0xb8] sm:$0xff] }
 0x21a   :  { %v6080_v15 = vpack.c.bf16 %v2945_v55, %v2944_v48  ;;  %v2248_v43 = vld [vmem:[%s9476_s5 + $0xb0] sm:$0xff] }
 0x21b   :  { %6065 = vmatpush3.bf16.msra.mxu0 %v6064_v44  ;;  %v2243_v44 = vld [vmem:[%s9476_s5 + $0x88] sm:$0xff]  ;;  %v6126_v48 = vpack.c.bf16 %v2249_v62, %v2248_v43  ;;  %v2232_v55 = vld [vmem:[%s9476_s5 + $0x30] sm:$0xff]  ;;  %v2238_v43 = vld [vmem:[%s9476_s5 + $0x60] sm:$0xff] }
 0x21c   :  { %6097 = vmatpush3.bf16.msra.mxu1 %v6096_v21  ;;  %6067 = vmatprep.subr.bf16.mxu0 %v6066_v4  ;;  %v2274_v21 = vld [vmem:[%s9476_s5 + $0x180] sm:$0xff]  ;;  %v2275_v4 = vld [vmem:[%s9476_s5 + $0x188] sm:$0xff]  ;;  %v6114_v3 = vpack.c.bf16 %v2243_v44, %v2242_v63  ;;  %v2265_v63 = vld [vmem:[%s9476_s5 + $0x138] sm:$0xff] }
 0x21d   :  { %6099 = vmatprep.subr.bf16.mxu1 %v6098_v22  ;;  %v2226_v22 = vld [vmem:[%s9476_s5] sm:$0xff]  ;;  %v6146_v0 = vpack.c.bf16 %v2275_v4, %v2274_v21  ;;  %v2251_v21 = vld [vmem:[%s9476_s5 + $0xc8] sm:$0xff] }
 0x21e   :  { %v2250_v44 = vld [vmem:[%s9476_s5 + $0xc0] sm:$0xff]  ;;  %v2239_v62 = vld [vmem:[%s9476_s5 + $0x68] sm:$0xff] }
 0x21f   :  { %6069 = vmatpush3.bf16.msra.mxu0 %v6068_v8  ;;  %v2245_v8 = vld [vmem:[%s9476_s5 + $0x98] sm:$0xff]  ;;  %v2282_v4 = vld [vmem:[%s9476_s5 + $0x1c0] sm:$0xff]  ;;  %v6130_v49 = vpack.c.bf16 %v2251_v21, %v2250_v44  ;;  %v2240_v44 = vld [vmem:[%s9476_s5 + $0x70] sm:$0xff] }
 0x220   :  { %6101 = vmatpush3.bf16.msra.mxu1 %v6100_v47  ;;  %6071 = vmatprep.subr.bf16.mxu0 %v6070_v57  ;;  %v6116_v47 = vpack.c.bf16 %v2227_v11, %v2226_v22  ;;  %v2276_v57 = vld [vmem:[%s9476_s5 + $0x190] sm:$0xff]  ;;  %v6118_v5 = vpack.c.bf16 %v2245_v8, %v2244_v17  ;;  %v6128_v22 = vpack.c.bf16 %v2233_v20, %v2232_v55  ;;  %v2235_v17 = vld [vmem:[%s9476_s5 + $0x48] sm:$0xff]  ;;  %v2266_v8 = vld [vmem:[%s9476_s5 + $0x140] sm:$0xff] }
 0x221   :  { %6103 = vmatprep.subr.bf16.mxu1 %v6102_v18  ;;  %v2229_v18 = vld [vmem:[%s9476_s5 + $0x18] sm:$0xff] }
 0x222   :  { %v6120_v28 = vpack.c.bf16 %v2229_v18, %v2228_v31  ;;  %v2284_v18 = vld [vmem:[%s9476_s5 + $0x1d0] sm:$0xff]  ;;  %v2257_v20 = vld [vmem:[%s9476_s5 + $0xf8] sm:$0xff] }
 0x223   :  { %6073 = vmatpush3.bf16.msra.mxu0 %v6072_v32  ;;  %v6150_v32 = vpack.c.bf16 %v2277_v9, %v2276_v57  ;;  %v2267_v57 = vld [vmem:[%s9476_s5 + $0x148] sm:$0xff]  ;;  %v2252_v9 = vld [vmem:[%s9476_s5 + $0xd0] sm:$0xff]  ;;  %v2241_v21 = vld [vmem:[%s9476_s5 + $0x78] sm:$0xff] }
 0x224   :  { %6105 = vmatpush3.bf16.msra.mxu1 %v6104_v13  ;;  %6075 = vmatprep.subr.bf16.mxu0 %v6074_v58  ;;  %v2278_v13 = vld [vmem:[%s9476_s5 + $0x1a0] sm:$0xff]  ;;  %v2279_v58 = vld [vmem:[%s9476_s5 + $0x1a8] sm:$0xff]  ;;  %v6164_v26 = vpack.c.bf16 %v2267_v57, %v2266_v8 }
 0x225   :  { %6107 = vmatprep.subr.bf16.mxu1 %v6106_v16  ;;  %v2230_v16 = vld [vmem:[%s9476_s5 + $0x20] sm:$0xff]  ;;  %v6154_v25 = vpack.c.bf16 %v2279_v58, %v2278_v13  ;;  %v2268_v13 = vld [vmem:[%s9476_s5 + $0x150] sm:$0xff]  ;;  %v6166_v58 = vpack.c.bf16 %v2285_v10, %v2284_v18  ;;  %v2339_v10 = vld [vmem:[%s9476_s5 + $0x388] sm:$0xff] }
 0x226   :  { %v2338_v18 = vld [vmem:[%s9476_s5 + $0x380] sm:$0xff] }
 0x227   :  { %6077 = vmatpush3.bf16.msra.mxu0 %v6076_v6  ;;  %v2280_v6 = vld [vmem:[%s9476_s5 + $0x1b0] sm:$0xff] }
 0x228   :  { %6109 = vmatpush3.bf16.msra.mxu1 %v6108_v12  ;;  %6079 = vmatprep.subr.bf16.mxu0 %v6078_v54  ;;  %v6124_v12 = vpack.c.bf16 %v2231_v56, %v2230_v16  ;;  %v6535_v16 = vmov 1966171168  }
 0x229   :  { %6111 = vmatprep.subr.bf16.mxu1 %v6110_v2  ;;  %v2264_v2 = vld [vmem:[%s9476_s5 + $0x130] sm:$0xff]  ;;  %v4742_v56 = vunpack.c.l.s4 %v6535_v16 }
 0x22b   :  { %6081 = vmatpush3.bf16.msra.mxu0 %v6080_v15  ;;  %v2283_v15 = vld [vmem:[%s9476_s5 + $0x1c8] sm:$0xff] }
 0x22c   :  { %6113 = vmatpush3.bf16.msra.mxu1 %v6112_v42  ;;  %6115 = vmatprep.subr.bf16.mxu0 %v6114_v3  ;;  %v4695_v42 = vpop.xlane.xlu0 %4694 }
 0x22d   :  { %6147 = vmatprep.subr.bf16.mxu1 %v6146_v0  ;;  %v6160_v0 = vpack.c.bf16 %v2265_v63, %v2264_v2  ;;  %v2288_v2 = vld [vmem:[%s9476_s5 + $0x1f0] sm:$0xff]  ;;  %v4743_v63 = vunpack.c.0.s8 %v4742_v56 }
 0x22e   :  { %3759 = vmatmul.mubr.f32.vlgmr.msra.gmra.mrb[34].mxu0 %v7391_v19 }
 0x22f   :  { %3829 = vmatmul.mubr.f32.vlgmr.msra.gmra.mrb[34].mxu1 %v7393_v36  ;;  %6117 = vmatpush3.bf16.msra.mxu0 %v6116_v47  ;;  %v6162_v47 = vpack.c.bf16 %v2283_v15, %v2282_v4  ;;  %v2272_v4 = vld [vmem:[%s9476_s5 + $0x170] sm:$0xff]  ;;  %v6140_v15 = vpack.c.bf16 %v2239_v62, %v2238_v43  ;;  %v4746_v57 = vsub.s32 %v4743_v63, %v6626_v30 }
 0x230   :  { %3898 = vmatprep.mubr.f32.mxu0 %v7082_v37  ;;  %6149 = vmatpush3.bf16.msra.mxu1 %v6148_v35  ;;  %v2263_v37 = vld [vmem:[%s9476_s5 + $0x128] sm:$0xff]  ;;  %v2253_v35 = vld [vmem:[%s9476_s5 + $0xd8] sm:$0xff] }
 0x231   :  { %3968 = vmatprep.mubr.f32.mxu1 %v7084_v38  ;;  %6119 = vmatprep.subr.bf16.mxu0 %v6118_v5  ;;  %v2281_v38 = vld [vmem:[%s9476_s5 + $0x1b8] sm:$0xff]  ;;  %v6156_v54 = vpack.c.bf16 %v2263_v37, %v2262_v53  ;;  %v6132_v5 = vpack.c.bf16 %v2235_v17, %v2234_v34  ;;  %v6134_v33 = vpack.c.bf16 %v2253_v35, %v2252_v9  ;;  %v2286_v53 = vld [vmem:[%s9476_s5 + $0x1e0] sm:$0xff] }
 0x232   :  { %6151 = vmatprep.subr.bf16.mxu1 %v6150_v32  ;;  %v6158_v7 = vpack.c.bf16 %v2281_v38, %v2280_v6  ;;  %v2237_v32 = vld [vmem:[%s9476_s5 + $0x58] sm:$0xff]  ;;  %v6144_v9 = vpack.c.bf16 %v2241_v21, %v2240_v44  ;;  %v2310_v21 = vld [vmem:[%s9476_s5 + $0x2a0] sm:$0xff] }
 0x233   :  { %6121 = vmatpush3.bf16.msra.mxu0 %v6120_v28  ;;  %v2269_v28 = vld [vmem:[%s9476_s5 + $0x158] sm:$0xff]  ;;  %v6136_v37 = vpack.c.bf16 %v2237_v32, %v2236_v40 }
 0x234   :  { %6153 = vmatpush3.bf16.msra.mxu1 %v6152_v41  ;;  %6123 = vmatprep.subr.bf16.mxu0 %v6122_v27  ;;  %v2254_v41 = vld [vmem:[%s9476_s5 + $0xe0] sm:$0xff]  ;;  %v2255_v27 = vld [vmem:[%s9476_s5 + $0xe8] sm:$0xff]  ;;  %v6168_v6 = vpack.c.bf16 %v2269_v28, %v2268_v13  ;;  %v2325_v44 = vld [vmem:[%s9476_s5 + $0x318] sm:$0xff] }
 0x235   :  { %6155 = vmatprep.subr.bf16.mxu1 %v6154_v25  ;;  %v2287_v25 = vld [vmem:[%s9476_s5 + $0x1e8] sm:$0xff]  ;;  %v6138_v38 = vpack.c.bf16 %v2255_v27, %v2254_v41  ;;  %v2290_v28 = vld [vmem:[%s9476_s5 + $0x200] sm:$0xff] }
 0x236   :  { %v6170_v55 = vpack.c.bf16 %v2287_v25, %v2286_v53  ;;  %v2291_v41 = vld [vmem:[%s9476_s5 + $0x208] sm:$0xff]  ;;  %v2308_v53 = vld [vmem:[%s9476_s5 + $0x290] sm:$0xff]  ;;  %v2309_v25 = vld [vmem:[%s9476_s5 + $0x298] sm:$0xff] }
 0x237   :  { %6125 = vmatpush3.bf16.msra.mxu0 %v6124_v12  ;;  %v4708_v3 = vpop.xlane.xlu1 %4707  ;;  %v2270_v12 = vld [vmem:[%s9476_s5 + $0x160] sm:$0xff]  ;;  %v6182_v63 = vpack.c.bf16 %v2309_v25, %v2308_v53  ;;  %v2316_v53 = vld [vmem:[%s9476_s5 + $0x2d0] sm:$0xff]  ;;  %v2317_v25 = vld [vmem:[%s9476_s5 + $0x2d8] sm:$0xff] }
 0x238   :  { %6157 = vmatpush3.bf16.msra.mxu1 %v6156_v54  ;;  %v8353_v11 = vadd.f32 %v4708_v3, %v4695_v42  ;;  %6127 = vmatprep.subr.bf16.mxu0 %v6126_v48  ;;  %v2271_v54 = vld [vmem:[%s9476_s5 + $0x168] sm:$0xff]  ;;  %v2256_v48 = vld [vmem:[%s9476_s5 + $0xf0] sm:$0xff]  ;;  %v2273_v42 = vld [vmem:[%s9476_s5 + $0x178] sm:$0xff] }
 0x239   :  { %6159 = vmatprep.subr.bf16.mxu1 %v6158_v7  ;;  %v2289_v7 = vld [vmem:[%s9476_s5 + $0x1f8] sm:$0xff]  ;;  %v2306_v3 = vld [vmem:[%s9476_s5 + $0x280] sm:$0xff]  ;;  %v6142_v17 = vpack.c.bf16 %v2257_v20, %v2256_v48  ;;  %v6176_v35 = vpack.c.bf16 %v2273_v42, %v2272_v4  ;;  %v2311_v4 = vld [vmem:[%s9476_s5 + $0x2a8] sm:$0xff] }
 0x23a   :  { %v4719_v31 = vmax.f32 %v8353_v11, 1e-24  ;;  %v6174_v8 = vpack.c.bf16 %v2289_v7, %v2288_v2  ;;  %v2293_v20 = vld [vmem:[%s9476_s5 + $0x218] sm:$0xff]  ;;  %v2324_v2 = vld [vmem:[%s9476_s5 + $0x310] sm:$0xff]  ;;  %vm4712_vm4 = vcmp.eq.f32.partialorder %v8353_v11, inf  ;;  %vm4714_vm5 = vcmp.eq.f32.partialorder %v8353_v11, 0.0 }
 0x23b   :  { %6129 = vmatpush3.bf16.msra.mxu0 %v6128_v22  ;;  %v2307_v22 = vld [vmem:[%s9476_s5 + $0x288] sm:$0xff] }
 0x23c   :  { %6528 = vrsqrt.f32 %v4719_v31  ;;  %6161 = vmatpush3.bf16.msra.mxu1 %v6160_v0  ;;  %6131 = vmatprep.subr.bf16.mxu0 %v6130_v49  ;;  %v6172_v0 = vpack.c.bf16 %v2271_v54, %v2270_v12  ;;  %v6532_v49 = vld [vmem:[%s9474_s2] sm:$0xff]  ;;  %v6178_v31 = vpack.c.bf16 %v2307_v22, %v2306_v3  ;;  %v2341_v12 = vld [vmem:[%s9476_s5 + $0x398] sm:$0xff]  ;;  %v2343_v22 = vld [vmem:[%s9476_s5 + $0x3a8] sm:$0xff] }
 0x23d   :  { %6163 = vmatprep.subr.bf16.mxu1 %v6162_v47  ;;  %v93_v34 = vrot.slane %v6532_v49, %v7115_v1  ;;  %v2342_v3 = vld [vmem:[%s9476_s5 + $0x3a0] sm:$0xff]  ;;  %v6216_v49 = vpack.c.bf16 %v2325_v44, %v2324_v2  ;;  %v2319_v2 = vld [vmem:[%s9476_s5 + $0x2e8] sm:$0xff]  ;;  %6530 = vrsqrt.f32 %v8353_v11 }
 0x23f   :  { %6133 = vmatpush3.bf16.msra.mxu0 %v6132_v5 }
 0x240   :  { %6165 = vmatpush3.bf16.msra.mxu1 %v6164_v26  ;;  %6135 = vmatprep.subr.bf16.mxu0 %v6134_v33 }
 0x241   :  { %6167 = vmatprep.subr.bf16.mxu1 %v6166_v58 }
 0x243   :  { %6137 = vmatpush3.bf16.msra.mxu0 %v6136_v37  ;;  %v366_v37 = vadd.f32 %v7076_v23, %v93_v34  ;;  %v2292_v23 = vld [vmem:[%s9476_s5 + $0x210] sm:$0xff]  ;;  %v6186_v34 = vpack.c.bf16 %v2311_v4, %v2310_v21 }
 0x244   :  { %6169 = vmatpush3.bf16.msra.mxu1 %v6168_v6  ;;  %6139 = vmatprep.subr.bf16.mxu0 %v6138_v38  ;;  %v6180_v6 = vpack.c.bf16 %v2291_v41, %v2290_v28  ;;  %v2340_v38 = vld [vmem:[%s9476_s5 + $0x390] sm:$0xff]  ;;  %v2347_v28 = vld [vmem:[%s9476_s5 + $0x3c8] sm:$0xff] }
 0x245   :  { %6171 = vmatprep.subr.bf16.mxu1 %v6170_v55  ;;  %v6214_v42 = vpack.c.bf16 %v2341_v12, %v2340_v38  ;;  %v6198_v38 = vpack.c.bf16 %v2317_v25, %v2316_v53  ;;  %v2300_v12 = vld [vmem:[%s9476_s5 + $0x250] sm:$0xff]  ;;  %v2373_v25 = vld [vmem:[%s9476_s5 + $0x498] sm:$0xff] }
 0x246   :  { %v6529_v47 = vpop.eup %6528  ;;  %v2372_v53 = vld [vmem:[%s9476_s5 + $0x490] sm:$0xff] }
 0x247   :  { %v4727_v5 = vmul.f32 %v6529_v47, %v7157_v39  ;;  %v4728_v26 = vmul.f32 %v6529_v47, %v7172_v59  ;;  %v4729_v33 = vmul.f32 %v6529_v47, %v7159_v52  ;;  %v4730_v40 = vmul.f32 %v6529_v47, %v7174_v60  ;;  %6141 = vmatpush3.bf16.msra.mxu0 %v6140_v15 }
 0x248   :  { %v4765_v30 = vmul.f32 %v6529_v47, %v7391_v19  ;;  %v4766_v32 = vmul.f32 %v6529_v47, %v7395_v24  ;;  %v4767_v13 = vmul.f32 %v6529_v47, %v7393_v36  ;;  %v4768_v58 = vmul.f32 %v6529_v47, %v7397_v14  ;;  %6173 = vmatpush3.bf16.msra.mxu1 %v6172_v0  ;;  %v2322_v36 = vld [vmem:[%s9476_s5 + $0x300] sm:$0xff]  ;;  %v2323_v24 = vld [vmem:[%s9476_s5 + $0x308] sm:$0xff] }
 0x249   :  { %v4884_v27 = vpack.c.bf16 %v4728_v26, %v4727_v5  ;;  %v4885_v16 = vpack.c.bf16 %v4730_v40, %v4729_v33  ;;  %6143 = vmatprep.subr.bf16.mxu0 %v6142_v17  ;;  %6175 = vmatprep.subr.bf16.mxu1 %v6174_v8  ;;  %v6210_v19 = vpack.c.bf16 %v2339_v10, %v2338_v18  ;;  %v2294_v17 = vld [vmem:[%s9476_s5 + $0x220] sm:$0xff]  ;;  %v2295_v8 = vld [vmem:[%s9476_s5 + $0x228] sm:$0xff]  ;;  %v2296_v5 = vld [vmem:[%s9476_s5 + $0x230] sm:$0xff] }
 0x24a   :  { %v4887_v14 = vpack.c.bf16 %v4766_v32, %v4765_v30  ;;  %v4888_v56 = vpack.c.bf16 %v4768_v58, %v4767_v13  ;;  %v6212_v55 = vpack.c.bf16 %v2323_v24, %v2322_v36  ;;  %v6184_v0 = vpack.c.bf16 %v2293_v20, %v2292_v23  ;;  %v2297_v26 = vld [vmem:[%s9476_s5 + $0x238] sm:$0xff]  ;;  %v2328_v33 = vld [vmem:[%s9476_s5 + $0x330] sm:$0xff]  ;;  %v2314_v32 = vld [vmem:[%s9476_s5 + $0x2c0] sm:$0xff] }
 0x24b   :  { %v4747_v43 = vrot.slane %v4884_v27, %v4746_v57  ;;  %v4754_v62 = vrot.slane %v4885_v16, %v4746_v57  ;;  %6145 = vmatpush3.bf16.msra.mxu0 %v6144_v9  ;;  %v6218_v47 = vpack.c.bf16 %v2343_v22, %v2342_v3  ;;  %v2313_v9 = vld [vmem:[%s9476_s5 + $0x2b8] sm:$0xff]  ;;  %v2315_v13 = vld [vmem:[%s9476_s5 + $0x2c8] sm:$0xff]  ;;  %v2346_v58 = vld [vmem:[%s9476_s5 + $0x3c0] sm:$0xff]  ;;  %v6192_v41 = vpack.c.bf16 %v2297_v26, %v2296_v5 }
 0x24c   :  { %v4785_v54 = vrot.slane %v4887_v14, %v4746_v57  ;;  %v4792_v48 = vrot.slane %v4888_v56, %v4746_v57  ;;  %6177 = vmatpush3.bf16.msra.mxu1 %v6176_v35  ;;  %6179 = vmatprep.subr.bf16.mxu0 %v6178_v31  ;;  %v2312_v57 = vld [vmem:[%s9476_s5 + $0x2b0] sm:$0xff]  ;;  %v6188_v31 = vpack.c.bf16 %v2295_v8, %v2294_v17  ;;  %v2329_v30 = vld [vmem:[%s9476_s5 + $0x338] sm:$0xff]  ;;  %v2299_v36 = vld [vmem:[%s9476_s5 + $0x248] sm:$0xff] }
 0x24d   :  { %v4755_v7 = vcombine.low %v4747_v43, %v4754_v62  ;;  %6211 = vmatprep.subr.bf16.mxu1 %v6210_v19  ;;  %v2344_v35 = vld [vmem:[%s9476_s5 + $0x3b0] sm:$0xff]  ;;  %v6190_v10 = vpack.c.bf16 %v2313_v9, %v2312_v57  ;;  %v6224_v27 = vpack.c.bf16 %v2329_v30, %v2328_v33  ;;  %v6194_v16 = vpack.c.bf16 %v2315_v13, %v2314_v32  ;;  %v2298_v19 = vld [vmem:[%s9476_s5 + $0x240] sm:$0xff]  ;;  %v2331_v56 = vld [vmem:[%s9476_s5 + $0x348] sm:$0xff] }
 0x24e   :  { %v4793_v15 = vcombine.low %v4785_v54, %v4792_v48  ;;  %3899 = vmatmul.mubr.f32.vlgmr.msra.gmra.mrb[36].mxu0 %v366_v37  ;;  %v2330_v24 = vld [vmem:[%s9476_s5 + $0x340] sm:$0xff]  ;;  %v6226_v14 = vpack.c.bf16 %v2347_v28, %v2346_v58  ;;  %v2348_v37 = vld [vmem:[%s9476_s5 + $0x3d0] sm:$0xff]  ;;  %v2349_v43 = vld [vmem:[%s9476_s5 + $0x3d8] sm:$0xff]  ;;  %v6196_v62 = vpack.c.bf16 %v2299_v36, %v2298_v19 }
 0x24f   :  { %4886 = vst.sshfl [vmem:[%s9477_s9] sm:$0x55 pattern:$0x73625140] %v4755_v7  ;;  %3969 = vmatmul.mubr.f32.vlgmr.msra.gmra.mrb[36].mxu1 %v7078_v29  ;;  %6181 = vmatpush3.bf16.msra.mxu0 %v6180_v6  ;;  %v2326_v29 = vld [vmem:[%s9476_s5 + $0x320] sm:$0xff]  ;;  %v6228_v6 = vpack.c.bf16 %v2331_v56, %v2330_v24  ;;  %v2301_v54 = vld [vmem:[%s9476_s5 + $0x258] sm:$0xff]  ;;  %v2332_v48 = vld [vmem:[%s9476_s5 + $0x350] sm:$0xff] }
 0x250   :  { %4889 = vst.sshfl [vmem:[%s9477_s9 + $0x4] sm:$0x55 pattern:$0x73625140] %v4793_v15  ;;  %4038 = vmatprep.mubr.f32.mxu0 %v7096_v50  ;;  %6213 = vmatpush3.bf16.msra.mxu1 %v6212_v55  ;;  %v2327_v50 = vld [vmem:[%s9476_s5 + $0x328] sm:$0xff]  ;;  %v6230_v55 = vpack.c.bf16 %v2349_v43, %v2348_v37  ;;  %v2333_v23 = vld [vmem:[%s9476_s5 + $0x358] sm:$0xff]  ;;  %v6200_v44 = vpack.c.bf16 %v2301_v54, %v2300_v12 }
 0x251   :  { %4108 = vmatprep.mubr.f32.mxu1 %v7098_v51  ;;  %6183 = vmatprep.subr.bf16.mxu0 %v6182_v63  ;;  %v2345_v51 = vld [vmem:[%s9476_s5 + $0x3b8] sm:$0xff]  ;;  %v6220_v18 = vpack.c.bf16 %v2327_v50, %v2326_v29  ;;  %v2318_v20 = vld [vmem:[%s9476_s5 + $0x2e0] sm:$0xff]  ;;  %v2351_v63 = vld [vmem:[%s9476_s5 + $0x3e8] sm:$0xff]  ;;  %v6232_v21 = vpack.c.bf16 %v2333_v23, %v2332_v48  ;;  %v6246_v48 = vpack.c.bf16 %v2373_v25, %v2372_v53 }
 0x252   :  { %6215 = vmatprep.subr.bf16.mxu1 %v6214_v42  ;;  %v6222_v40 = vpack.c.bf16 %v2345_v51, %v2344_v35  ;;  %v2350_v7 = vld [vmem:[%s9476_s5 + $0x3e0] sm:$0xff]  ;;  %v6202_v4 = vpack.c.bf16 %v2319_v2, %v2318_v20  ;;  %v2303_v42 = vld [vmem:[%s9476_s5 + $0x268] sm:$0xff]  ;;  %v2320_v17 = vld [vmem:[%s9476_s5 + $0x2f0] sm:$0xff] }
 0x253   :  { %6185 = vmatpush3.bf16.msra.mxu0 %v6184_v0  ;;  %v2302_v15 = vld [vmem:[%s9476_s5 + $0x260] sm:$0xff]  ;;  %v2321_v8 = vld [vmem:[%s9476_s5 + $0x2f8] sm:$0xff]  ;;  %v2352_v50 = vld [vmem:[%s9476_s5 + $0x3f0] sm:$0xff] }
 0x254   :  { %6217 = vmatpush3.bf16.msra.mxu1 %v6216_v49  ;;  %6187 = vmatprep.subr.bf16.mxu0 %v6186_v34  ;;  %v2334_v3 = vld [vmem:[%s9476_s5 + $0x360] sm:$0xff]  ;;  %v6234_v49 = vpack.c.bf16 %v2351_v63, %v2350_v7  ;;  %v2335_v34 = vld [vmem:[%s9476_s5 + $0x368] sm:$0xff]  ;;  %v2353_v57 = vld [vmem:[%s9476_s5 + $0x3f8] sm:$0xff]  ;;  %v6204_v51 = vpack.c.bf16 %v2303_v42, %v2302_v15 }
 0x255   :  { %6219 = vmatprep.subr.bf16.mxu1 %v6218_v47  ;;  %v2305_v5 = vld [vmem:[%s9476_s5 + $0x278] sm:$0xff]  ;;  %v2336_v26 = vld [vmem:[%s9476_s5 + $0x370] sm:$0xff]  ;;  %v2370_v32 = vld [vmem:[%s9476_s5 + $0x480] sm:$0xff] }
 0x256   :  { %v2337_v30 = vld [vmem:[%s9476_s5 + $0x378] sm:$0xff]  ;;  %v2371_v13 = vld [vmem:[%s9476_s5 + $0x488] sm:$0xff]  ;;  %v2402_v58 = vld [vmem:[%s9476_s5 + $0x580] sm:$0xff] }
 0x257   :  { %6189 = vmatpush3.bf16.msra.mxu0 %v6188_v31  ;;  %v6236_v31 = vpack.c.bf16 %v2335_v34, %v2334_v3  ;;  %v2403_v28 = vld [vmem:[%s9476_s5 + $0x588] sm:$0xff]  ;;  %v2354_v19 = vld [vmem:[%s9476_s5 + $0x400] sm:$0xff]  ;;  %v2404_v43 = vld [vmem:[%s9476_s5 + $0x590] sm:$0xff] }
 0x258   :  { %6221 = vmatpush3.bf16.msra.mxu1 %v6220_v18  ;;  %6191 = vmatprep.subr.bf16.mxu0 %v6190_v10  ;;  %v6206_v18 = vpack.c.bf16 %v2321_v8, %v2320_v17  ;;  %v2304_v10 = vld [vmem:[%s9476_s5 + $0x270] sm:$0xff]  ;;  %v2355_v36 = vld [vmem:[%s9476_s5 + $0x408] sm:$0xff]  ;;  %v6274_v24 = vpack.c.bf16 %v2403_v28, %v2402_v58  ;;  %v2357_v12 = vld [vmem:[%s9476_s5 + $0x418] sm:$0xff] }
 0x259   :  { %6223 = vmatprep.subr.bf16.mxu1 %v6222_v40  ;;  %v6238_v40 = vpack.c.bf16 %v2353_v57, %v2352_v50  ;;  %v2387_v56 = vld [vmem:[%s9476_s5 + $0x508] sm:$0xff]  ;;  %v6244_v37 = vpack.c.bf16 %v2355_v36, %v2354_v19  ;;  %v2388_v54 = vld [vmem:[%s9476_s5 + $0x510] sm:$0xff]  ;;  %v2374_v23 = vld [vmem:[%s9476_s5 + $0x4a0] sm:$0xff] }
 0x25a   :  { %v2375_v20 = vld [vmem:[%s9476_s5 + $0x4a8] sm:$0xff]  ;;  %v2406_v7 = vld [vmem:[%s9476_s5 + $0x5a0] sm:$0xff]  ;;  %v2409_v34 = vld [vmem:[%s9476_s5 + $0x5b8] sm:$0xff] }
 0x25b   :  { %6193 = vmatpush3.bf16.msra.mxu0 %v6192_v41  ;;  %v6208_v41 = vpack.c.bf16 %v2305_v5, %v2304_v10  ;;  %v2407_v63 = vld [vmem:[%s9476_s5 + $0x5a8] sm:$0xff]  ;;  %v2390_v42 = vld [vmem:[%s9476_s5 + $0x520] sm:$0xff]  ;;  %v2361_v50 = vld [vmem:[%s9476_s5 + $0x438] sm:$0xff] }
 0x25c   :  { %6225 = vmatpush3.bf16.msra.mxu1 %v6224_v27  ;;  %6195 = vmatprep.subr.bf16.mxu0 %v6194_v16  ;;  %v6240_v27 = vpack.c.bf16 %v2337_v30, %v2336_v26  ;;  %v6242_v16 = vpack.c.bf16 %v2371_v13, %v2370_v32  ;;  %v2359_v15 = vld [vmem:[%s9476_s5 + $0x428] sm:$0xff]  ;;  %v6282_v3 = vpack.c.bf16 %v2407_v63, %v2406_v7  ;;  %v2392_v57 = vld [vmem:[%s9476_s5 + $0x530] sm:$0xff]  ;;  %v2362_v30 = vld [vmem:[%s9476_s5 + $0x440] sm:$0xff] }
 0x25d   :  { %6227 = vmatprep.subr.bf16.mxu1 %v6226_v14  ;;  %v2386_v14 = vld [vmem:[%s9476_s5 + $0x500] sm:$0xff]  ;;  %v2411_v10 = vld [vmem:[%s9476_s5 + $0x5c8] sm:$0xff]  ;;  %v2413_v19 = vld [vmem:[%s9476_s5 + $0x5d8] sm:$0xff] }
 0x25e   :  { %v2363_v32 = vld [vmem:[%s9476_s5 + $0x448] sm:$0xff]  ;;  %v2394_v13 = vld [vmem:[%s9476_s5 + $0x540] sm:$0xff]  ;;  %v2365_v53 = vld [vmem:[%s9476_s5 + $0x458] sm:$0xff] }
 0x25f   :  { %6197 = vmatpush3.bf16.msra.mxu0 %v6196_v62  ;;  %v2405_v62 = vld [vmem:[%s9476_s5 + $0x598] sm:$0xff]  ;;  %v2395_v28 = vld [vmem:[%s9476_s5 + $0x548] sm:$0xff]  ;;  %v6260_v36 = vpack.c.bf16 %v2363_v32, %v2362_v30  ;;  %v2396_v25 = vld [vmem:[%s9476_s5 + $0x550] sm:$0xff] }
 0x260   :  { %6229 = vmatpush3.bf16.msra.mxu1 %v6228_v6  ;;  %6199 = vmatprep.subr.bf16.mxu0 %v6198_v38  ;;  %v6276_v6 = vpack.c.bf16 %v2387_v56, %v2386_v14  ;;  %v2356_v38 = vld [vmem:[%s9476_s5 + $0x410] sm:$0xff]  ;;  %v6278_v2 = vpack.c.bf16 %v2405_v62, %v2404_v43  ;;  %v2397_v43 = vld [vmem:[%s9476_s5 + $0x558] sm:$0xff]  ;;  %v2382_v62 = vld [vmem:[%s9476_s5 + $0x4e0] sm:$0xff] }
 0x261   :  { %v4922_v22 = vpop.f32.mrb[24].mxu0  ;;  %v4957_v0 = vpop.f32.mrb[24].mxu1  ;;  %6231 = vmatprep.subr.bf16.mxu1 %v6230_v55  ;;  %v2389_v55 = vld [vmem:[%s9476_s5 + $0x518] sm:$0xff]  ;;  %v2364_v56 = vld [vmem:[%s9476_s5 + $0x450] sm:$0xff]  ;;  %v2418_v30 = vld [vmem:[%s9476_s5 + $0x600] sm:$0xff] }
 0x262   :  { %v4923_v29 = vpop.f32.mrb[25].mxu0  ;;  %v4958_v47 = vpop.f32.mrb[25].mxu1  ;;  %v2419_v32 = vld [vmem:[%s9476_s5 + $0x608] sm:$0xff] }
 0x263   :  { %v4924_v9 = vadd.f32 %v4923_v29, %v4922_v22  ;;  %v4959_v35 = vadd.f32 %v4958_v47, %v4957_v0  ;;  %6201 = vmatpush3.bf16.msra.mxu0 %v6200_v44  ;;  %v6248_v44 = vpack.c.bf16 %v2357_v12, %v2356_v38  ;;  %v2376_v22 = vld [vmem:[%s9476_s5 + $0x4b0] sm:$0xff]  ;;  %v2377_v0 = vld [vmem:[%s9476_s5 + $0x4b8] sm:$0xff]  ;;  %v2414_v38 = vld [vmem:[%s9476_s5 + $0x5e0] sm:$0xff] }
 0x264   :  { %6233 = vmatpush3.bf16.msra.mxu1 %v6232_v21  ;;  %6203 = vmatprep.subr.bf16.mxu0 %v6202_v4  ;;  %v6280_v21 = vpack.c.bf16 %v2389_v55, %v2388_v54  ;;  %v6250_v4 = vpack.c.bf16 %v2375_v20, %v2374_v23  ;;  %v6254_v29 = vpack.c.bf16 %v2377_v0, %v2376_v22  ;;  %v2360_v47 = vld [vmem:[%s9476_s5 + $0x430] sm:$0xff]  ;;  %v2415_v12 = vld [vmem:[%s9476_s5 + $0x5e8] sm:$0xff]  ;;  %v2366_v23 = vld [vmem:[%s9476_s5 + $0x460] sm:$0xff] }
 0x265   :  { %v8652_v33 = vadd.f32 %v4959_v35, %v4924_v9  ;;  %6235 = vmatprep.subr.bf16.mxu1 %v6234_v49  ;;  %v2408_v49 = vld [vmem:[%s9476_s5 + $0x5b0] sm:$0xff]  ;;  %v2393_v35 = vld [vmem:[%s9476_s5 + $0x538] sm:$0xff]  ;;  %v6256_v5 = vpack.c.bf16 %v2361_v50, %v2360_v47  ;;  %v6264_v54 = vpack.c.bf16 %v2365_v53, %v2364_v56  ;;  %v2367_v20 = vld [vmem:[%s9476_s5 + $0x468] sm:$0xff] }
 0x266   :  { %v6286_v9 = vpack.c.bf16 %v2409_v34, %v2408_v49  ;;  %v6288_v26 = vpack.c.bf16 %v2393_v35, %v2392_v57  ;;  %v6268_v0 = vpack.c.bf16 %v2367_v20, %v2366_v23  ;;  %v2401_v57 = vld [vmem:[%s9476_s5 + $0x578] sm:$0xff]  ;;  %v2435_v35 = vld [vmem:[%s9476_s5 + $0x688] sm:$0xff]  ;;  %v2420_v56 = vld [vmem:[%s9476_s5 + $0x610] sm:$0xff] }
 0x267   :  { %6205 = vmatpush3.bf16.msra.mxu0 %v6204_v51  ;;  %v2378_v51 = vld [vmem:[%s9476_s5 + $0x4c0] sm:$0xff]  ;;  %v2421_v53 = vld [vmem:[%s9476_s5 + $0x618] sm:$0xff]  ;;  %v9500_v23 = vld [vmem:[#allocation8_spill] sm:$0xff] }
 0x268   :  { %6237 = vmatpush3.bf16.msra.mxu1 %v6236_v31  ;;  %6207 = vmatprep.subr.bf16.mxu0 %v6206_v18  ;;  %v2379_v31 = vld [vmem:[%s9476_s5 + $0x4c8] sm:$0xff]  ;;  %v2410_v18 = vld [vmem:[%s9476_s5 + $0x5c0] sm:$0xff] }
 0x269   :  { %6239 = vmatprep.subr.bf16.mxu1 %v6238_v40  ;;  %v6258_v40 = vpack.c.bf16 %v2379_v31, %v2378_v51  ;;  %v6290_v58 = vpack.c.bf16 %v2411_v10, %v2410_v18  ;;  %v2466_v51 = vld [vmem:[%s9476_s5 + $0x780] sm:$0xff]  ;;  %v6533_v10 = vld [vmem:[%s9474_s2 + $0x8] sm:$0xff] }
 0x26b   :  { %6209 = vmatpush3.bf16.msra.mxu0 %v6208_v41  ;;  %v2380_v41 = vld [vmem:[%s9476_s5 + $0x4d0] sm:$0xff] }
 0x26c   :  { %6241 = vmatpush3.bf16.msra.mxu1 %v6240_v27  ;;  %6243 = vmatprep.subr.bf16.mxu0 %v6242_v16  ;;  %v2381_v27 = vld [vmem:[%s9476_s5 + $0x4d8] sm:$0xff]  ;;  %v2412_v16 = vld [vmem:[%s9476_s5 + $0x5d0] sm:$0xff] }
 0x26d   :  { %6275 = vmatprep.subr.bf16.mxu1 %v6274_v24  ;;  %v6292_v24 = vpack.c.bf16 %v2395_v28, %v2394_v13  ;;  %v6262_v14 = vpack.c.bf16 %v2381_v27, %v2380_v41  ;;  %v2436_v28 = vld [vmem:[%s9476_s5 + $0x690] sm:$0xff]  ;;  %v2437_v41 = vld [vmem:[%s9476_s5 + $0x698] sm:$0xff]  ;;  %v6308_v27 = vpack.c.bf16 %v2419_v32, %v2418_v30 }
 0x26e   :  { %4039 = vmatmul.mubr.f32.vlgmr.msra.gmra.mrb[38].mxu0 %v7091_v45  ;;  %v2358_v45 = vld [vmem:[%s9476_s5 + $0x420] sm:$0xff]  ;;  %v2444_v30 = vld [vmem:[%s9476_s5 + $0x6d0] sm:$0xff]  ;;  %v2445_v32 = vld [vmem:[%s9476_s5 + $0x6d8] sm:$0xff] }
 0x26f   :  { %4109 = vmatmul.mubr.f32.vlgmr.msra.gmra.mrb[38].mxu1 %v7093_v46  ;;  %6245 = vmatpush3.bf16.msra.mxu0 %v6244_v37  ;;  %v9497_v46 = vld [vmem:[#allocation5_spill] sm:$0xff]  ;;  %v6252_v17 = vpack.c.bf16 %v2359_v15, %v2358_v45  ;;  %v6294_v37 = vpack.c.bf16 %v2413_v19, %v2412_v16  ;;  %v2468_v16 = vld [vmem:[%s9476_s5 + $0x790] sm:$0xff] }
 0x270   :  { %4178 = vmatprep.mubr.f32.mxu0 %v7108_v61  ;;  %6277 = vmatpush3.bf16.msra.mxu1 %v6276_v6  ;;  %v2391_v61 = vld [vmem:[%s9476_s5 + $0x528] sm:$0xff]  ;;  %v2385_v45 = vld [vmem:[%s9476_s5 + $0x4f8] sm:$0xff] }
 0x271   :  { %4248 = vmatprep.mubr.f32.mxu1 %v9497_v46  ;;  %6247 = vmatprep.subr.bf16.mxu0 %v6246_v48  ;;  %v6284_v8 = vpack.c.bf16 %v2391_v61, %v2390_v42  ;;  %v2383_v6 = vld [vmem:[%s9476_s5 + $0x4e8] sm:$0xff]  ;;  %v6296_v48 = vpack.c.bf16 %v2397_v43, %v2396_v25  ;;  %v2416_v46 = vld [vmem:[%s9476_s5 + $0x5f0] sm:$0xff]  ;;  %v2469_v19 = vld [vmem:[%s9476_s5 + $0x798] sm:$0xff] }
 0x272   :  { %6279 = vmatprep.subr.bf16.mxu1 %v6278_v2  ;;  %v6266_v55 = vpack.c.bf16 %v2383_v6, %v2382_v62  ;;  %v2398_v2 = vld [vmem:[%s9476_s5 + $0x560] sm:$0xff]  ;;  %v2452_v25 = vld [vmem:[%s9476_s5 + $0x710] sm:$0xff]  ;;  %v2453_v43 = vld [vmem:[%s9476_s5 + $0x718] sm:$0xff] }
 0x273   :  { %6249 = vmatpush3.bf16.msra.mxu0 %v6248_v44  ;;  %v6298_v44 = vpack.c.bf16 %v2415_v12, %v2414_v38  ;;  %v2438_v62 = vld [vmem:[%s9476_s5 + $0x6a0] sm:$0xff]  ;;  %v2439_v6 = vld [vmem:[%s9476_s5 + $0x6a8] sm:$0xff]  ;;  %v6342_v38 = vpack.c.bf16 %v2469_v19, %v2468_v16  ;;  %v6344_v20 = vpack.c.bf16 %v2453_v43, %v2452_v25  ;;  %v2429_v16 = vld [vmem:[%s9476_s5 + $0x658] sm:$0xff] }
 0x274   :  { %6281 = vmatpush3.bf16.msra.mxu1 %v6280_v21  ;;  %6251 = vmatprep.subr.bf16.mxu0 %v6250_v4  ;;  %v2399_v21 = vld [vmem:[%s9476_s5 + $0x568] sm:$0xff]  ;;  %v2384_v4 = vld [vmem:[%s9476_s5 + $0x4f0] sm:$0xff]  ;;  %v2470_v12 = vld [vmem:[%s9476_s5 + $0x7a0] sm:$0xff] }
 0x275   :  { %6283 = vmatprep.subr.bf16.mxu1 %v6282_v3  ;;  %v2417_v3 = vld [vmem:[%s9476_s5 + $0x5f8] sm:$0xff]  ;;  %v6300_v49 = vpack.c.bf16 %v2399_v21, %v2398_v2  ;;  %v6270_v34 = vpack.c.bf16 %v2385_v45, %v2384_v4  ;;  %v6314_v2 = vpack.c.bf16 %v2439_v6, %v2438_v62  ;;  %v2455_v45 = vld [vmem:[%s9476_s5 + $0x728] sm:$0xff]  ;;  %v2460_v19 = vld [vmem:[%s9476_s5 + $0x750] sm:$0xff] }
 0x276   :  { %v6302_v50 = vpack.c.bf16 %v2417_v3, %v2416_v46  ;;  %v9501_v21 = vld [vmem:[#allocation9_spill] sm:$0xff]  ;;  %v2472_v46 = vld [vmem:[%s9476_s5 + $0x7b0] sm:$0xff]  ;;  %v2479_v25 = vld [vmem:[%s9476_s5 + $0x7e8] sm:$0xff] }
 0x277   :  { %6253 = vmatpush3.bf16.msra.mxu0 %v6252_v17  ;;  %v2368_v17 = vld [vmem:[%s9476_s5 + $0x470] sm:$0xff]  ;;  %v2473_v3 = vld [vmem:[%s9476_s5 + $0x7b8] sm:$0xff]  ;;  %v2430_v6 = vld [vmem:[%s9476_s5 + $0x660] sm:$0xff] }
 0x278   :  { %6285 = vmatpush3.bf16.msra.mxu1 %v6284_v8  ;;  %6255 = vmatprep.subr.bf16.mxu0 %v6254_v29  ;;  %v2369_v8 = vld [vmem:[%s9476_s5 + $0x478] sm:$0xff]  ;;  %v2400_v29 = vld [vmem:[%s9476_s5 + $0x570] sm:$0xff] }
 0x279   :  { %6287 = vmatprep.subr.bf16.mxu1 %v6286_v9  ;;  %v2434_v9 = vld [vmem:[%s9476_s5 + $0x680] sm:$0xff]  ;;  %v6272_v18 = vpack.c.bf16 %v2369_v8, %v2368_v17  ;;  %v2456_v17 = vld [vmem:[%s9476_s5 + $0x730] sm:$0xff]  ;;  %v6350_v8 = vpack.c.bf16 %v2473_v3, %v2472_v46 }
 0x27a   :  { %v2432_v3 = vld [vmem:[%s9476_s5 + $0x670] sm:$0xff] }
 0x27b   :  { %6257 = vmatpush3.bf16.msra.mxu0 %v6256_v5  ;;  %v125_v5 = vrot.slane %v6533_v10, %v7115_v1  ;;  %v2451_v1 = vld [vmem:[%s9476_s5 + $0x708] sm:$0xff] }
 0x27c   :  { %6289 = vmatpush3.bf16.msra.mxu1 %v6288_v26  ;;  %6259 = vmatprep.subr.bf16.mxu0 %v6258_v40  ;;  %v6304_v26 = vpack.c.bf16 %v2401_v57, %v2400_v29  ;;  %v6306_v40 = vpack.c.bf16 %v2435_v35, %v2434_v9  ;;  %v2457_v29 = vld [vmem:[%s9476_s5 + $0x738] sm:$0xff]  ;;  %v2474_v57 = vld [vmem:[%s9476_s5 + $0x7c0] sm:$0xff]  ;;  %v2475_v9 = vld [vmem:[%s9476_s5 + $0x7c8] sm:$0xff] }
 0x27d   :  { %6291 = vmatprep.subr.bf16.mxu1 %v6290_v58  ;;  %v2450_v58 = vld [vmem:[%s9476_s5 + $0x700] sm:$0xff]  ;;  %v2427_v10 = vld [vmem:[%s9476_s5 + $0x648] sm:$0xff] }
 0x27f   :  { %6261 = vmatpush3.bf16.msra.mxu0 %v6260_v36  ;;  %v9498_v36 = vld [vmem:[#allocation3_spill] sm:$0xff] }
 0x280   :  { %6293 = vmatpush3.bf16.msra.mxu1 %v6292_v24  ;;  %6263 = vmatprep.subr.bf16.mxu0 %v6262_v14  ;;  %v650_v24 = vadd.f32 %v9498_v36, %v125_v5  ;;  %v6340_v14 = vpack.c.bf16 %v2451_v1, %v2450_v58  ;;  %v2458_v5 = vld [vmem:[%s9476_s5 + $0x740] sm:$0xff]  ;;  %v2477_v58 = vld [vmem:[%s9476_s5 + $0x7d8] sm:$0xff] }
 0x281   :  { %v4992_v7 = vpop.f32.mrb[26].mxu0  ;;  %v5027_v63 = vpop.f32.mrb[26].mxu1  ;;  %6295 = vmatprep.subr.bf16.mxu1 %v6294_v37  ;;  %v6310_v37 = vpack.c.bf16 %v2437_v41, %v2436_v28  ;;  %v6326_v41 = vpack.c.bf16 %v2445_v32, %v2444_v30  ;;  %v2532_v30 = vld [vmem:[%s9476_s5 + $0x990] sm:$0xff]  ;;  %v2533_v32 = vld [vmem:[%s9476_s5 + $0x998] sm:$0xff] }
 0x282   :  { %v4993_v15 = vpop.f32.mrb[27].mxu0  ;;  %v5028_v42 = vpop.f32.mrb[27].mxu1 }
 0x283   :  { %v4994_v61 = vadd.f32 %v4993_v15, %v4992_v7  ;;  %v5029_v22 = vadd.f32 %v5028_v42, %v5027_v63  ;;  %6265 = vmatpush3.bf16.msra.mxu0 %v6264_v54  ;;  %v2471_v54 = vld [vmem:[%s9476_s5 + $0x7a8] sm:$0xff]  ;;  %v2422_v7 = vld [vmem:[%s9476_s5 + $0x620] sm:$0xff]  ;;  %v2440_v15 = vld [vmem:[%s9476_s5 + $0x6b0] sm:$0xff] }
 0x284   :  { %6297 = vmatpush3.bf16.msra.mxu1 %v6296_v48  ;;  %6267 = vmatprep.subr.bf16.mxu0 %v6266_v55  ;;  %v9499_v48 = vld [vmem:[#allocation4_spill] sm:$0xff]  ;;  %v6312_v55 = vpack.c.bf16 %v2421_v53, %v2420_v56  ;;  %v2423_v63 = vld [vmem:[%s9476_s5 + $0x628] sm:$0xff]  ;;  %v6346_v4 = vpack.c.bf16 %v2471_v54, %v2470_v12  ;;  %v2441_v42 = vld [vmem:[%s9476_s5 + $0x6b8] sm:$0xff] }
 0x285   :  { %v3201_v47 = vadd.f32 %v4994_v61, %v8652_v33  ;;  %6299 = vmatprep.subr.bf16.mxu1 %v6298_v44  ;;  %v2467_v33 = vld [vmem:[%s9476_s5 + $0x788] sm:$0xff]  ;;  %v2454_v44 = vld [vmem:[%s9476_s5 + $0x720] sm:$0xff]  ;;  %v6316_v61 = vpack.c.bf16 %v2423_v63, %v2422_v7  ;;  %v2480_v63 = vld [vmem:[%s9476_s5 + $0x7f0] sm:$0xff] }
 0x286   :  { %v6338_v13 = vpack.c.bf16 %v2467_v33, %v2466_v51  ;;  %v6352_v51 = vpack.c.bf16 %v2457_v29, %v2456_v17  ;;  %v2447_v56 = vld [vmem:[%s9476_s5 + $0x6e8] sm:$0xff]  ;;  %v2478_v53 = vld [vmem:[%s9476_s5 + $0x7e0] sm:$0xff] }
 0x287   :  { %v8866_v31 = vadd.f32 %v5029_v22, %v3201_v47  ;;  %6269 = vmatpush3.bf16.msra.mxu0 %v6268_v0  ;;  %v6348_v22 = vpack.c.bf16 %v2455_v45, %v2454_v44  ;;  %v6318_v0 = vpack.c.bf16 %v2441_v42, %v2440_v15  ;;  %v2442_v47 = vld [vmem:[%s9476_s5 + $0x6c0] sm:$0xff]  ;;  %v2481_v44 = vld [vmem:[%s9476_s5 + $0x7f8] sm:$0xff] }
 0x288   :  { %6301 = vmatpush3.bf16.msra.mxu1 %v6300_v49  ;;  %6271 = vmatprep.subr.bf16.mxu0 %v6270_v34  ;;  %v2424_v49 = vld [vmem:[%s9476_s5 + $0x630] sm:$0xff]  ;;  %v2425_v34 = vld [vmem:[%s9476_s5 + $0x638] sm:$0xff]  ;;  %v2462_v12 = vld [vmem:[%s9476_s5 + $0x760] sm:$0xff] }
 0x289   :  { %6303 = vmatprep.subr.bf16.mxu1 %v6302_v50  ;;  %v2443_v50 = vld [vmem:[%s9476_s5 + $0x6c8] sm:$0xff]  ;;  %v6320_v35 = vpack.c.bf16 %v2425_v34, %v2424_v49  ;;  %v6366_v49 = vpack.c.bf16 %v2481_v44, %v2480_v63  ;;  %v2465_v34 = vld [vmem:[%s9476_s5 + $0x778] sm:$0xff]  ;;  %v2498_v17 = vld [vmem:[%s9476_s5 + $0x880] sm:$0xff] }
 0x28a   :  { %v6322_v33 = vpack.c.bf16 %v2443_v50, %v2442_v47  ;;  %v2530_v29 = vld [vmem:[%s9476_s5 + $0x980] sm:$0xff] }
 0x28b   :  { %6273 = vmatpush3.bf16.msra.mxu0 %v6272_v18  ;;  %v2426_v18 = vld [vmem:[%s9476_s5 + $0x640] sm:$0xff] }
 0x28c   :  { %6305 = vmatpush3.bf16.msra.mxu1 %v6304_v26  ;;  %6307 = vmatprep.subr.bf16.mxu0 %v6306_v40  ;;  %v6354_v26 = vpack.c.bf16 %v2475_v9, %v2474_v57  ;;  %v2459_v40 = vld [vmem:[%s9476_s5 + $0x748] sm:$0xff]  ;;  %v6324_v1 = vpack.c.bf16 %v2427_v10, %v2426_v18  ;;  %v2514_v18 = vld [vmem:[%s9476_s5 + $0x900] sm:$0xff] }
 0x28d   :  { %6339 = vmatprep.subr.bf16.mxu1 %v6338_v13  ;;  %v2476_v13 = vld [vmem:[%s9476_s5 + $0x7d0] sm:$0xff]  ;;  %v6356_v28 = vpack.c.bf16 %v2459_v40, %v2458_v5  ;;  %v2515_v10 = vld [vmem:[%s9476_s5 + $0x908] sm:$0xff] }
 0x28e   :  { %4179 = vmatmul.mubr.f32.vlgmr.msra.gmra.mrb[40].mxu0 %v650_v24  ;;  %v6358_v36 = vpack.c.bf16 %v2477_v58, %v2476_v13  ;;  %v2461_v24 = vld [vmem:[%s9476_s5 + $0x758] sm:$0xff]  ;;  %v2500_v5 = vld [vmem:[%s9476_s5 + $0x890] sm:$0xff]  ;;  %v6404_v13 = vpack.c.bf16 %v2515_v10, %v2514_v18 }
 0x28f   :  { %4249 = vmatmul.mubr.f32.vlgmr.msra.gmra.mrb[40].mxu1 %v9499_v48  ;;  %6309 = vmatpush3.bf16.msra.mxu0 %v6308_v27  ;;  %v2428_v27 = vld [vmem:[%s9476_s5 + $0x650] sm:$0xff]  ;;  %v6360_v43 = vpack.c.bf16 %v2461_v24, %v2460_v19  ;;  %v6362_v48 = vpack.c.bf16 %v2479_v25, %v2478_v53  ;;  %v2503_v19 = vld [vmem:[%s9476_s5 + $0x8a8] sm:$0xff]  ;;  %v6406_v24 = vpack.c.bf16 %v2533_v32, %v2532_v30 }
 0x290   :  { %4318 = vmatprep.mubr.f32.mxu0 %v9500_v23  ;;  %6341 = vmatpush3.bf16.msra.mxu1 %v6340_v14  ;;  %v2446_v14 = vld [vmem:[%s9476_s5 + $0x6e0] sm:$0xff]  ;;  %v2448_v23 = vld [vmem:[%s9476_s5 + $0x6f0] sm:$0xff]  ;;  %v9503_v53 = vld [vmem:[#allocation7_spill] sm:$0xff] }
 0x291   :  { %4388 = vmatprep.mubr.f32.mxu1 %v9501_v21  ;;  %6311 = vmatprep.subr.bf16.mxu0 %v6310_v37  ;;  %v6328_v37 = vpack.c.bf16 %v2429_v16, %v2428_v27  ;;  %v6330_v62 = vpack.c.bf16 %v2447_v56, %v2446_v14  ;;  %v2484_v58 = vld [vmem:[%s9476_s5 + $0x810] sm:$0xff]  ;;  %v2517_v27 = vld [vmem:[%s9476_s5 + $0x918] sm:$0xff]  ;;  %v2502_v16 = vld [vmem:[%s9476_s5 + $0x8a0] sm:$0xff] }
 0x292   :  { %6343 = vmatprep.subr.bf16.mxu1 %v6342_v38  ;;  %v2431_v38 = vld [vmem:[%s9476_s5 + $0x668] sm:$0xff]  ;;  %v2534_v14 = vld [vmem:[%s9476_s5 + $0x9a0] sm:$0xff]  ;;  %v2524_v30 = vld [vmem:[%s9476_s5 + $0x950] sm:$0xff] }
 0x293   :  { %6313 = vmatpush3.bf16.msra.mxu0 %v6312_v55  ;;  %v2463_v55 = vld [vmem:[%s9476_s5 + $0x768] sm:$0xff]  ;;  %v6332_v45 = vpack.c.bf16 %v2431_v38, %v2430_v6  ;;  %v2486_v6 = vld [vmem:[%s9476_s5 + $0x820] sm:$0xff] }
 0x294   :  { %6345 = vmatpush3.bf16.msra.mxu1 %v6344_v20  ;;  %6315 = vmatprep.subr.bf16.mxu0 %v6314_v2  ;;  %v2449_v20 = vld [vmem:[%s9476_s5 + $0x6f8] sm:$0xff]  ;;  %v6364_v42 = vpack.c.bf16 %v2463_v55, %v2462_v12  ;;  %v2535_v56 = vld [vmem:[%s9476_s5 + $0x9a8] sm:$0xff]  ;;  %v2518_v12 = vld [vmem:[%s9476_s5 + $0x920] sm:$0xff] }
 0x295   :  { %6347 = vmatprep.subr.bf16.mxu1 %v6346_v4  ;;  %v6334_v46 = vpack.c.bf16 %v2449_v20, %v2448_v23  ;;  %v2487_v38 = vld [vmem:[%s9476_s5 + $0x828] sm:$0xff]  ;;  %v2504_v23 = vld [vmem:[%s9476_s5 + $0x8b0] sm:$0xff]  ;;  %v2505_v20 = vld [vmem:[%s9476_s5 + $0x8b8] sm:$0xff] }
 0x296   :  { %v2519_v55 = vld [vmem:[%s9476_s5 + $0x928] sm:$0xff]  ;;  %v6380_v63 = vpack.c.bf16 %v2487_v38, %v2486_v6  ;;  %v2544_v38 = vld [vmem:[%s9476_s5 + $0x9f0] sm:$0xff] }
 0x297   :  { %6317 = vmatpush3.bf16.msra.mxu0 %v6316_v61  ;;  %v2433_v61 = vld [vmem:[%s9476_s5 + $0x678] sm:$0xff]  ;;  %v6412_v44 = vpack.c.bf16 %v2519_v55, %v2518_v12 }
 0x298   :  { %6349 = vmatpush3.bf16.msra.mxu1 %v6348_v22  ;;  %6319 = vmatprep.subr.bf16.mxu0 %v6318_v0  ;;  %v2464_v22 = vld [vmem:[%s9476_s5 + $0x770] sm:$0xff]  ;;  %v6336_v50 = vpack.c.bf16 %v2433_v61, %v2432_v3  ;;  %v2506_v3 = vld [vmem:[%s9476_s5 + $0x8c0] sm:$0xff]  ;;  %v2507_v61 = vld [vmem:[%s9476_s5 + $0x8c8] sm:$0xff] }
 0x299   :  { %6351 = vmatprep.subr.bf16.mxu1 %v6350_v8  ;;  %v2499_v8 = vld [vmem:[%s9476_s5 + $0x888] sm:$0xff]  ;;  %v6368_v57 = vpack.c.bf16 %v2465_v34, %v2464_v22  ;;  %v2538_v22 = vld [vmem:[%s9476_s5 + $0x9c0] sm:$0xff]  ;;  %v2545_v12 = vld [vmem:[%s9476_s5 + $0x9f8] sm:$0xff] }
 0x29a   :  { %v6370_v9 = vpack.c.bf16 %v2499_v8, %v2498_v17  ;;  %v6386_v17 = vpack.c.bf16 %v2507_v61, %v2506_v3  ;;  %v2490_v8 = vld [vmem:[%s9476_s5 + $0x840] sm:$0xff] }
 0x29b   :  { %6321 = vmatpush3.bf16.msra.mxu0 %v6320_v35  ;;  %v2482_v35 = vld [vmem:[%s9476_s5 + $0x800] sm:$0xff] }
 0x29c   :  { %6353 = vmatpush3.bf16.msra.mxu1 %v6352_v51  ;;  %6323 = vmatprep.subr.bf16.mxu0 %v6322_v33  ;;  %v2483_v51 = vld [vmem:[%s9476_s5 + $0x808] sm:$0xff] }
 0x29d   :  { %6355 = vmatprep.subr.bf16.mxu1 %v6354_v26  ;;  %v2501_v26 = vld [vmem:[%s9476_s5 + $0x898] sm:$0xff]  ;;  %v6372_v40 = vpack.c.bf16 %v2483_v51, %v2482_v35  ;;  %v2540_v51 = vld [vmem:[%s9476_s5 + $0x9d0] sm:$0xff] }
 0x29e   :  { %v2509_v35 = vld [vmem:[%s9476_s5 + $0x8d8] sm:$0xff] }
 0x29f   :  { %6325 = vmatpush3.bf16.msra.mxu0 %v6324_v1  ;;  %v2485_v1 = vld [vmem:[%s9476_s5 + $0x818] sm:$0xff] }
 0x2a0   :  { %6357 = vmatpush3.bf16.msra.mxu1 %v6356_v28  ;;  %6327 = vmatprep.subr.bf16.mxu0 %v6326_v41  ;;  %v2516_v28 = vld [vmem:[%s9476_s5 + $0x910] sm:$0xff]  ;;  %v6374_v41 = vpack.c.bf16 %v2501_v26, %v2500_v5  ;;  %v6376_v25 = vpack.c.bf16 %v2485_v1, %v2484_v58  ;;  %v2510_v58 = vld [vmem:[%s9476_s5 + $0x8e0] sm:$0xff]  ;;  %v2511_v1 = vld [vmem:[%s9476_s5 + $0x8e8] sm:$0xff] }
 0x2a1   :  { %v5062_v54 = vpop.f32.mrb[28].mxu0  ;;  %6359 = vmatprep.subr.bf16.mxu1 %v6358_v36  ;;  %v9502_v36 = vld [vmem:[#allocation6_spill] sm:$0xff]  ;;  %v2492_v26 = vld [vmem:[%s9476_s5 + $0x850] sm:$0xff] }
 0x2a2   :  { %v5097_v2 = vpop.f32.mrb[28].mxu1  ;;  %v5063_v7 = vpop.f32.mrb[29].mxu0 }
 0x2a3   :  { %v5064_v21 = vadd.f32 %v5063_v7, %v5062_v54  ;;  %v5098_v4 = vpop.f32.mrb[29].mxu1  ;;  %6329 = vmatpush3.bf16.msra.mxu0 %v6328_v37  ;;  %v9504_v37 = vld [vmem:[#allocation12_spill] sm:$0xff]  ;;  %v9505_v54 = vld [vmem:[#allocation13_spill] sm:$0xff] }
 0x2a4   :  { %v5099_v15 = vadd.f32 %v5098_v4, %v5097_v2  ;;  %6361 = vmatpush3.bf16.msra.mxu1 %v6360_v43  ;;  %6331 = vmatprep.subr.bf16.mxu0 %v6330_v62  ;;  %v6408_v43 = vpack.c.bf16 %v2517_v27, %v2516_v28  ;;  %v6378_v62 = vpack.c.bf16 %v2503_v19, %v2502_v16  ;;  %v2536_v2 = vld [vmem:[%s9476_s5 + $0x9b0] sm:$0xff]  ;;  %v2537_v7 = vld [vmem:[%s9476_s5 + $0x9b8] sm:$0xff]  ;;  %v2542_v28 = vld [vmem:[%s9476_s5 + $0x9e0] sm:$0xff] }
 0x2a5   :  { %v3341_v0 = vadd.f32 %v5064_v21, %v8866_v31  ;;  %6363 = vmatprep.subr.bf16.mxu1 %v6362_v48  ;;  %v2531_v31 = vld [vmem:[%s9476_s5 + $0x988] sm:$0xff]  ;;  %v6410_v48 = vpack.c.bf16 %v2535_v56, %v2534_v14  ;;  %v6382_v21 = vpack.c.bf16 %v2505_v20, %v2504_v23  ;;  %v2488_v4 = vld [vmem:[%s9476_s5 + $0x830] sm:$0xff]  ;;  %v6394_v19 = vpack.c.bf16 %v2511_v1, %v2510_v58  ;;  %v2526_v14 = vld [vmem:[%s9476_s5 + $0x960] sm:$0xff] }
 0x2a6   :  { %v6402_v33 = vpack.c.bf16 %v2531_v31, %v2530_v29  ;;  %v2491_v29 = vld [vmem:[%s9476_s5 + $0x848] sm:$0xff]  ;;  %v2522_v31 = vld [vmem:[%s9476_s5 + $0x940] sm:$0xff] }
 0x2a7   :  { %v9069_v47 = vadd.f32 %v5099_v15, %v3341_v0  ;;  %6333 = vmatpush3.bf16.msra.mxu0 %v6332_v45  ;;  %v2489_v45 = vld [vmem:[%s9476_s5 + $0x838] sm:$0xff]  ;;  %v2520_v15 = vld [vmem:[%s9476_s5 + $0x930] sm:$0xff]  ;;  %v2539_v0 = vld [vmem:[%s9476_s5 + $0x9c8] sm:$0xff]  ;;  %v6388_v18 = vpack.c.bf16 %v2491_v29, %v2490_v8 }
 0x2a8   :  { %6365 = vmatpush3.bf16.msra.mxu1 %v6364_v42  ;;  %6335 = vmatprep.subr.bf16.mxu0 %v6334_v46  ;;  %v6414_v42 = vpack.c.bf16 %v2537_v7, %v2536_v2  ;;  %v2521_v46 = vld [vmem:[%s9476_s5 + $0x938] sm:$0xff]  ;;  %v2496_v7 = vld [vmem:[%s9476_s5 + $0x870] sm:$0xff]  ;;  %v2578_v8 = vld [vmem:[%s9476_s5 + $0xb00] sm:$0xff] }
 0x2a9   :  { %6367 = vmatprep.subr.bf16.mxu1 %v6366_v49  ;;  %v6384_v49 = vpack.c.bf16 %v2489_v45, %v2488_v4  ;;  %v6416_v34 = vpack.c.bf16 %v2521_v46, %v2520_v15  ;;  %v6430_v4 = vpack.c.bf16 %v2545_v12, %v2544_v38  ;;  %v2529_v45 = vld [vmem:[%s9476_s5 + $0x978] sm:$0xff]  ;;  %v2562_v15 = vld [vmem:[%s9476_s5 + $0xa80] sm:$0xff]  ;;  %v2579_v29 = vld [vmem:[%s9476_s5 + $0xb08] sm:$0xff] }
 0x2aa   :  { %v2594_v46 = vld [vmem:[%s9476_s5 + $0xb80] sm:$0xff]  ;;  %v2599_v1 = vld [vmem:[%s9476_s5 + $0xba8] sm:$0xff]  ;;  %v2553_v38 = vld [vmem:[%s9476_s5 + $0xa38] sm:$0xff] }
 0x2ab   :  { %6337 = vmatpush3.bf16.msra.mxu0 %v6336_v50  ;;  %v6418_v50 = vpack.c.bf16 %v2539_v0, %v2538_v22  ;;  %v2598_v58 = vld [vmem:[%s9476_s5 + $0xba0] sm:$0xff]  ;;  %v2584_v12 = vld [vmem:[%s9476_s5 + $0xb30] sm:$0xff] }
 0x2ac   :  { %6369 = vmatpush3.bf16.msra.mxu1 %v6368_v57  ;;  %6371 = vmatprep.subr.bf16.mxu0 %v6370_v9  ;;  %v2523_v57 = vld [vmem:[%s9476_s5 + $0x948] sm:$0xff]  ;;  %v2508_v9 = vld [vmem:[%s9476_s5 + $0x8d0] sm:$0xff] }
 0x2ad   :  { %6403 = vmatprep.subr.bf16.mxu1 %v6402_v33  ;;  %v2541_v33 = vld [vmem:[%s9476_s5 + $0x9d8] sm:$0xff]  ;;  %v6420_v10 = vpack.c.bf16 %v2523_v57, %v2522_v31  ;;  %v6390_v5 = vpack.c.bf16 %v2509_v35, %v2508_v9  ;;  %v2564_v31 = vld [vmem:[%s9476_s5 + $0xa90] sm:$0xff] }
 0x2ae   :  { %4319 = vmatmul.mubr.f32.vlgmr.msra.gmra.mrb[42].mxu0 %v9502_v36  ;;  %v6422_v32 = vpack.c.bf16 %v2541_v33, %v2540_v51  ;;  %v2494_v36 = vld [vmem:[%s9476_s5 + $0x860] sm:$0xff]  ;;  %v2596_v9 = vld [vmem:[%s9476_s5 + $0xb90] sm:$0xff]  ;;  %v2597_v35 = vld [vmem:[%s9476_s5 + $0xb98] sm:$0xff]  ;;  %v6468_v51 = vpack.c.bf16 %v2579_v29, %v2578_v8 }
 0x2af   :  { %4389 = vmatmul.mubr.f32.vlgmr.msra.gmra.mrb[42].mxu1 %v9503_v53  ;;  %6373 = vmatpush3.bf16.msra.mxu0 %v6372_v40  ;;  %v2493_v40 = vld [vmem:[%s9476_s5 + $0x858] sm:$0xff]  ;;  %v2548_v33 = vld [vmem:[%s9476_s5 + $0xa10] sm:$0xff] }
 0x2b0   :  { %4458 = vmatprep.mubr.f32.mxu0 %v9504_v37  ;;  %6405 = vmatpush3.bf16.msra.mxu1 %v6404_v13  ;;  %v2525_v13 = vld [vmem:[%s9476_s5 + $0x958] sm:$0xff]  ;;  %v6392_v27 = vpack.c.bf16 %v2493_v40, %v2492_v26  ;;  %v2512_v37 = vld [vmem:[%s9476_s5 + $0x8f0] sm:$0xff]  ;;  %v2566_v40 = vld [vmem:[%s9476_s5 + $0xaa0] sm:$0xff] }
 0x2b1   :  { %4528 = vmatprep.mubr.f32.mxu1 %v9505_v54  ;;  %6375 = vmatprep.subr.bf16.mxu0 %v6374_v41  ;;  %v2543_v41 = vld [vmem:[%s9476_s5 + $0x9e8] sm:$0xff]  ;;  %v6424_v16 = vpack.c.bf16 %v2525_v13, %v2524_v30  ;;  %v2581_v26 = vld [vmem:[%s9476_s5 + $0xb18] sm:$0xff]  ;;  %v6470_v13 = vpack.c.bf16 %v2597_v35, %v2596_v9  ;;  %v2588_v29 = vld [vmem:[%s9476_s5 + $0xb50] sm:$0xff] }
 0x2b2   :  { %6407 = vmatprep.subr.bf16.mxu1 %v6406_v24  ;;  %v2495_v24 = vld [vmem:[%s9476_s5 + $0x868] sm:$0xff]  ;;  %v6426_v53 = vpack.c.bf16 %v2543_v41, %v2542_v28  ;;  %v2557_v8 = vld [vmem:[%s9476_s5 + $0xa58] sm:$0xff]  ;;  %v2606_v35 = vld [vmem:[%s9476_s5 + $0xbe0] sm:$0xff] }
 0x2b3   :  { %6377 = vmatpush3.bf16.msra.mxu0 %v6376_v25  ;;  %v2527_v25 = vld [vmem:[%s9476_s5 + $0x968] sm:$0xff]  ;;  %v6396_v55 = vpack.c.bf16 %v2495_v24, %v2494_v36  ;;  %v2582_v24 = vld [vmem:[%s9476_s5 + $0xb20] sm:$0xff] }
 0x2b4   :  { %6409 = vmatpush3.bf16.msra.mxu1 %v6408_v43  ;;  %6379 = vmatprep.subr.bf16.mxu0 %v6378_v62  ;;  %v2513_v43 = vld [vmem:[%s9476_s5 + $0x8f8] sm:$0xff]  ;;  %v6428_v20 = vpack.c.bf16 %v2527_v25, %v2526_v14  ;;  %v2567_v30 = vld [vmem:[%s9476_s5 + $0xaa8] sm:$0xff]  ;;  %v6474_v14 = vpack.c.bf16 %v2599_v1, %v2598_v58  ;;  %v2600_v25 = vld [vmem:[%s9476_s5 + $0xbb0] sm:$0xff] }
 0x2b5   :  { %6411 = vmatprep.subr.bf16.mxu1 %v6410_v48  ;;  %v6398_v2 = vpack.c.bf16 %v2513_v43, %v2512_v37  ;;  %v9507_v28 = vld [vmem:[#allocation11_spill] sm:$0xff]  ;;  %v2576_v58 = vld [vmem:[%s9476_s5 + $0xaf0] sm:$0xff]  ;;  %v2577_v1 = vld [vmem:[%s9476_s5 + $0xaf8] sm:$0xff] }
 0x2b6   :  { %v2551_v36 = vld [vmem:[%s9476_s5 + $0xa28] sm:$0xff] }
 0x2b7   :  { %6381 = vmatpush3.bf16.msra.mxu0 %v6380_v63  ;;  %v2497_v63 = vld [vmem:[%s9476_s5 + $0x878] sm:$0xff]  ;;  %v2575_v9 = vld [vmem:[%s9476_s5 + $0xae8] sm:$0xff] }
 0x2b8   :  { %6413 = vmatpush3.bf16.msra.mxu1 %v6412_v44  ;;  %6383 = vmatprep.subr.bf16.mxu0 %v6382_v21  ;;  %v2528_v44 = vld [vmem:[%s9476_s5 + $0x970] sm:$0xff]  ;;  %v6400_v61 = vpack.c.bf16 %v2497_v63, %v2496_v7 }
 0x2b9   :  { %6415 = vmatprep.subr.bf16.mxu1 %v6414_v42  ;;  %v2563_v42 = vld [vmem:[%s9476_s5 + $0xa88] sm:$0xff]  ;;  %v6432_v22 = vpack.c.bf16 %v2529_v45, %v2528_v44  ;;  %v2586_v45 = vld [vmem:[%s9476_s5 + $0xb40] sm:$0xff] }
 0x2ba   :  { %v6434_v0 = vpack.c.bf16 %v2563_v42, %v2562_v15  ;;  %v2587_v42 = vld [vmem:[%s9476_s5 + $0xb48] sm:$0xff] }
 0x2bb   :  { %6385 = vmatpush3.bf16.msra.mxu0 %v6384_v49  ;;  %v2546_v49 = vld [vmem:[%s9476_s5 + $0xa00] sm:$0xff] }
 0x2bc   :  { %6417 = vmatpush3.bf16.msra.mxu1 %v6416_v34  ;;  %6387 = vmatprep.subr.bf16.mxu0 %v6386_v17  ;;  %v2547_v34 = vld [vmem:[%s9476_s5 + $0xa08] sm:$0xff] }
 0x2bd   :  { %6419 = vmatprep.subr.bf16.mxu1 %v6418_v50  ;;  %v2565_v50 = vld [vmem:[%s9476_s5 + $0xa98] sm:$0xff]  ;;  %v6436_v57 = vpack.c.bf16 %v2547_v34, %v2546_v49  ;;  %v6484_v49 = vpack.c.bf16 %v2587_v42, %v2586_v45 }
 0x2bf   :  { %6389 = vmatpush3.bf16.msra.mxu0 %v6388_v18  ;;  %v2549_v18 = vld [vmem:[%s9476_s5 + $0xa18] sm:$0xff] }
 0x2c0   :  { %6421 = vmatpush3.bf16.msra.mxu1 %v6420_v10  ;;  %6391 = vmatprep.subr.bf16.mxu0 %v6390_v5  ;;  %v2580_v10 = vld [vmem:[%s9476_s5 + $0xb10] sm:$0xff]  ;;  %v6438_v5 = vpack.c.bf16 %v2565_v50, %v2564_v31  ;;  %v6440_v41 = vpack.c.bf16 %v2549_v18, %v2548_v33  ;;  %v2589_v50 = vld [vmem:[%s9476_s5 + $0xb58] sm:$0xff] }
 0x2c1   :  { %v5132_v56 = vpop.f32.mrb[30].mxu0  ;;  %6423 = vmatprep.subr.bf16.mxu1 %v6422_v32  ;;  %v9506_v32 = vld [vmem:[#allocation10_spill] sm:$0xff]  ;;  %v6488_v18 = vpack.c.bf16 %v2589_v50, %v2588_v29 }
 0x2c2   :  { %v5167_v62 = vpop.f32.mrb[30].mxu1  ;;  %v5133_v6 = vpop.f32.mrb[31].mxu0 }
 0x2c3   :  { %v5134_v54 = vadd.f32 %v5133_v6, %v5132_v56  ;;  %v5168_v48 = vpop.f32.mrb[31].mxu1  ;;  %6393 = vmatpush3.bf16.msra.mxu0 %v6392_v27  ;;  %v6472_v27 = vpack.c.bf16 %v2581_v26, %v2580_v10  ;;  %v2568_v56 = vld [vmem:[%s9476_s5 + $0xab0] sm:$0xff]  ;;  %v2559_v26 = vld [vmem:[%s9476_s5 + $0xa68] sm:$0xff] }
 0x2c4   :  { %v5169_v23 = vadd.f32 %v5168_v48, %v5167_v62  ;;  %6425 = vmatpush3.bf16.msra.mxu1 %v6424_v16  ;;  %6395 = vmatprep.subr.bf16.mxu0 %v6394_v19  ;;  %v6442_v16 = vpack.c.bf16 %v2567_v30, %v2566_v40  ;;  %v2550_v19 = vld [vmem:[%s9476_s5 + $0xa20] sm:$0xff]  ;;  %v2552_v6 = vld [vmem:[%s9476_s5 + $0xa30] sm:$0xff]  ;;  %v2585_v48 = vld [vmem:[%s9476_s5 + $0xb38] sm:$0xff] }
 0x2c5   :  { %v3481_v21 = vadd.f32 %v5134_v54, %v9069_v47  ;;  %6427 = vmatprep.subr.bf16.mxu1 %v6426_v53  ;;  %v2595_v47 = vld [vmem:[%s9476_s5 + $0xb88] sm:$0xff]  ;;  %v2569_v53 = vld [vmem:[%s9476_s5 + $0xab8] sm:$0xff]  ;;  %v6444_v37 = vpack.c.bf16 %v2551_v36, %v2550_v19  ;;  %v6448_v7 = vpack.c.bf16 %v2553_v38, %v2552_v6  ;;  %v6480_v63 = vpack.c.bf16 %v2585_v48, %v2584_v12  ;;  %v2590_v40 = vld [vmem:[%s9476_s5 + $0xb60] sm:$0xff] }
 0x2c6   :  { %v6466_v17 = vpack.c.bf16 %v2595_v47, %v2594_v46  ;;  %v6446_v62 = vpack.c.bf16 %v2569_v53, %v2568_v56  ;;  %v2572_v46 = vld [vmem:[%s9476_s5 + $0xad0] sm:$0xff]  ;;  %v2573_v47 = vld [vmem:[%s9476_s5 + $0xad8] sm:$0xff]  ;;  %v6462_v56 = vpack.c.bf16 %v2577_v1, %v2576_v58 }
 0x2c7   :  { %v9268_v3 = vadd.f32 %v5169_v23, %v3481_v21  ;;  %6397 = vmatpush3.bf16.msra.mxu0 %v6396_v55  ;;  %v2570_v55 = vld [vmem:[%s9476_s5 + $0xac0] sm:$0xff]  ;;  %v2571_v23 = vld [vmem:[%s9476_s5 + $0xac8] sm:$0xff]  ;;  %v6454_v34 = vpack.c.bf16 %v2573_v47, %v2572_v46  ;;  %v2560_v53 = vld [vmem:[%s9476_s5 + $0xa70] sm:$0xff] }
 0x2c8   :  { %6429 = vmatpush3.bf16.msra.mxu1 %v6428_v20  ;;  %6399 = vmatprep.subr.bf16.mxu0 %v6398_v2  ;;  %v2602_v20 = vld [vmem:[%s9476_s5 + $0xbc0] sm:$0xff]  ;;  %v2603_v2 = vld [vmem:[%s9476_s5 + $0xbc8] sm:$0xff]  ;;  %v6450_v44 = vpack.c.bf16 %v2571_v23, %v2570_v55 }
 0x2c9   :  { %6431 = vmatprep.subr.bf16.mxu1 %v6430_v4  ;;  %v2554_v21 = vld [vmem:[%s9476_s5 + $0xa40] sm:$0xff]  ;;  %v2555_v4 = vld [vmem:[%s9476_s5 + $0xa48] sm:$0xff]  ;;  %v6482_v15 = vpack.c.bf16 %v2603_v2, %v2602_v20 }
 0x2cb   :  { %6401 = vmatpush3.bf16.msra.mxu0 %v6400_v61  ;;  %v2604_v61 = vld [vmem:[%s9476_s5 + $0xbd0] sm:$0xff] }
 0x2cc   :  { %6433 = vmatpush3.bf16.msra.mxu1 %v6432_v22  ;;  %6435 = vmatprep.subr.bf16.mxu0 %v6434_v0  ;;  %v2605_v22 = vld [vmem:[%s9476_s5 + $0xbd8] sm:$0xff]  ;;  %v6452_v0 = vpack.c.bf16 %v2555_v4, %v2554_v21 }
 0x2cd   :  { %6467 = vmatprep.subr.bf16.mxu1 %v6466_v17  ;;  %v2556_v17 = vld [vmem:[%s9476_s5 + $0xa50] sm:$0xff]  ;;  %v6486_v31 = vpack.c.bf16 %v2605_v22, %v2604_v61 }
 0x2ce   :  { %4459 = vmatmul.mubr.f32.vlgmr.msra.gmra.mrb[44].mxu0 %v9506_v32  ;;  %v6456_v33 = vpack.c.bf16 %v2557_v8, %v2556_v17 }
 0x2cf   :  { %4529 = vmatmul.mubr.f32.vlgmr.msra.gmra.mrb[44].mxu1 %v9507_v28  ;;  %6437 = vmatpush3.bf16.msra.mxu0 %v6436_v57  ;;  %v2574_v57 = vld [vmem:[%s9476_s5 + $0xae0] sm:$0xff] }
 0x2d0   :  { %4598 = vmatprep.mubr.f32.mxu0 %v7172_v59  ;;  %6469 = vmatpush3.bf16.msra.mxu1 %v6468_v51  ;;  %v2583_v59 = vld [vmem:[%s9476_s5 + $0xb28] sm:$0xff]  ;;  %v6458_v10 = vpack.c.bf16 %v2575_v9, %v2574_v57 }
 0x2d1   :  { %4668 = vmatprep.mubr.f32.mxu1 %v7174_v60  ;;  %6439 = vmatprep.subr.bf16.mxu0 %v6438_v5  ;;  %v2601_v60 = vld [vmem:[%s9476_s5 + $0xbb8] sm:$0xff]  ;;  %v6476_v43 = vpack.c.bf16 %v2583_v59, %v2582_v24  ;;  %v2607_v51 = vld [vmem:[%s9476_s5 + $0xbe8] sm:$0xff]  ;;  %v2558_v5 = vld [vmem:[%s9476_s5 + $0xa60] sm:$0xff] }
 0x2d2   :  { %6471 = vmatprep.subr.bf16.mxu1 %v6470_v13  ;;  %v6478_v54 = vpack.c.bf16 %v2601_v60, %v2600_v25  ;;  %v6490_v32 = vpack.c.bf16 %v2607_v51, %v2606_v35  ;;  %v2591_v13 = vld [vmem:[%s9476_s5 + $0xb68] sm:$0xff]  ;;  %v6460_v24 = vpack.c.bf16 %v2559_v26, %v2558_v5  ;;  %v2561_v25 = vld [vmem:[%s9476_s5 + $0xa78] sm:$0xff] }
 0x2d3   :  { %6441 = vmatpush3.bf16.msra.mxu0 %v6440_v41  ;;  %v6492_v59 = vpack.c.bf16 %v2591_v13, %v2590_v40  ;;  %v6464_v38 = vpack.c.bf16 %v2561_v25, %v2560_v53 }
 0x2d4   :  { %6473 = vmatpush3.bf16.msra.mxu1 %v6472_v27  ;;  %6443 = vmatprep.subr.bf16.mxu0 %v6442_v16  ;;  %v2608_v27 = vld [vmem:[%s9476_s5 + $0xbf0] sm:$0xff]  ;;  %v2609_v16 = vld [vmem:[%s9476_s5 + $0xbf8] sm:$0xff] }
 0x2d5   :  { %6475 = vmatprep.subr.bf16.mxu1 %v6474_v14 }
 0x2d7   :  { %6445 = vmatpush3.bf16.msra.mxu0 %v6444_v37  ;;  %v6494_v37 = vpack.c.bf16 %v2609_v16, %v2608_v27 }
 0x2d8   :  { %6477 = vmatpush3.bf16.msra.mxu1 %v6476_v43  ;;  %6447 = vmatprep.subr.bf16.mxu0 %v6446_v62  ;;  %v2592_v43 = vld [vmem:[%s9476_s5 + $0xb70] sm:$0xff]  ;;  %v2593_v62 = vld [vmem:[%s9476_s5 + $0xb78] sm:$0xff] }
 0x2d9   :  { %6479 = vmatprep.subr.bf16.mxu1 %v6478_v54  ;;  %v6496_v12 = vpack.c.bf16 %v2593_v62, %v2592_v43 }
 0x2db   :  { %6449 = vmatpush3.bf16.msra.mxu0 %v6448_v7 }
 0x2dc   :  { %6481 = vmatpush3.bf16.msra.mxu1 %v6480_v63  ;;  %6451 = vmatprep.subr.bf16.mxu0 %v6450_v44 }
 0x2dd   :  { %6483 = vmatprep.subr.bf16.mxu1 %v6482_v15 }
 0x2df   :  { %6453 = vmatpush3.bf16.msra.mxu0 %v6452_v0 }
 0x2e0   :  { %6485 = vmatpush3.bf16.msra.mxu1 %v6484_v49  ;;  %6455 = vmatprep.subr.bf16.mxu0 %v6454_v34 }
 0x2e1   :  { %v5202_v30 = vpop.f32.mrb[32].mxu0  ;;  %6487 = vmatprep.subr.bf16.mxu1 %v6486_v31 }
 0x2e2   :  { %v5237_v28 = vpop.f32.mrb[32].mxu1  ;;  %v5203_v41 = vpop.f32.mrb[33].mxu0 }
 0x2e3   :  { %v5204_v19 = vadd.f32 %v5203_v41, %v5202_v30  ;;  %v5238_v36 = vpop.f32.mrb[33].mxu1  ;;  %6457 = vmatpush3.bf16.msra.mxu0 %v6456_v33 }
 0x2e4   :  { %v5239_v14 = vadd.f32 %v5238_v36, %v5237_v28  ;;  %6489 = vmatpush3.bf16.msra.mxu1 %v6488_v18  ;;  %6459 = vmatprep.subr.bf16.mxu0 %v6458_v10 }
 0x2e5   :  { %v3621_v60 = vadd.f32 %v5204_v19, %v9268_v3  ;;  %6491 = vmatprep.subr.bf16.mxu1 %v6490_v32  ;;  %v6531_v19 = vpop.eup %6530 }
 0x2e6   :  { %v4711_v36 = vmul.f32 %v6531_v19, %v8353_v11 }
 0x2e7   :  { %v3691_v6 = vadd.f32 %v5239_v14, %v3621_v60  ;;  %6461 = vmatpush3.bf16.msra.mxu0 %v6460_v24  ;;  %v4715_v14 = vand.u32 2147483648, %v8353_v11 }
 0x2e8   :  { %6493 = vmatpush3.bf16.msra.mxu1 %v6492_v59  ;;  %6463 = vmatprep.subr.bf16.mxu0 %v6462_v56  ;;  %v4713_v24 = vsel %vm4712_vm4, %v8353_v11, %v4711_v36 }
 0x2e9   :  { %6495 = vmatprep.subr.bf16.mxu1 %v6494_v37  ;;  %v4716_v25 = vsel %vm4714_vm5, %v4715_v14, %v4713_v24 }
 0x2eb   :  { %6465 = vmatpush3.bf16.msra.mxu0 %v6464_v38  ;;  %v4883_v38 = vld [vmem:[%s9478_s7] ss:$0 sm:$0xff] }
 0x2ec   :  { %6497 = vmatpush3.bf16.msra.mxu1 %v6496_v12 }
 0x2ee   :  { %4599 = vmatmul.mubr.f32.vlgmr.msra.gmra.mrb[46].mxu0 %v7157_v39 }
 0x2ef   :  { %4669 = vmatmul.mubr.f32.vlgmr.msra.gmra.mrb[46].mxu1 %v7159_v52 }
 0x301   :  { %v5272_v3 = vpop.f32.mrb[34].mxu0 }
 0x302   :  { %v5307_v54 = vpop.f32.mrb[34].mxu1  ;;  %v5273_v48 = vpop.f32.mrb[35].mxu0 }
 0x303   :  { %v5274_v55 = vadd.f32 %v5273_v48, %v5272_v3  ;;  %v5308_v23 = vpop.f32.mrb[35].mxu1  ;;  %v9508_v3 = vld [vmem:[#allocation2_spill] sm:$0xff] }
 0x304   :  { %v5309_v20 = vadd.f32 %v5308_v23, %v5307_v54  ;;  %vm4721_vm6 = vcmp.eq.s32.totalorder %v9508_v3, 10 }
 0x305   :  { %v3761_v2 = vadd.f32 %v5274_v55, %v3691_v6  ;;  %v4717_v6 = vmax.f32 %v4716_v25, 10.0 }
 0x307   :  { %v3831_v7 = vadd.f32 %v5309_v20, %v3761_v2  ;;  %v4718_v48 = vmin.f32 %v4717_v6, 110.0 }
 0x321   :  { %v5342_v63 = vpop.f32.mrb[36].mxu0 }
 0x322   :  { %v5377_v44 = vpop.f32.mrb[36].mxu1  ;;  %v5343_v21 = vpop.f32.mrb[37].mxu0 }
 0x323   :  { %v5344_v4 = vadd.f32 %v5343_v21, %v5342_v63  ;;  %v5378_v45 = vpop.f32.mrb[37].mxu1 }
 0x324   :  { %v5379_v15 = vadd.f32 %v5378_v45, %v5377_v44 }
 0x325   :  { %v3901_v42 = vadd.f32 %v5344_v4, %v3831_v7 }
 0x327   :  { %v3971_v46 = vadd.f32 %v5379_v15, %v3901_v42 }
 0x341   :  { %v5412_v47 = vpop.f32.mrb[38].mxu0 }
 0x342   :  { %v5447_v39 = vpop.f32.mrb[38].mxu1  ;;  %v5413_v61 = vpop.f32.mrb[39].mxu0 }
 0x343   :  { %v5414_v52 = vadd.f32 %v5413_v61, %v5412_v47  ;;  %v5448_v22 = vpop.f32.mrb[39].mxu1 }
 0x344   :  { %v5449_v0 = vadd.f32 %v5448_v22, %v5447_v39 }
 0x345   :  { %v4041_v49 = vadd.f32 %v5414_v52, %v3971_v46 }
 0x347   :  { %v4111_v34 = vadd.f32 %v5449_v0, %v4041_v49 }
 0x361   :  { %v5482_v17 = vpop.f32.mrb[40].mxu0 }
 0x362   :  { %v5517_v8 = vpop.f32.mrb[40].mxu1  ;;  %v5483_v29 = vpop.f32.mrb[41].mxu0 }
 0x363   :  { %v5484_v31 = vadd.f32 %v5483_v29, %v5482_v17  ;;  %v5518_v50 = vpop.f32.mrb[41].mxu1 }
 0x364   :  { %v5519_v57 = vadd.f32 %v5518_v50, %v5517_v8 }
 0x365   :  { %v4181_v9 = vadd.f32 %v5484_v31, %v4111_v34 }
 0x367   :  { %v4251_v35 = vadd.f32 %v5519_v57, %v4181_v9 }
 0x381   :  { %v5552_v51 = vpop.f32.mrb[42].mxu0 }
 0x382   :  { %v5587_v33 = vpop.f32.mrb[42].mxu1  ;;  %v5553_v18 = vpop.f32.mrb[43].mxu0 }
 0x383   :  { %v5554_v10 = vadd.f32 %v5553_v18, %v5552_v51  ;;  %v5588_v5 = vpop.f32.mrb[43].mxu1 }
 0x384   :  { %v5589_v26 = vadd.f32 %v5588_v5, %v5587_v33 }
 0x385   :  { %v4321_v40 = vadd.f32 %v5554_v10, %v4251_v35 }
 0x387   :  { %v4391_v30 = vadd.f32 %v5589_v26, %v4321_v40 }
 0x3a1   :  { %v5622_v32 = vpop.f32.mrb[44].mxu0 }
 0x3a2   :  { %v5657_v13 = vpop.f32.mrb[44].mxu1  ;;  %v5623_v58 = vpop.f32.mrb[45].mxu0 }
 0x3a3   :  { %v5624_v1 = vadd.f32 %v5623_v58, %v5622_v32  ;;  %v5658_v28 = vpop.f32.mrb[45].mxu1 }
 0x3a4   :  { %v5659_v41 = vadd.f32 %v5658_v28, %v5657_v13 }
 0x3a5   :  { %v4461_v27 = vadd.f32 %v5624_v1, %v4391_v30 }
 0x3a7   :  { %v4531_v16 = vadd.f32 %v5659_v41, %v4461_v27 }
 0x3c1   :  { %v5692_v59 = vpop.f32.mrb[46].mxu0 }
 0x3c2   :  { %v5727_v56 = vpop.f32.mrb[46].mxu1  ;;  %v5693_v53 = vpop.f32.mrb[47].mxu0 }
 0x3c3   :  { %v5694_v60 = vadd.f32 %v5693_v53, %v5692_v59  ;;  %v5728_v37 = vpop.f32.mrb[47].mxu1 }
 0x3c4   :  { %v5729_v43 = vadd.f32 %v5728_v37, %v5727_v56 }
 0x3c5   :  { %v4601_v62 = vadd.f32 %v5694_v60, %v4531_v16 }
 0x3c7   :  { %v4671_v12 = vadd.f32 %v5729_v43, %v4601_v62 }
 0x3c9   :  { %v4681_v54 = vadd.f32 %v4883_v38, %v4671_v12 }
 0x3cb   :  { %v4724_v55 = vsel %vm4721_vm6, %v4718_v48, %v4681_v54 }
 0x3cc   :  { %4726 = vst.msk [vmem:[%s9479_s8] sm:$0x3] %vm4725_vm7, %v4724_v55 }

</bundles_post_ra>
